<compile_context>
chip_gen: v7x
topology: tpu7x:2x2x1
jax: 0.10.0
libtpu: 0.0.40
codegen_flags: <defaults>
</compile_context>

<pallas_src>
import functools

import jax
import jax.numpy as jnp
from jax.experimental import pallas as pl
from jax.experimental.pallas import tpu as pltpu

LRELU_SLOPE = 0.2
BN_EPS = 1e-5
TAIL_COUT_PAD = 8     # tail Cout 1 -> 8 sublanes (host keeps row 0)


def _round_up(x, m):
    return ((x + m - 1) // m) * m


def _full_spec(shape):
    zeros = (0,) * len(shape)
    return pl.BlockSpec(shape, lambda i: zeros)


def _wdisc_fused_kernel(*refs, n_layers, ksize, wp_stride, lc, shift_off,
                        inv_nhw, dims):
    """head -> body -> tail, everything resident in VMEM (channel-major).

    refs = (mask, x, w_0..w_{L-1}, b_tail, gamma_0..gamma_{L-2},
            beta_0..beta_{L-2}, out, act_scratch, col_scratch)

    Activations are (C, N*Hp*Wp) flat-padded; output pixel (n, oy, ox) lives
    at flat column j = n*Hp*Wp + oy*Wp + ox (top-left anchored), so tap
    (dy, dx) is the contiguous lane shift dy*Wp + dx and every conv is ONE
    transposed MXU matmul y^T = W^T @ col.
    """
    L = n_layers
    KK = ksize * ksize

    mask_ref = refs[0]
    x_ref = refs[1]
    w_refs = refs[2:2 + L]
    b_tail_ref = refs[2 + L]
    g_refs = refs[3 + L:3 + L + (L - 1)]
    be_refs = refs[3 + L + (L - 1):3 + L + 2 * (L - 1)]
    n_in = 3 + L + 2 * (L - 1)
    o_ref, act_ref, col_ref = refs[n_in], refs[n_in + 1], refs[n_in + 2]

    # Zero the activation scratch ONCE.  Every layer only overwrites the
    # interior columns [shift_off, shift_off + lc), so the untouched zero
    # border / zero tail provide the conv zero padding of the next layer.
    act_ref[...] = jnp.zeros_like(act_ref)

    mask = mask_ref[...]                    # (1, lc) f32, 1 on valid pixels

    src_ref = x_ref
    for li in range(L):
        cinp, coutp = dims[li]

        # im2col via flat contiguous shifts: full-width unmasked col stores,
        # statically-offset (rotated) loads from the bf16 activation buffer.
        for tap in range(KK):
            dy, dx = divmod(tap, ksize)
            off = dy * wp_stride + dx
            col_ref[tap * cinp:(tap + 1) * cinp, :] = src_ref[:, off:off + lc]

        # ONE transposed MXU matmul per conv, bf16 x bf16 -> f32 accumulate:
        # (coutp, KK*cinp) @ (KK*cinp, lc) -> (coutp, lc).
        y = jnp.dot(w_refs[li][...], col_ref[0:KK * cinp, :],
                    preferred_element_type=jnp.float32)

        if li < L - 1:
            # Conv bias skipped: it cancels exactly under the BN mean.
            # Single-pass masked BatchNorm2d statistics (training-mode batch
            # stats, biased variance), f32 accumulation.
            ym = y * mask
            s1 = jnp.sum(ym, axis=1, keepdims=True)
            s2 = jnp.sum(ym * ym, axis=1, keepdims=True)
            mean = s1 * inv_nhw
            var = s2 * inv_nhw - mean * mean
            scale = g_refs[li][...] * jax.lax.rsqrt(var + BN_EPS)
            shift = be_refs[li][...] - mean * scale
            y = y * scale + shift
            y = jnp.where(y > 0, y, LRELU_SLOPE * y)
            # Mask out garbage columns, then write the interior of the next
            # layer's padded grid (a constant lane shift of +shift_off); the
            # border / tail of act_ref stay zero from the single init above.
            act_ref[:, shift_off:shift_off + lc] = (y * mask).astype(
                act_ref.dtype)
            src_ref = act_ref
        else:
            # Tail: bare conv + bias; tiny lane-dense (coutp, lc) f32 store.
            o_ref[...] = (y + b_tail_ref[...]).astype(o_ref.dtype)


def init_wdiscriminator_params(key, *, nc_im, nfc, min_nfc, num_layer, ksize):
    """Per-layer (w[kh,kw,cin,cout], b[cout], gamma[cout], beta[cout]), f32."""
    layer_chans = [(nc_im, nfc)]                       # head
    Nc = nfc
    for i in range(num_layer - 2):                     # body
        Nc = int(nfc / (2 ** (i + 1)))
        layer_chans.append((max(2 * Nc, min_nfc), max(Nc, min_nfc)))
    layer_chans.append((max(Nc, min_nfc), 1))          # tail

    raw = []
    for cin, cout in layer_chans:
        key, kw_, kb_ = jax.random.split(key, 3)
        w = jax.random.normal(kw_, (ksize, ksize, cin, cout), jnp.float32) * 0.1
        b = jax.random.normal(kb_, (cout,), jnp.float32) * 0.1
        gamma = jnp.ones((cout,), jnp.float32)         # BN weight default init
        beta = jnp.zeros((cout,), jnp.float32)         # BN bias default init
        raw.append((w, b, gamma, beta))
    return raw


def pack_params(raw_params, *, ksize):
    """Repack parameters for the fused, transposed-matmul kernel.

    * weights  -> bf16 (cout_pad, KK*cin_pad)  (transposed, zero-padded chans)
    * BN gamma/beta -> f32 (cout_pad, 1), ZERO padded (keeps padded channels
      exactly zero through BN)
    * tail bias -> f32 (TAIL_COUT_PAD, 1)
    Conv biases of BN layers are dropped (cancelled by the BN mean).
    """
    KK = ksize * ksize
    L = len(raw_params)

    cin0 = raw_params[0][0].shape[2]
    cin0_p = _round_up(cin0, 8)
    c_pad = 8                                          # uniform hidden width
    for li, (w, _, _, _) in enumerate(raw_params):
        _, _, cin, cout = w.shape
        if li > 0:
            c_pad = max(c_pad, _round_up(cin, 8))
        if li < L - 1:
            c_pad = max(c_pad, _round_up(cout, 8))

    dims, w_list, gammas, betas = [], [], [], []
    b_tail = None
    for li, (w, b, g, be) in enumerate(raw_params):
        _, _, cin, cout = w.shape
        cinp = cin0_p if li == 0 else c_pad
        coutp = TAIL_COUT_PAD if li == L - 1 else c_pad
        wp = jnp.zeros((KK, cinp, coutp), jnp.float32)
        wp = wp.at[:, :cin, :cout].set(w.reshape(KK, cin, cout))
        wt = jnp.transpose(wp, (2, 0, 1)).reshape(coutp, KK * cinp)
        w_list.append(wt.astype(jnp.bfloat16))
        dims.append((cinp, coutp))
        if li == L - 1:
            b_tail = jnp.zeros((coutp, 1), jnp.float32).at[:cout, 0].set(b)
        else:
            gammas.append(
                jnp.zeros((coutp, 1), jnp.float32).at[:cout, 0].set(g))
            betas.append(
                jnp.zeros((coutp, 1), jnp.float32).at[:cout, 0].set(be))
    return dims, w_list, b_tail, gammas, betas


def wdiscriminator_forward(x_nchw, packed, *, ksize, pad):
    """NCHW in / NCHW out, the whole network in one pallas_call."""
    dims, w_list, b_tail, gammas, betas = packed
    L = len(dims)
    N, C, H, W = x_nchw.shape
    KK = ksize * ksize

    assert 2 * pad == ksize - 1, "flat-shift kernel assumes same-padding convs"

    Hp, Wp = H + 2 * pad, W + 2 * pad
    l_flat = N * Hp * Wp
    max_off = (ksize - 1) * Wp + (ksize - 1)
    lc = _round_up((N - 1) * Hp * Wp + H * Wp, 128)    # lane-dense col count
    la = _round_up(max(l_flat, lc + max_off), 128)     # padded act length
    shift_off = pad * Wp + pad
    nhw = N * H * W

    # Host prep (once): NCHW -> channel-major flat padded grid, bf16.
    cin0_p = dims[0][0]
    xt = jnp.transpose(x_nchw, (1, 0, 2, 3)).astype(jnp.float32)   # (C,N,H,W)
    xt = jnp.pad(xt, ((0, cin0_p - C), (0, 0), (pad, pad), (pad, pad)))
    x_flat = xt.reshape(cin0_p, l_flat)
    x_flat = jnp.pad(x_flat, ((0, 0), (0, la - l_flat))).astype(jnp.bfloat16)

    # 0/1 mask of valid (non-garbage) output columns, shared by all layers.
    jj = jnp.arange(lc, dtype=jnp.int32)
    rem = jj % (Hp * Wp)
    mask = ((jj // (Hp * Wp) < N) & (rem // Wp < H) & (rem % Wp < W))
    mask = mask.astype(jnp.float32).reshape(1, lc)

    c_act = max(co for _, co in dims[:L - 1])
    c_col = max(ci for ci, _ in dims)

    kernel = functools.partial(
        _wdisc_fused_kernel, n_layers=L, ksize=ksize, wp_stride=Wp, lc=lc,
        shift_off=shift_off, inv_nhw=1.0 / nhw, dims=tuple(dims))

    inputs = ([mask, x_flat] + list(w_list) + [b_tail]
              + list(gammas) + list(betas))
    out_sds = jax.ShapeDtypeStruct((dims[-1][1], lc), jnp.float32)

    y = pl.pallas_call(
        kernel,
        out_shape=out_sds,
        grid=(1,),
        in_specs=[_full_spec(a.shape) for a in inputs],
        out_specs=_full_spec(out_sds.shape),
        scratch_shapes=[
            pltpu.VMEM((c_act, la), jnp.bfloat16),        # activations
            pltpu.VMEM((KK * c_col, lc), jnp.bfloat16),   # transposed im2col
        ],
        compiler_params=pltpu.CompilerParams(
            dimension_semantics=("arbitrary",)),
    )(*inputs)

    # Row 0 = the single tail channel; gather the valid interior per image.
    row = y[0]
    imgs = [row[n * Hp * Wp: n * Hp * Wp + H * Wp].reshape(H, Wp)[:, :W]
            for n in range(N)]
    return jnp.stack(imgs)[:, None, :, :]


def _reference_forward(x_nchw, raw_params, *, ksize, pad):
    """Pure-JAX reference (lax conv; bf16 matmul inputs / f32 accumulation to
    mirror the kernel's precision choice; BN/LeakyReLU in f32)."""
    x = jnp.transpose(x_nchw, (0, 2, 3, 1)).astype(jnp.float32)
    L = len(raw_params)
    for li, (w, b, g, be) in enumerate(raw_params):
        y = jax.lax.conv_general_dilated(
            x.astype(jnp.bfloat16), w.astype(jnp.bfloat16),
            window_strides=(1, 1), padding=[(pad, pad), (pad, pad)],
            dimension_numbers=('NHWC', 'HWIO', 'NHWC'),
            preferred_element_type=jnp.float32)
        y = y + b.reshape(1, 1, 1, -1)   # bias (cancels under BN for li < L-1)
        if li < L - 1:
            mean = jnp.mean(y, axis=(0, 1, 2), keepdims=True)
            var = jnp.mean((y - mean) ** 2, axis=(0, 1, 2), keepdims=True)
            y = (y - mean) * jax.lax.rsqrt(var + BN_EPS)
            y = y * g.reshape(1, 1, 1, -1) + be.reshape(1, 1, 1, -1)
            y = jnp.where(y > 0, y, LRELU_SLOPE * y)
        x = y
    return jnp.transpose(x, (0, 3, 1, 2))


if __name__ == "__main__":
    # opt: nc_im=3, nfc=32, min_nfc=32, num_layer=5, ker_size=3, padd_size=1
    nc_im, nfc, min_nfc, num_layer, ksize, pad = 3, 32, 32, 5, 3, 1
    batch, spatial = 2, 16

    key = jax.random.PRNGKey(0)
    kx, kp = jax.random.split(key)
    x = jax.random.normal(kx, (batch, nc_im, spatial, spatial), jnp.float32)

    raw = init_wdiscriminator_params(
        kp, nc_im=nc_im, nfc=nfc, min_nfc=min_nfc,
        num_layer=num_layer, ksize=ksize)
    packed = pack_params(raw, ksize=ksize)

    out = wdiscriminator_forward(x, packed, ksize=ksize, pad=pad)
    out = jax.block_until_ready(out)

    ref = jax.block_until_ready(
        _reference_forward(x, raw, ksize=ksize, pad=pad))

    assert out.shape == (batch, 1, spatial, spatial), out.shape
    max_err = float(jnp.max(jnp.abs(out - ref)))
    assert jnp.allclose(out, ref, atol=1e-2, rtol=1e-2), max_err

    print("KERNEL_OK")
</pallas_src>

<mosaic_0001>
module attributes {stable_mosaic.version = 11 : i64} {
  func.func @_wdisc_fused_kernel(%arg0: i32, %arg1: memref<1x640xf32, #tpu.memory_space<vmem>>, %arg2: memref<8x768xbf16, #tpu.memory_space<vmem>>, %arg3: memref<32x72xbf16, #tpu.memory_space<vmem>>, %arg4: memref<32x288xbf16, #tpu.memory_space<vmem>>, %arg5: memref<32x288xbf16, #tpu.memory_space<vmem>>, %arg6: memref<32x288xbf16, #tpu.memory_space<vmem>>, %arg7: memref<8x288xbf16, #tpu.memory_space<vmem>>, %arg8: memref<8x1xf32, #tpu.memory_space<vmem>>, %arg9: memref<32x1xf32, #tpu.memory_space<vmem>>, %arg10: memref<32x1xf32, #tpu.memory_space<vmem>>, %arg11: memref<32x1xf32, #tpu.memory_space<vmem>>, %arg12: memref<32x1xf32, #tpu.memory_space<vmem>>, %arg13: memref<32x1xf32, #tpu.memory_space<vmem>>, %arg14: memref<32x1xf32, #tpu.memory_space<vmem>>, %arg15: memref<32x1xf32, #tpu.memory_space<vmem>>, %arg16: memref<32x1xf32, #tpu.memory_space<vmem>>, %arg17: memref<8x640xf32, #tpu.memory_space<vmem>>, %arg18: memref<32x768xbf16, #tpu.memory_space<vmem>>, %arg19: memref<288x640xbf16, #tpu.memory_space<vmem>>) attributes {dimension_semantics = [#tpu.dimension_semantics<arbitrary>], iteration_bounds = array<i64: 1>, scalar_prefetch = 0 : i64, scratch_operands = 2 : i64, tpu.core_type = #tpu.core_type<tc>, window_params = [{pipeline_mode = #tpu.pipeline_mode<synchronous>, transform_indices = @transform_0, window_bounds = array<i64: 1, 640>}, {pipeline_mode = #tpu.pipeline_mode<synchronous>, transform_indices = @transform_1, window_bounds = array<i64: 8, 768>}, {pipeline_mode = #tpu.pipeline_mode<synchronous>, transform_indices = @transform_2, window_bounds = array<i64: 32, 72>}, {pipeline_mode = #tpu.pipeline_mode<synchronous>, transform_indices = @transform_3, window_bounds = array<i64: 32, 288>}, {pipeline_mode = #tpu.pipeline_mode<synchronous>, transform_indices = @transform_4, window_bounds = array<i64: 32, 288>}, {pipeline_mode = #tpu.pipeline_mode<synchronous>, transform_indices = @transform_5, window_bounds = array<i64: 32, 288>}, {pipeline_mode = #tpu.pipeline_mode<synchronous>, transform_indices = @transform_6, window_bounds = array<i64: 8, 288>}, {pipeline_mode = #tpu.pipeline_mode<synchronous>, transform_indices = @transform_7, window_bounds = array<i64: 8, 1>}, {pipeline_mode = #tpu.pipeline_mode<synchronous>, transform_indices = @transform_8, window_bounds = array<i64: 32, 1>}, {pipeline_mode = #tpu.pipeline_mode<synchronous>, transform_indices = @transform_9, window_bounds = array<i64: 32, 1>}, {pipeline_mode = #tpu.pipeline_mode<synchronous>, transform_indices = @transform_10, window_bounds = array<i64: 32, 1>}, {pipeline_mode = #tpu.pipeline_mode<synchronous>, transform_indices = @transform_11, window_bounds = array<i64: 32, 1>}, {pipeline_mode = #tpu.pipeline_mode<synchronous>, transform_indices = @transform_12, window_bounds = array<i64: 32, 1>}, {pipeline_mode = #tpu.pipeline_mode<synchronous>, transform_indices = @transform_13, window_bounds = array<i64: 32, 1>}, {pipeline_mode = #tpu.pipeline_mode<synchronous>, transform_indices = @transform_14, window_bounds = array<i64: 32, 1>}, {pipeline_mode = #tpu.pipeline_mode<synchronous>, transform_indices = @transform_15, window_bounds = array<i64: 32, 1>}, {pipeline_mode = #tpu.pipeline_mode<synchronous>, transform_indices = @transform_16, window_bounds = array<i64: 8, 640>}]} {
    %cst = arith.constant 0.000000e+00 : bf16
    %0 = vector.broadcast %cst : bf16 to vector<32x768xbf16>
    %c0 = arith.constant 0 : index
    %c0_0 = arith.constant 0 : index
    %1 = vector.load %arg18[%c0, %c0_0] : memref<32x768xbf16, #tpu.memory_space<vmem>>, vector<32x768xbf16>
    tpu.vector_store %arg18[%c0, %c0_0], %0 {strides = array<i32>} : memref<32x768xbf16, #tpu.memory_space<vmem>>, vector<32x768xbf16>,
    %c0_1 = arith.constant 0 : index
    %c0_2 = arith.constant 0 : index
    %2 = vector.load %arg1[%c0_1, %c0_2] : memref<1x640xf32, #tpu.memory_space<vmem>>, vector<1x640xf32>
    %c0_3 = arith.constant 0 : index
    %c0_4 = arith.constant 0 : index
    %3 = vector.load %arg2[%c0_3, %c0_4] : memref<8x768xbf16, #tpu.memory_space<vmem>>, vector<8x640xbf16>
    %c0_5 = arith.constant 0 : index
    %c0_6 = arith.constant 0 : index
    %4 = vector.load %arg19[%c0_5, %c0_6] : memref<288x640xbf16, #tpu.memory_space<vmem>>, vector<8x640xbf16>
    tpu.vector_store %arg19[%c0_5, %c0_6], %3 {strides = array<i32>} : memref<288x640xbf16, #tpu.memory_space<vmem>>, vector<8x640xbf16>,
    %c0_7 = arith.constant 0 : index
    %c1 = arith.constant 1 : index
    %5 = vector.load %arg2[%c0_7, %c1] : memref<8x768xbf16, #tpu.memory_space<vmem>>, vector<8x640xbf16>
    %c8 = arith.constant 8 : index
    %c0_8 = arith.constant 0 : index
    %6 = vector.load %arg19[%c8, %c0_8] : memref<288x640xbf16, #tpu.memory_space<vmem>>, vector<8x640xbf16>
    tpu.vector_store %arg19[%c8, %c0_8], %5 {strides = array<i32>} : memref<288x640xbf16, #tpu.memory_space<vmem>>, vector<8x640xbf16>,
    %c0_9 = arith.constant 0 : index
    %c2 = arith.constant 2 : index
    %7 = vector.load %arg2[%c0_9, %c2] : memref<8x768xbf16, #tpu.memory_space<vmem>>, vector<8x640xbf16>
    %c16 = arith.constant 16 : index
    %c0_10 = arith.constant 0 : index
    %8 = vector.load %arg19[%c16, %c0_10] : memref<288x640xbf16, #tpu.memory_space<vmem>>, vector<8x640xbf16>
    tpu.vector_store %arg19[%c16, %c0_10], %7 {strides = array<i32>} : memref<288x640xbf16, #tpu.memory_space<vmem>>, vector<8x640xbf16>,
    %c0_11 = arith.constant 0 : index
    %c18 = arith.constant 18 : index
    %9 = vector.load %arg2[%c0_11, %c18] : memref<8x768xbf16, #tpu.memory_space<vmem>>, vector<8x640xbf16>
    %c24 = arith.constant 24 : index
    %c0_12 = arith.constant 0 : index
    %10 = vector.load %arg19[%c24, %c0_12] : memref<288x640xbf16, #tpu.memory_space<vmem>>, vector<8x640xbf16>
    tpu.vector_store %arg19[%c24, %c0_12], %9 {strides = array<i32>} : memref<288x640xbf16, #tpu.memory_space<vmem>>, vector<8x640xbf16>,
    %c0_13 = arith.constant 0 : index
    %c19 = arith.constant 19 : index
    %11 = vector.load %arg2[%c0_13, %c19] : memref<8x768xbf16, #tpu.memory_space<vmem>>, vector<8x640xbf16>
    %c32 = arith.constant 32 : index
    %c0_14 = arith.constant 0 : index
    %12 = vector.load %arg19[%c32, %c0_14] : memref<288x640xbf16, #tpu.memory_space<vmem>>, vector<8x640xbf16>
    tpu.vector_store %arg19[%c32, %c0_14], %11 {strides = array<i32>} : memref<288x640xbf16, #tpu.memory_space<vmem>>, vector<8x640xbf16>,
    %c0_15 = arith.constant 0 : index
    %c20 = arith.constant 20 : index
    %13 = vector.load %arg2[%c0_15, %c20] : memref<8x768xbf16, #tpu.memory_space<vmem>>, vector<8x640xbf16>
    %c40 = arith.constant 40 : index
    %c0_16 = arith.constant 0 : index
    %14 = vector.load %arg19[%c40, %c0_16] : memref<288x640xbf16, #tpu.memory_space<vmem>>, vector<8x640xbf16>
    tpu.vector_store %arg19[%c40, %c0_16], %13 {strides = array<i32>} : memref<288x640xbf16, #tpu.memory_space<vmem>>, vector<8x640xbf16>,
    %c0_17 = arith.constant 0 : index
    %c36 = arith.constant 36 : index
    %15 = vector.load %arg2[%c0_17, %c36] : memref<8x768xbf16, #tpu.memory_space<vmem>>, vector<8x640xbf16>
    %c48 = arith.constant 48 : index
    %c0_18 = arith.constant 0 : index
    %16 = vector.load %arg19[%c48, %c0_18] : memref<288x640xbf16, #tpu.memory_space<vmem>>, vector<8x640xbf16>
    tpu.vector_store %arg19[%c48, %c0_18], %15 {strides = array<i32>} : memref<288x640xbf16, #tpu.memory_space<vmem>>, vector<8x640xbf16>,
    %c0_19 = arith.constant 0 : index
    %c37 = arith.constant 37 : index
    %17 = vector.load %arg2[%c0_19, %c37] : memref<8x768xbf16, #tpu.memory_space<vmem>>, vector<8x640xbf16>
    %c56 = arith.constant 56 : index
    %c0_20 = arith.constant 0 : index
    %18 = vector.load %arg19[%c56, %c0_20] : memref<288x640xbf16, #tpu.memory_space<vmem>>, vector<8x640xbf16>
    tpu.vector_store %arg19[%c56, %c0_20], %17 {strides = array<i32>} : memref<288x640xbf16, #tpu.memory_space<vmem>>, vector<8x640xbf16>,
    %c0_21 = arith.constant 0 : index
    %c38 = arith.constant 38 : index
    %19 = vector.load %arg2[%c0_21, %c38] : memref<8x768xbf16, #tpu.memory_space<vmem>>, vector<8x640xbf16>
    %c64 = arith.constant 64 : index
    %c0_22 = arith.constant 0 : index
    %20 = vector.load %arg19[%c64, %c0_22] : memref<288x640xbf16, #tpu.memory_space<vmem>>, vector<8x640xbf16>
    tpu.vector_store %arg19[%c64, %c0_22], %19 {strides = array<i32>} : memref<288x640xbf16, #tpu.memory_space<vmem>>, vector<8x640xbf16>,
    %c0_23 = arith.constant 0 : index
    %c0_24 = arith.constant 0 : index
    %21 = vector.load %arg3[%c0_23, %c0_24] : memref<32x72xbf16, #tpu.memory_space<vmem>>, vector<32x72xbf16>
    %c0_25 = arith.constant 0 : index
    %c0_26 = arith.constant 0 : index
    %22 = vector.load %arg19[%c0_25, %c0_26] : memref<288x640xbf16, #tpu.memory_space<vmem>>, vector<72x640xbf16>
    %cst_27 = arith.constant dense<0.000000e+00> : vector<32x640xf32>
    %23 = tpu.matmul %21, %22, %cst_27 {dimension_numbers = #tpu.dot_dimension_numbers<[1], [0], [0], [1], [0, 0, 1, 1], [], []>} : vector<32x72xbf16>, vector<72x640xbf16>, vector<32x640xf32> -> vector<32x640xf32>
    %24 = vector.broadcast %2 : vector<1x640xf32> to vector<32x640xf32>
    %25 = arith.mulf %23, %24 : vector<32x640xf32>
    %cst_28 = arith.constant dense<0.000000e+00> : vector<32xf32>
    %26 = vector.multi_reduction <add>, %25, %cst_28 [1] : vector<32x640xf32> to vector<32xf32>
    %27 = vector.shape_cast %26 : vector<32xf32> to vector<32x1xf32>
    %28 = arith.mulf %25, %25 : vector<32x640xf32>
    %cst_29 = arith.constant dense<0.000000e+00> : vector<32xf32>
    %29 = vector.multi_reduction <add>, %28, %cst_29 [1] : vector<32x640xf32> to vector<32xf32>
    %30 = vector.shape_cast %29 : vector<32xf32> to vector<32x1xf32>
    %cst_30 = arith.constant 0.001953125 : f32
    %31 = vector.broadcast %cst_30 : f32 to vector<32x1xf32>
    %32 = arith.mulf %27, %31 : vector<32x1xf32>
    %cst_31 = arith.constant 0.001953125 : f32
    %33 = vector.broadcast %cst_31 : f32 to vector<32x1xf32>
    %34 = arith.mulf %30, %33 : vector<32x1xf32>
    %35 = arith.mulf %32, %32 : vector<32x1xf32>
    %36 = arith.subf %34, %35 : vector<32x1xf32>
    %c0_32 = arith.constant 0 : index
    %c0_33 = arith.constant 0 : index
    %37 = vector.load %arg9[%c0_32, %c0_33] : memref<32x1xf32, #tpu.memory_space<vmem>>, vector<32x1xf32>
    %cst_34 = arith.constant 9.99999974E-6 : f32
    %38 = vector.broadcast %cst_34 : f32 to vector<32x1xf32>
    %39 = arith.addf %36, %38 : vector<32x1xf32>
    %40 = math.rsqrt %39 : vector<32x1xf32>
    %41 = arith.mulf %37, %40 : vector<32x1xf32>
    %c0_35 = arith.constant 0 : index
    %c0_36 = arith.constant 0 : index
    %42 = vector.load %arg13[%c0_35, %c0_36] : memref<32x1xf32, #tpu.memory_space<vmem>>, vector<32x1xf32>
    %43 = arith.mulf %32, %41 : vector<32x1xf32>
    %44 = arith.subf %42, %43 : vector<32x1xf32>
    %45 = vector.broadcast %41 : vector<32x1xf32> to vector<32x640xf32>
    %46 = arith.mulf %23, %45 : vector<32x640xf32>
    %47 = vector.broadcast %44 : vector<32x1xf32> to vector<32x640xf32>
    %48 = arith.addf %46, %47 : vector<32x640xf32>
    %cst_37 = arith.constant 0.000000e+00 : f32
    %49 = vector.broadcast %cst_37 : f32 to vector<32x640xf32>
    %50 = arith.cmpf ogt, %48, %49 : vector<32x640xf32>
    %cst_38 = arith.constant 2.000000e-01 : f32
    %51 = vector.broadcast %cst_38 : f32 to vector<32x640xf32>
    %52 = arith.mulf %51, %48 : vector<32x640xf32>
    %53 = arith.select %50, %48, %52 : vector<32x640xi1>, vector<32x640xf32>
    %54 = vector.broadcast %2 : vector<1x640xf32> to vector<32x640xf32>
    %55 = arith.mulf %53, %54 : vector<32x640xf32>
    %56 = arith.truncf %55 : vector<32x640xf32> to vector<32x640xbf16>
    %c0_39 = arith.constant 0 : index
    %c19_40 = arith.constant 19 : index
    %57 = vector.load %arg18[%c0_39, %c19_40] : memref<32x768xbf16, #tpu.memory_space<vmem>>, vector<32x640xbf16>
    tpu.vector_store %arg18[%c0_39, %c19_40], %56 {strides = array<i32>} : memref<32x768xbf16, #tpu.memory_space<vmem>>, vector<32x640xbf16>,
    %c0_41 = arith.constant 0 : index
    %c0_42 = arith.constant 0 : index
    %58 = vector.load %arg18[%c0_41, %c0_42] : memref<32x768xbf16, #tpu.memory_space<vmem>>, vector<32x640xbf16>
    %c0_43 = arith.constant 0 : index
    %c0_44 = arith.constant 0 : index
    %59 = vector.load %arg19[%c0_43, %c0_44] : memref<288x640xbf16, #tpu.memory_space<vmem>>, vector<32x640xbf16>
    tpu.vector_store %arg19[%c0_43, %c0_44], %58 {strides = array<i32>} : memref<288x640xbf16, #tpu.memory_space<vmem>>, vector<32x640xbf16>,
    %c0_45 = arith.constant 0 : index
    %c1_46 = arith.constant 1 : index
    %60 = vector.load %arg18[%c0_45, %c1_46] : memref<32x768xbf16, #tpu.memory_space<vmem>>, vector<32x640xbf16>
    %c32_47 = arith.constant 32 : index
    %c0_48 = arith.constant 0 : index
    %61 = vector.load %arg19[%c32_47, %c0_48] : memref<288x640xbf16, #tpu.memory_space<vmem>>, vector<32x640xbf16>
    tpu.vector_store %arg19[%c32_47, %c0_48], %60 {strides = array<i32>} : memref<288x640xbf16, #tpu.memory_space<vmem>>, vector<32x640xbf16>,
    %c0_49 = arith.constant 0 : index
    %c2_50 = arith.constant 2 : index
    %62 = vector.load %arg18[%c0_49, %c2_50] : memref<32x768xbf16, #tpu.memory_space<vmem>>, vector<32x640xbf16>
    %c64_51 = arith.constant 64 : index
    %c0_52 = arith.constant 0 : index
    %63 = vector.load %arg19[%c64_51, %c0_52] : memref<288x640xbf16, #tpu.memory_space<vmem>>, vector<32x640xbf16>
    tpu.vector_store %arg19[%c64_51, %c0_52], %62 {strides = array<i32>} : memref<288x640xbf16, #tpu.memory_space<vmem>>, vector<32x640xbf16>,
    %c0_53 = arith.constant 0 : index
    %c18_54 = arith.constant 18 : index
    %64 = vector.load %arg18[%c0_53, %c18_54] : memref<32x768xbf16, #tpu.memory_space<vmem>>, vector<32x640xbf16>
    %c96 = arith.constant 96 : index
    %c0_55 = arith.constant 0 : index
    %65 = vector.load %arg19[%c96, %c0_55] : memref<288x640xbf16, #tpu.memory_space<vmem>>, vector<32x640xbf16>
    tpu.vector_store %arg19[%c96, %c0_55], %64 {strides = array<i32>} : memref<288x640xbf16, #tpu.memory_space<vmem>>, vector<32x640xbf16>,
    %c0_56 = arith.constant 0 : index
    %c19_57 = arith.constant 19 : index
    %66 = vector.load %arg18[%c0_56, %c19_57] : memref<32x768xbf16, #tpu.memory_space<vmem>>, vector<32x640xbf16>
    %c128 = arith.constant 128 : index
    %c0_58 = arith.constant 0 : index
    %67 = vector.load %arg19[%c128, %c0_58] : memref<288x640xbf16, #tpu.memory_space<vmem>>, vector<32x640xbf16>
    tpu.vector_store %arg19[%c128, %c0_58], %66 {strides = array<i32>} : memref<288x640xbf16, #tpu.memory_space<vmem>>, vector<32x640xbf16>,
    %c0_59 = arith.constant 0 : index
    %c20_60 = arith.constant 20 : index
    %68 = vector.load %arg18[%c0_59, %c20_60] : memref<32x768xbf16, #tpu.memory_space<vmem>>, vector<32x640xbf16>
    %c160 = arith.constant 160 : index
    %c0_61 = arith.constant 0 : index
    %69 = vector.load %arg19[%c160, %c0_61] : memref<288x640xbf16, #tpu.memory_space<vmem>>, vector<32x640xbf16>
    tpu.vector_store %arg19[%c160, %c0_61], %68 {strides = array<i32>} : memref<288x640xbf16, #tpu.memory_space<vmem>>, vector<32x640xbf16>,
    %c0_62 = arith.constant 0 : index
    %c36_63 = arith.constant 36 : index
    %70 = vector.load %arg18[%c0_62, %c36_63] : memref<32x768xbf16, #tpu.memory_space<vmem>>, vector<32x640xbf16>
    %c192 = arith.constant 192 : index
    %c0_64 = arith.constant 0 : index
    %71 = vector.load %arg19[%c192, %c0_64] : memref<288x640xbf16, #tpu.memory_space<vmem>>, vector<32x640xbf16>
    tpu.vector_store %arg19[%c192, %c0_64], %70 {strides = array<i32>} : memref<288x640xbf16, #tpu.memory_space<vmem>>, vector<32x640xbf16>,
    %c0_65 = arith.constant 0 : index
    %c37_66 = arith.constant 37 : index
    %72 = vector.load %arg18[%c0_65, %c37_66] : memref<32x768xbf16, #tpu.memory_space<vmem>>, vector<32x640xbf16>
    %c224 = arith.constant 224 : index
    %c0_67 = arith.constant 0 : index
    %73 = vector.load %arg19[%c224, %c0_67] : memref<288x640xbf16, #tpu.memory_space<vmem>>, vector<32x640xbf16>
    tpu.vector_store %arg19[%c224, %c0_67], %72 {strides = array<i32>} : memref<288x640xbf16, #tpu.memory_space<vmem>>, vector<32x640xbf16>,
    %c0_68 = arith.constant 0 : index
    %c38_69 = arith.constant 38 : index
    %74 = vector.load %arg18[%c0_68, %c38_69] : memref<32x768xbf16, #tpu.memory_space<vmem>>, vector<32x640xbf16>
    %c256 = arith.constant 256 : index
    %c0_70 = arith.constant 0 : index
    %75 = vector.load %arg19[%c256, %c0_70] : memref<288x640xbf16, #tpu.memory_space<vmem>>, vector<32x640xbf16>
    tpu.vector_store %arg19[%c256, %c0_70], %74 {strides = array<i32>} : memref<288x640xbf16, #tpu.memory_space<vmem>>, vector<32x640xbf16>,
    %c0_71 = arith.constant 0 : index
    %c0_72 = arith.constant 0 : index
    %76 = vector.load %arg4[%c0_71, %c0_72] : memref<32x288xbf16, #tpu.memory_space<vmem>>, vector<32x288xbf16>
    %c0_73 = arith.constant 0 : index
    %c0_74 = arith.constant 0 : index
    %77 = vector.load %arg19[%c0_73, %c0_74] : memref<288x640xbf16, #tpu.memory_space<vmem>>, vector<288x640xbf16>
    %cst_75 = arith.constant dense<0.000000e+00> : vector<32x640xf32>
    %78 = tpu.matmul %76, %77, %cst_75 {dimension_numbers = #tpu.dot_dimension_numbers<[1], [0], [0], [1], [0, 0, 1, 1], [], []>} : vector<32x288xbf16>, vector<288x640xbf16>, vector<32x640xf32> -> vector<32x640xf32>
    %79 = vector.broadcast %2 : vector<1x640xf32> to vector<32x640xf32>
    %80 = arith.mulf %78, %79 : vector<32x640xf32>
    %cst_76 = arith.constant dense<0.000000e+00> : vector<32xf32>
    %81 = vector.multi_reduction <add>, %80, %cst_76 [1] : vector<32x640xf32> to vector<32xf32>
    %82 = vector.shape_cast %81 : vector<32xf32> to vector<32x1xf32>
    %83 = arith.mulf %80, %80 : vector<32x640xf32>
    %cst_77 = arith.constant dense<0.000000e+00> : vector<32xf32>
    %84 = vector.multi_reduction <add>, %83, %cst_77 [1] : vector<32x640xf32> to vector<32xf32>
    %85 = vector.shape_cast %84 : vector<32xf32> to vector<32x1xf32>
    %cst_78 = arith.constant 0.001953125 : f32
    %86 = vector.broadcast %cst_78 : f32 to vector<32x1xf32>
    %87 = arith.mulf %82, %86 : vector<32x1xf32>
    %cst_79 = arith.constant 0.001953125 : f32
    %88 = vector.broadcast %cst_79 : f32 to vector<32x1xf32>
    %89 = arith.mulf %85, %88 : vector<32x1xf32>
    %90 = arith.mulf %87, %87 : vector<32x1xf32>
    %91 = arith.subf %89, %90 : vector<32x1xf32>
    %c0_80 = arith.constant 0 : index
    %c0_81 = arith.constant 0 : index
    %92 = vector.load %arg10[%c0_80, %c0_81] : memref<32x1xf32, #tpu.memory_space<vmem>>, vector<32x1xf32>
    %cst_82 = arith.constant 9.99999974E-6 : f32
    %93 = vector.broadcast %cst_82 : f32 to vector<32x1xf32>
    %94 = arith.addf %91, %93 : vector<32x1xf32>
    %95 = math.rsqrt %94 : vector<32x1xf32>
    %96 = arith.mulf %92, %95 : vector<32x1xf32>
    %c0_83 = arith.constant 0 : index
    %c0_84 = arith.constant 0 : index
    %97 = vector.load %arg14[%c0_83, %c0_84] : memref<32x1xf32, #tpu.memory_space<vmem>>, vector<32x1xf32>
    %98 = arith.mulf %87, %96 : vector<32x1xf32>
    %99 = arith.subf %97, %98 : vector<32x1xf32>
    %100 = vector.broadcast %96 : vector<32x1xf32> to vector<32x640xf32>
    %101 = arith.mulf %78, %100 : vector<32x640xf32>
    %102 = vector.broadcast %99 : vector<32x1xf32> to vector<32x640xf32>
    %103 = arith.addf %101, %102 : vector<32x640xf32>
    %cst_85 = arith.constant 0.000000e+00 : f32
    %104 = vector.broadcast %cst_85 : f32 to vector<32x640xf32>
    %105 = arith.cmpf ogt, %103, %104 : vector<32x640xf32>
    %cst_86 = arith.constant 2.000000e-01 : f32
    %106 = vector.broadcast %cst_86 : f32 to vector<32x640xf32>
    %107 = arith.mulf %106, %103 : vector<32x640xf32>
    %108 = arith.select %105, %103, %107 : vector<32x640xi1>, vector<32x640xf32>
    %109 = vector.broadcast %2 : vector<1x640xf32> to vector<32x640xf32>
    %110 = arith.mulf %108, %109 : vector<32x640xf32>
    %111 = arith.truncf %110 : vector<32x640xf32> to vector<32x640xbf16>
    %c0_87 = arith.constant 0 : index
    %c19_88 = arith.constant 19 : index
    %112 = vector.load %arg18[%c0_87, %c19_88] : memref<32x768xbf16, #tpu.memory_space<vmem>>, vector<32x640xbf16>
    tpu.vector_store %arg18[%c0_87, %c19_88], %111 {strides = array<i32>} : memref<32x768xbf16, #tpu.memory_space<vmem>>, vector<32x640xbf16>,
    %c0_89 = arith.constant 0 : index
    %c0_90 = arith.constant 0 : index
    %113 = vector.load %arg18[%c0_89, %c0_90] : memref<32x768xbf16, #tpu.memory_space<vmem>>, vector<32x640xbf16>
    %c0_91 = arith.constant 0 : index
    %c0_92 = arith.constant 0 : index
    %114 = vector.load %arg19[%c0_91, %c0_92] : memref<288x640xbf16, #tpu.memory_space<vmem>>, vector<32x640xbf16>
    tpu.vector_store %arg19[%c0_91, %c0_92], %113 {strides = array<i32>} : memref<288x640xbf16, #tpu.memory_space<vmem>>, vector<32x640xbf16>,
    %c0_93 = arith.constant 0 : index
    %c1_94 = arith.constant 1 : index
    %115 = vector.load %arg18[%c0_93, %c1_94] : memref<32x768xbf16, #tpu.memory_space<vmem>>, vector<32x640xbf16>
    %c32_95 = arith.constant 32 : index
    %c0_96 = arith.constant 0 : index
    %116 = vector.load %arg19[%c32_95, %c0_96] : memref<288x640xbf16, #tpu.memory_space<vmem>>, vector<32x640xbf16>
    tpu.vector_store %arg19[%c32_95, %c0_96], %115 {strides = array<i32>} : memref<288x640xbf16, #tpu.memory_space<vmem>>, vector<32x640xbf16>,
    %c0_97 = arith.constant 0 : index
    %c2_98 = arith.constant 2 : index
    %117 = vector.load %arg18[%c0_97, %c2_98] : memref<32x768xbf16, #tpu.memory_space<vmem>>, vector<32x640xbf16>
    %c64_99 = arith.constant 64 : index
    %c0_100 = arith.constant 0 : index
    %118 = vector.load %arg19[%c64_99, %c0_100] : memref<288x640xbf16, #tpu.memory_space<vmem>>, vector<32x640xbf16>
    tpu.vector_store %arg19[%c64_99, %c0_100], %117 {strides = array<i32>} : memref<288x640xbf16, #tpu.memory_space<vmem>>, vector<32x640xbf16>,
    %c0_101 = arith.constant 0 : index
    %c18_102 = arith.constant 18 : index
    %119 = vector.load %arg18[%c0_101, %c18_102] : memref<32x768xbf16, #tpu.memory_space<vmem>>, vector<32x640xbf16>
    %c96_103 = arith.constant 96 : index
    %c0_104 = arith.constant 0 : index
    %120 = vector.load %arg19[%c96_103, %c0_104] : memref<288x640xbf16, #tpu.memory_space<vmem>>, vector<32x640xbf16>
    tpu.vector_store %arg19[%c96_103, %c0_104], %119 {strides = array<i32>} : memref<288x640xbf16, #tpu.memory_space<vmem>>, vector<32x640xbf16>,
    %c0_105 = arith.constant 0 : index
    %c19_106 = arith.constant 19 : index
    %121 = vector.load %arg18[%c0_105, %c19_106] : memref<32x768xbf16, #tpu.memory_space<vmem>>, vector<32x640xbf16>
    %c128_107 = arith.constant 128 : index
    %c0_108 = arith.constant 0 : index
    %122 = vector.load %arg19[%c128_107, %c0_108] : memref<288x640xbf16, #tpu.memory_space<vmem>>, vector<32x640xbf16>
    tpu.vector_store %arg19[%c128_107, %c0_108], %121 {strides = array<i32>} : memref<288x640xbf16, #tpu.memory_space<vmem>>, vector<32x640xbf16>,
    %c0_109 = arith.constant 0 : index
    %c20_110 = arith.constant 20 : index
    %123 = vector.load %arg18[%c0_109, %c20_110] : memref<32x768xbf16, #tpu.memory_space<vmem>>, vector<32x640xbf16>
    %c160_111 = arith.constant 160 : index
    %c0_112 = arith.constant 0 : index
    %124 = vector.load %arg19[%c160_111, %c0_112] : memref<288x640xbf16, #tpu.memory_space<vmem>>, vector<32x640xbf16>
    tpu.vector_store %arg19[%c160_111, %c0_112], %123 {strides = array<i32>} : memref<288x640xbf16, #tpu.memory_space<vmem>>, vector<32x640xbf16>,
    %c0_113 = arith.constant 0 : index
    %c36_114 = arith.constant 36 : index
    %125 = vector.load %arg18[%c0_113, %c36_114] : memref<32x768xbf16, #tpu.memory_space<vmem>>, vector<32x640xbf16>
    %c192_115 = arith.constant 192 : index
    %c0_116 = arith.constant 0 : index
    %126 = vector.load %arg19[%c192_115, %c0_116] : memref<288x640xbf16, #tpu.memory_space<vmem>>, vector<32x640xbf16>
    tpu.vector_store %arg19[%c192_115, %c0_116], %125 {strides = array<i32>} : memref<288x640xbf16, #tpu.memory_space<vmem>>, vector<32x640xbf16>,
    %c0_117 = arith.constant 0 : index
    %c37_118 = arith.constant 37 : index
    %127 = vector.load %arg18[%c0_117, %c37_118] : memref<32x768xbf16, #tpu.memory_space<vmem>>, vector<32x640xbf16>
    %c224_119 = arith.constant 224 : index
    %c0_120 = arith.constant 0 : index
    %128 = vector.load %arg19[%c224_119, %c0_120] : memref<288x640xbf16, #tpu.memory_space<vmem>>, vector<32x640xbf16>
    tpu.vector_store %arg19[%c224_119, %c0_120], %127 {strides = array<i32>} : memref<288x640xbf16, #tpu.memory_space<vmem>>, vector<32x640xbf16>,
    %c0_121 = arith.constant 0 : index
    %c38_122 = arith.constant 38 : index
    %129 = vector.load %arg18[%c0_121, %c38_122] : memref<32x768xbf16, #tpu.memory_space<vmem>>, vector<32x640xbf16>
    %c256_123 = arith.constant 256 : index
    %c0_124 = arith.constant 0 : index
    %130 = vector.load %arg19[%c256_123, %c0_124] : memref<288x640xbf16, #tpu.memory_space<vmem>>, vector<32x640xbf16>
    tpu.vector_store %arg19[%c256_123, %c0_124], %129 {strides = array<i32>} : memref<288x640xbf16, #tpu.memory_space<vmem>>, vector<32x640xbf16>,
    %c0_125 = arith.constant 0 : index
    %c0_126 = arith.constant 0 : index
    %131 = vector.load %arg5[%c0_125, %c0_126] : memref<32x288xbf16, #tpu.memory_space<vmem>>, vector<32x288xbf16>
    %c0_127 = arith.constant 0 : index
    %c0_128 = arith.constant 0 : index
    %132 = vector.load %arg19[%c0_127, %c0_128] : memref<288x640xbf16, #tpu.memory_space<vmem>>, vector<288x640xbf16>
    %cst_129 = arith.constant dense<0.000000e+00> : vector<32x640xf32>
    %133 = tpu.matmul %131, %132, %cst_129 {dimension_numbers = #tpu.dot_dimension_numbers<[1], [0], [0], [1], [0, 0, 1, 1], [], []>} : vector<32x288xbf16>, vector<288x640xbf16>, vector<32x640xf32> -> vector<32x640xf32>
    %134 = vector.broadcast %2 : vector<1x640xf32> to vector<32x640xf32>
    %135 = arith.mulf %133, %134 : vector<32x640xf32>
    %cst_130 = arith.constant dense<0.000000e+00> : vector<32xf32>
    %136 = vector.multi_reduction <add>, %135, %cst_130 [1] : vector<32x640xf32> to vector<32xf32>
    %137 = vector.shape_cast %136 : vector<32xf32> to vector<32x1xf32>
    %138 = arith.mulf %135, %135 : vector<32x640xf32>
    %cst_131 = arith.constant dense<0.000000e+00> : vector<32xf32>
    %139 = vector.multi_reduction <add>, %138, %cst_131 [1] : vector<32x640xf32> to vector<32xf32>
    %140 = vector.shape_cast %139 : vector<32xf32> to vector<32x1xf32>
    %cst_132 = arith.constant 0.001953125 : f32
    %141 = vector.broadcast %cst_132 : f32 to vector<32x1xf32>
    %142 = arith.mulf %137, %141 : vector<32x1xf32>
    %cst_133 = arith.constant 0.001953125 : f32
    %143 = vector.broadcast %cst_133 : f32 to vector<32x1xf32>
    %144 = arith.mulf %140, %143 : vector<32x1xf32>
    %145 = arith.mulf %142, %142 : vector<32x1xf32>
    %146 = arith.subf %144, %145 : vector<32x1xf32>
    %c0_134 = arith.constant 0 : index
    %c0_135 = arith.constant 0 : index
    %147 = vector.load %arg11[%c0_134, %c0_135] : memref<32x1xf32, #tpu.memory_space<vmem>>, vector<32x1xf32>
    %cst_136 = arith.constant 9.99999974E-6 : f32
    %148 = vector.broadcast %cst_136 : f32 to vector<32x1xf32>
    %149 = arith.addf %146, %148 : vector<32x1xf32>
    %150 = math.rsqrt %149 : vector<32x1xf32>
    %151 = arith.mulf %147, %150 : vector<32x1xf32>
    %c0_137 = arith.constant 0 : index
    %c0_138 = arith.constant 0 : index
    %152 = vector.load %arg15[%c0_137, %c0_138] : memref<32x1xf32, #tpu.memory_space<vmem>>, vector<32x1xf32>
    %153 = arith.mulf %142, %151 : vector<32x1xf32>
    %154 = arith.subf %152, %153 : vector<32x1xf32>
    %155 = vector.broadcast %151 : vector<32x1xf32> to vector<32x640xf32>
    %156 = arith.mulf %133, %155 : vector<32x640xf32>
    %157 = vector.broadcast %154 : vector<32x1xf32> to vector<32x640xf32>
    %158 = arith.addf %156, %157 : vector<32x640xf32>
    %cst_139 = arith.constant 0.000000e+00 : f32
    %159 = vector.broadcast %cst_139 : f32 to vector<32x640xf32>
    %160 = arith.cmpf ogt, %158, %159 : vector<32x640xf32>
    %cst_140 = arith.constant 2.000000e-01 : f32
    %161 = vector.broadcast %cst_140 : f32 to vector<32x640xf32>
    %162 = arith.mulf %161, %158 : vector<32x640xf32>
    %163 = arith.select %160, %158, %162 : vector<32x640xi1>, vector<32x640xf32>
    %164 = vector.broadcast %2 : vector<1x640xf32> to vector<32x640xf32>
    %165 = arith.mulf %163, %164 : vector<32x640xf32>
    %166 = arith.truncf %165 : vector<32x640xf32> to vector<32x640xbf16>
    %c0_141 = arith.constant 0 : index
    %c19_142 = arith.constant 19 : index
    %167 = vector.load %arg18[%c0_141, %c19_142] : memref<32x768xbf16, #tpu.memory_space<vmem>>, vector<32x640xbf16>
    tpu.vector_store %arg18[%c0_141, %c19_142], %166 {strides = array<i32>} : memref<32x768xbf16, #tpu.memory_space<vmem>>, vector<32x640xbf16>,
    %c0_143 = arith.constant 0 : index
    %c0_144 = arith.constant 0 : index
    %168 = vector.load %arg18[%c0_143, %c0_144] : memref<32x768xbf16, #tpu.memory_space<vmem>>, vector<32x640xbf16>
    %c0_145 = arith.constant 0 : index
    %c0_146 = arith.constant 0 : index
    %169 = vector.load %arg19[%c0_145, %c0_146] : memref<288x640xbf16, #tpu.memory_space<vmem>>, vector<32x640xbf16>
    tpu.vector_store %arg19[%c0_145, %c0_146], %168 {strides = array<i32>} : memref<288x640xbf16, #tpu.memory_space<vmem>>, vector<32x640xbf16>,
    %c0_147 = arith.constant 0 : index
    %c1_148 = arith.constant 1 : index
    %170 = vector.load %arg18[%c0_147, %c1_148] : memref<32x768xbf16, #tpu.memory_space<vmem>>, vector<32x640xbf16>
    %c32_149 = arith.constant 32 : index
    %c0_150 = arith.constant 0 : index
    %171 = vector.load %arg19[%c32_149, %c0_150] : memref<288x640xbf16, #tpu.memory_space<vmem>>, vector<32x640xbf16>
    tpu.vector_store %arg19[%c32_149, %c0_150], %170 {strides = array<i32>} : memref<288x640xbf16, #tpu.memory_space<vmem>>, vector<32x640xbf16>,
    %c0_151 = arith.constant 0 : index
    %c2_152 = arith.constant 2 : index
    %172 = vector.load %arg18[%c0_151, %c2_152] : memref<32x768xbf16, #tpu.memory_space<vmem>>, vector<32x640xbf16>
    %c64_153 = arith.constant 64 : index
    %c0_154 = arith.constant 0 : index
    %173 = vector.load %arg19[%c64_153, %c0_154] : memref<288x640xbf16, #tpu.memory_space<vmem>>, vector<32x640xbf16>
    tpu.vector_store %arg19[%c64_153, %c0_154], %172 {strides = array<i32>} : memref<288x640xbf16, #tpu.memory_space<vmem>>, vector<32x640xbf16>,
    %c0_155 = arith.constant 0 : index
    %c18_156 = arith.constant 18 : index
    %174 = vector.load %arg18[%c0_155, %c18_156] : memref<32x768xbf16, #tpu.memory_space<vmem>>, vector<32x640xbf16>
    %c96_157 = arith.constant 96 : index
    %c0_158 = arith.constant 0 : index
    %175 = vector.load %arg19[%c96_157, %c0_158] : memref<288x640xbf16, #tpu.memory_space<vmem>>, vector<32x640xbf16>
    tpu.vector_store %arg19[%c96_157, %c0_158], %174 {strides = array<i32>} : memref<288x640xbf16, #tpu.memory_space<vmem>>, vector<32x640xbf16>,
    %c0_159 = arith.constant 0 : index
    %c19_160 = arith.constant 19 : index
    %176 = vector.load %arg18[%c0_159, %c19_160] : memref<32x768xbf16, #tpu.memory_space<vmem>>, vector<32x640xbf16>
    %c128_161 = arith.constant 128 : index
    %c0_162 = arith.constant 0 : index
    %177 = vector.load %arg19[%c128_161, %c0_162] : memref<288x640xbf16, #tpu.memory_space<vmem>>, vector<32x640xbf16>
    tpu.vector_store %arg19[%c128_161, %c0_162], %176 {strides = array<i32>} : memref<288x640xbf16, #tpu.memory_space<vmem>>, vector<32x640xbf16>,
    %c0_163 = arith.constant 0 : index
    %c20_164 = arith.constant 20 : index
    %178 = vector.load %arg18[%c0_163, %c20_164] : memref<32x768xbf16, #tpu.memory_space<vmem>>, vector<32x640xbf16>
    %c160_165 = arith.constant 160 : index
    %c0_166 = arith.constant 0 : index
    %179 = vector.load %arg19[%c160_165, %c0_166] : memref<288x640xbf16, #tpu.memory_space<vmem>>, vector<32x640xbf16>
    tpu.vector_store %arg19[%c160_165, %c0_166], %178 {strides = array<i32>} : memref<288x640xbf16, #tpu.memory_space<vmem>>, vector<32x640xbf16>,
    %c0_167 = arith.constant 0 : index
    %c36_168 = arith.constant 36 : index
    %180 = vector.load %arg18[%c0_167, %c36_168] : memref<32x768xbf16, #tpu.memory_space<vmem>>, vector<32x640xbf16>
    %c192_169 = arith.constant 192 : index
    %c0_170 = arith.constant 0 : index
    %181 = vector.load %arg19[%c192_169, %c0_170] : memref<288x640xbf16, #tpu.memory_space<vmem>>, vector<32x640xbf16>
    tpu.vector_store %arg19[%c192_169, %c0_170], %180 {strides = array<i32>} : memref<288x640xbf16, #tpu.memory_space<vmem>>, vector<32x640xbf16>,
    %c0_171 = arith.constant 0 : index
    %c37_172 = arith.constant 37 : index
    %182 = vector.load %arg18[%c0_171, %c37_172] : memref<32x768xbf16, #tpu.memory_space<vmem>>, vector<32x640xbf16>
    %c224_173 = arith.constant 224 : index
    %c0_174 = arith.constant 0 : index
    %183 = vector.load %arg19[%c224_173, %c0_174] : memref<288x640xbf16, #tpu.memory_space<vmem>>, vector<32x640xbf16>
    tpu.vector_store %arg19[%c224_173, %c0_174], %182 {strides = array<i32>} : memref<288x640xbf16, #tpu.memory_space<vmem>>, vector<32x640xbf16>,
    %c0_175 = arith.constant 0 : index
    %c38_176 = arith.constant 38 : index
    %184 = vector.load %arg18[%c0_175, %c38_176] : memref<32x768xbf16, #tpu.memory_space<vmem>>, vector<32x640xbf16>
    %c256_177 = arith.constant 256 : index
    %c0_178 = arith.constant 0 : index
    %185 = vector.load %arg19[%c256_177, %c0_178] : memref<288x640xbf16, #tpu.memory_space<vmem>>, vector<32x640xbf16>
    tpu.vector_store %arg19[%c256_177, %c0_178], %184 {strides = array<i32>} : memref<288x640xbf16, #tpu.memory_space<vmem>>, vector<32x640xbf16>,
    %c0_179 = arith.constant 0 : index
    %c0_180 = arith.constant 0 : index
    %186 = vector.load %arg6[%c0_179, %c0_180] : memref<32x288xbf16, #tpu.memory_space<vmem>>, vector<32x288xbf16>
    %c0_181 = arith.constant 0 : index
    %c0_182 = arith.constant 0 : index
    %187 = vector.load %arg19[%c0_181, %c0_182] : memref<288x640xbf16, #tpu.memory_space<vmem>>, vector<288x640xbf16>
    %cst_183 = arith.constant dense<0.000000e+00> : vector<32x640xf32>
    %188 = tpu.matmul %186, %187, %cst_183 {dimension_numbers = #tpu.dot_dimension_numbers<[1], [0], [0], [1], [0, 0, 1, 1], [], []>} : vector<32x288xbf16>, vector<288x640xbf16>, vector<32x640xf32> -> vector<32x640xf32>
    %189 = vector.broadcast %2 : vector<1x640xf32> to vector<32x640xf32>
    %190 = arith.mulf %188, %189 : vector<32x640xf32>
    %cst_184 = arith.constant dense<0.000000e+00> : vector<32xf32>
    %191 = vector.multi_reduction <add>, %190, %cst_184 [1] : vector<32x640xf32> to vector<32xf32>
    %192 = vector.shape_cast %191 : vector<32xf32> to vector<32x1xf32>
    %193 = arith.mulf %190, %190 : vector<32x640xf32>
    %cst_185 = arith.constant dense<0.000000e+00> : vector<32xf32>
    %194 = vector.multi_reduction <add>, %193, %cst_185 [1] : vector<32x640xf32> to vector<32xf32>
    %195 = vector.shape_cast %194 : vector<32xf32> to vector<32x1xf32>
    %cst_186 = arith.constant 0.001953125 : f32
    %196 = vector.broadcast %cst_186 : f32 to vector<32x1xf32>
    %197 = arith.mulf %192, %196 : vector<32x1xf32>
    %cst_187 = arith.constant 0.001953125 : f32
    %198 = vector.broadcast %cst_187 : f32 to vector<32x1xf32>
    %199 = arith.mulf %195, %198 : vector<32x1xf32>
    %200 = arith.mulf %197, %197 : vector<32x1xf32>
    %201 = arith.subf %199, %200 : vector<32x1xf32>
    %c0_188 = arith.constant 0 : index
    %c0_189 = arith.constant 0 : index
    %202 = vector.load %arg12[%c0_188, %c0_189] : memref<32x1xf32, #tpu.memory_space<vmem>>, vector<32x1xf32>
    %cst_190 = arith.constant 9.99999974E-6 : f32
    %203 = vector.broadcast %cst_190 : f32 to vector<32x1xf32>
    %204 = arith.addf %201, %203 : vector<32x1xf32>
    %205 = math.rsqrt %204 : vector<32x1xf32>
    %206 = arith.mulf %202, %205 : vector<32x1xf32>
    %c0_191 = arith.constant 0 : index
    %c0_192 = arith.constant 0 : index
    %207 = vector.load %arg16[%c0_191, %c0_192] : memref<32x1xf32, #tpu.memory_space<vmem>>, vector<32x1xf32>
    %208 = arith.mulf %197, %206 : vector<32x1xf32>
    %209 = arith.subf %207, %208 : vector<32x1xf32>
    %210 = vector.broadcast %206 : vector<32x1xf32> to vector<32x640xf32>
    %211 = arith.mulf %188, %210 : vector<32x640xf32>
    %212 = vector.broadcast %209 : vector<32x1xf32> to vector<32x640xf32>
    %213 = arith.addf %211, %212 : vector<32x640xf32>
    %cst_193 = arith.constant 0.000000e+00 : f32
    %214 = vector.broadcast %cst_193 : f32 to vector<32x640xf32>
    %215 = arith.cmpf ogt, %213, %214 : vector<32x640xf32>
    %cst_194 = arith.constant 2.000000e-01 : f32
    %216 = vector.broadcast %cst_194 : f32 to vector<32x640xf32>
    %217 = arith.mulf %216, %213 : vector<32x640xf32>
    %218 = arith.select %215, %213, %217 : vector<32x640xi1>, vector<32x640xf32>
    %219 = vector.broadcast %2 : vector<1x640xf32> to vector<32x640xf32>
    %220 = arith.mulf %218, %219 : vector<32x640xf32>
    %221 = arith.truncf %220 : vector<32x640xf32> to vector<32x640xbf16>
    %c0_195 = arith.constant 0 : index
    %c19_196 = arith.constant 19 : index
    %222 = vector.load %arg18[%c0_195, %c19_196] : memref<32x768xbf16, #tpu.memory_space<vmem>>, vector<32x640xbf16>
    tpu.vector_store %arg18[%c0_195, %c19_196], %221 {strides = array<i32>} : memref<32x768xbf16, #tpu.memory_space<vmem>>, vector<32x640xbf16>,
    %c0_197 = arith.constant 0 : index
    %c0_198 = arith.constant 0 : index
    %223 = vector.load %arg18[%c0_197, %c0_198] : memref<32x768xbf16, #tpu.memory_space<vmem>>, vector<32x640xbf16>
    %c0_199 = arith.constant 0 : index
    %c0_200 = arith.constant 0 : index
    %224 = vector.load %arg19[%c0_199, %c0_200] : memref<288x640xbf16, #tpu.memory_space<vmem>>, vector<32x640xbf16>
    tpu.vector_store %arg19[%c0_199, %c0_200], %223 {strides = array<i32>} : memref<288x640xbf16, #tpu.memory_space<vmem>>, vector<32x640xbf16>,
    %c0_201 = arith.constant 0 : index
    %c1_202 = arith.constant 1 : index
    %225 = vector.load %arg18[%c0_201, %c1_202] : memref<32x768xbf16, #tpu.memory_space<vmem>>, vector<32x640xbf16>
    %c32_203 = arith.constant 32 : index
    %c0_204 = arith.constant 0 : index
    %226 = vector.load %arg19[%c32_203, %c0_204] : memref<288x640xbf16, #tpu.memory_space<vmem>>, vector<32x640xbf16>
    tpu.vector_store %arg19[%c32_203, %c0_204], %225 {strides = array<i32>} : memref<288x640xbf16, #tpu.memory_space<vmem>>, vector<32x640xbf16>,
    %c0_205 = arith.constant 0 : index
    %c2_206 = arith.constant 2 : index
    %227 = vector.load %arg18[%c0_205, %c2_206] : memref<32x768xbf16, #tpu.memory_space<vmem>>, vector<32x640xbf16>
    %c64_207 = arith.constant 64 : index
    %c0_208 = arith.constant 0 : index
    %228 = vector.load %arg19[%c64_207, %c0_208] : memref<288x640xbf16, #tpu.memory_space<vmem>>, vector<32x640xbf16>
    tpu.vector_store %arg19[%c64_207, %c0_208], %227 {strides = array<i32>} : memref<288x640xbf16, #tpu.memory_space<vmem>>, vector<32x640xbf16>,
    %c0_209 = arith.constant 0 : index
    %c18_210 = arith.constant 18 : index
    %229 = vector.load %arg18[%c0_209, %c18_210] : memref<32x768xbf16, #tpu.memory_space<vmem>>, vector<32x640xbf16>
    %c96_211 = arith.constant 96 : index
    %c0_212 = arith.constant 0 : index
    %230 = vector.load %arg19[%c96_211, %c0_212] : memref<288x640xbf16, #tpu.memory_space<vmem>>, vector<32x640xbf16>
    tpu.vector_store %arg19[%c96_211, %c0_212], %229 {strides = array<i32>} : memref<288x640xbf16, #tpu.memory_space<vmem>>, vector<32x640xbf16>,
    %c0_213 = arith.constant 0 : index
    %c19_214 = arith.constant 19 : index
    %231 = vector.load %arg18[%c0_213, %c19_214] : memref<32x768xbf16, #tpu.memory_space<vmem>>, vector<32x640xbf16>
    %c128_215 = arith.constant 128 : index
    %c0_216 = arith.constant 0 : index
    %232 = vector.load %arg19[%c128_215, %c0_216] : memref<288x640xbf16, #tpu.memory_space<vmem>>, vector<32x640xbf16>
    tpu.vector_store %arg19[%c128_215, %c0_216], %231 {strides = array<i32>} : memref<288x640xbf16, #tpu.memory_space<vmem>>, vector<32x640xbf16>,
    %c0_217 = arith.constant 0 : index
    %c20_218 = arith.constant 20 : index
    %233 = vector.load %arg18[%c0_217, %c20_218] : memref<32x768xbf16, #tpu.memory_space<vmem>>, vector<32x640xbf16>
    %c160_219 = arith.constant 160 : index
    %c0_220 = arith.constant 0 : index
    %234 = vector.load %arg19[%c160_219, %c0_220] : memref<288x640xbf16, #tpu.memory_space<vmem>>, vector<32x640xbf16>
    tpu.vector_store %arg19[%c160_219, %c0_220], %233 {strides = array<i32>} : memref<288x640xbf16, #tpu.memory_space<vmem>>, vector<32x640xbf16>,
    %c0_221 = arith.constant 0 : index
    %c36_222 = arith.constant 36 : index
    %235 = vector.load %arg18[%c0_221, %c36_222] : memref<32x768xbf16, #tpu.memory_space<vmem>>, vector<32x640xbf16>
    %c192_223 = arith.constant 192 : index
    %c0_224 = arith.constant 0 : index
    %236 = vector.load %arg19[%c192_223, %c0_224] : memref<288x640xbf16, #tpu.memory_space<vmem>>, vector<32x640xbf16>
    tpu.vector_store %arg19[%c192_223, %c0_224], %235 {strides = array<i32>} : memref<288x640xbf16, #tpu.memory_space<vmem>>, vector<32x640xbf16>,
    %c0_225 = arith.constant 0 : index
    %c37_226 = arith.constant 37 : index
    %237 = vector.load %arg18[%c0_225, %c37_226] : memref<32x768xbf16, #tpu.memory_space<vmem>>, vector<32x640xbf16>
    %c224_227 = arith.constant 224 : index
    %c0_228 = arith.constant 0 : index
    %238 = vector.load %arg19[%c224_227, %c0_228] : memref<288x640xbf16, #tpu.memory_space<vmem>>, vector<32x640xbf16>
    tpu.vector_store %arg19[%c224_227, %c0_228], %237 {strides = array<i32>} : memref<288x640xbf16, #tpu.memory_space<vmem>>, vector<32x640xbf16>,
    %c0_229 = arith.constant 0 : index
    %c38_230 = arith.constant 38 : index
    %239 = vector.load %arg18[%c0_229, %c38_230] : memref<32x768xbf16, #tpu.memory_space<vmem>>, vector<32x640xbf16>
    %c256_231 = arith.constant 256 : index
    %c0_232 = arith.constant 0 : index
    %240 = vector.load %arg19[%c256_231, %c0_232] : memref<288x640xbf16, #tpu.memory_space<vmem>>, vector<32x640xbf16>
    tpu.vector_store %arg19[%c256_231, %c0_232], %239 {strides = array<i32>} : memref<288x640xbf16, #tpu.memory_space<vmem>>, vector<32x640xbf16>,
    %c0_233 = arith.constant 0 : index
    %c0_234 = arith.constant 0 : index
    %241 = vector.load %arg7[%c0_233, %c0_234] : memref<8x288xbf16, #tpu.memory_space<vmem>>, vector<8x288xbf16>
    %c0_235 = arith.constant 0 : index
    %c0_236 = arith.constant 0 : index
    %242 = vector.load %arg19[%c0_235, %c0_236] : memref<288x640xbf16, #tpu.memory_space<vmem>>, vector<288x640xbf16>
    %cst_237 = arith.constant dense<0.000000e+00> : vector<8x640xf32>
    %243 = tpu.matmul %241, %242, %cst_237 {dimension_numbers = #tpu.dot_dimension_numbers<[1], [0], [0], [1], [0, 0, 1, 1], [], []>} : vector<8x288xbf16>, vector<288x640xbf16>, vector<8x640xf32> -> vector<8x640xf32>
    %c0_238 = arith.constant 0 : index
    %c0_239 = arith.constant 0 : index
    %244 = vector.load %arg8[%c0_238, %c0_239] : memref<8x1xf32, #tpu.memory_space<vmem>>, vector<8x1xf32>
    %245 = vector.broadcast %244 : vector<8x1xf32> to vector<8x640xf32>
    %246 = arith.addf %243, %245 : vector<8x640xf32>
    %c0_240 = arith.constant 0 : index
    %c0_241 = arith.constant 0 : index
    %247 = vector.load %arg17[%c0_240, %c0_241] : memref<8x640xf32, #tpu.memory_space<vmem>>, vector<8x640xf32>
    tpu.vector_store %arg17[%c0_240, %c0_241], %246 {strides = array<i32>} : memref<8x640xf32, #tpu.memory_space<vmem>>, vector<8x640xf32>,
    return
  }
  func.func @transform_0(%arg0: i32) -> (i32, i32) {
    %c0_i32 = arith.constant 0 : i32
    %c0_i32_0 = arith.constant 0 : i32
    %c0_i32_1 = arith.constant 0 : i32
    return %c0_i32, %c0_i32_0 : i32, i32
  }
  func.func @transform_1(%arg0: i32) -> (i32, i32) {
    %c0_i32 = arith.constant 0 : i32
    %c0_i32_0 = arith.constant 0 : i32
    %c0_i32_1 = arith.constant 0 : i32
    return %c0_i32, %c0_i32_0 : i32, i32
  }
  func.func @transform_2(%arg0: i32) -> (i32, i32) {
    %c0_i32 = arith.constant 0 : i32
    %c0_i32_0 = arith.constant 0 : i32
    %c0_i32_1 = arith.constant 0 : i32
    return %c0_i32, %c0_i32_0 : i32, i32
  }
  func.func @transform_3(%arg0: i32) -> (i32, i32) {
    %c0_i32 = arith.constant 0 : i32
    %c0_i32_0 = arith.constant 0 : i32
    %c0_i32_1 = arith.constant 0 : i32
    return %c0_i32, %c0_i32_0 : i32, i32
  }
  func.func @transform_4(%arg0: i32) -> (i32, i32) {
    %c0_i32 = arith.constant 0 : i32
    %c0_i32_0 = arith.constant 0 : i32
    %c0_i32_1 = arith.constant 0 : i32
    return %c0_i32, %c0_i32_0 : i32, i32
  }
  func.func @transform_5(%arg0: i32) -> (i32, i32) {
    %c0_i32 = arith.constant 0 : i32
    %c0_i32_0 = arith.constant 0 : i32
    %c0_i32_1 = arith.constant 0 : i32
    return %c0_i32, %c0_i32_0 : i32, i32
  }
  func.func @transform_6(%arg0: i32) -> (i32, i32) {
    %c0_i32 = arith.constant 0 : i32
    %c0_i32_0 = arith.constant 0 : i32
    %c0_i32_1 = arith.constant 0 : i32
    return %c0_i32, %c0_i32_0 : i32, i32
  }
  func.func @transform_7(%arg0: i32) -> (i32, i32) {
    %c0_i32 = arith.constant 0 : i32
    %c0_i32_0 = arith.constant 0 : i32
    %c0_i32_1 = arith.constant 0 : i32
    return %c0_i32, %c0_i32_0 : i32, i32
  }
  func.func @transform_8(%arg0: i32) -> (i32, i32) {
    %c0_i32 = arith.constant 0 : i32
    %c0_i32_0 = arith.constant 0 : i32
    %c0_i32_1 = arith.constant 0 : i32
    return %c0_i32, %c0_i32_0 : i32, i32
  }
  func.func @transform_9(%arg0: i32) -> (i32, i32) {
    %c0_i32 = arith.constant 0 : i32
    %c0_i32_0 = arith.constant 0 : i32
    %c0_i32_1 = arith.constant 0 : i32
    return %c0_i32, %c0_i32_0 : i32, i32
  }
  func.func @transform_10(%arg0: i32) -> (i32, i32) {
    %c0_i32 = arith.constant 0 : i32
    %c0_i32_0 = arith.constant 0 : i32
    %c0_i32_1 = arith.constant 0 : i32
    return %c0_i32, %c0_i32_0 : i32, i32
  }
  func.func @transform_11(%arg0: i32) -> (i32, i32) {
    %c0_i32 = arith.constant 0 : i32
    %c0_i32_0 = arith.constant 0 : i32
    %c0_i32_1 = arith.constant 0 : i32
    return %c0_i32, %c0_i32_0 : i32, i32
  }
  func.func @transform_12(%arg0: i32) -> (i32, i32) {
    %c0_i32 = arith.constant 0 : i32
    %c0_i32_0 = arith.constant 0 : i32
    %c0_i32_1 = arith.constant 0 : i32
    return %c0_i32, %c0_i32_0 : i32, i32
  }
  func.func @transform_13(%arg0: i32) -> (i32, i32) {
    %c0_i32 = arith.constant 0 : i32
    %c0_i32_0 = arith.constant 0 : i32
    %c0_i32_1 = arith.constant 0 : i32
    return %c0_i32, %c0_i32_0 : i32, i32
  }
  func.func @transform_14(%arg0: i32) -> (i32, i32) {
    %c0_i32 = arith.constant 0 : i32
    %c0_i32_0 = arith.constant 0 : i32
    %c0_i32_1 = arith.constant 0 : i32
    return %c0_i32, %c0_i32_0 : i32, i32
  }
  func.func @transform_15(%arg0: i32) -> (i32, i32) {
    %c0_i32 = arith.constant 0 : i32
    %c0_i32_0 = arith.constant 0 : i32
    %c0_i32_1 = arith.constant 0 : i32
    return %c0_i32, %c0_i32_0 : i32, i32
  }
  func.func @transform_16(%arg0: i32) -> (i32, i32) {
    %c0_i32 = arith.constant 0 : i32
    %c0_i32_0 = arith.constant 0 : i32
    %c0_i32_1 = arith.constant 0 : i32
    return %c0_i32, %c0_i32_0 : i32, i32
  }
}

</mosaic_0001>

<bundles_post_ra>
// kernel: tpu_custom_call.1
= control target key start
LH: loop header
LB: loop body
LE: loop exit
PB: predicated region body
PF: predicated region fallthrough
CT: control target
= control target key end

     0   :  { %s10183_s0 = inlined_call_operand.vmem [shape: f32[1,640], index: 0, kind: input, shape index: {}]   ;;  %s10184_s1 = inlined_call_operand.vmem [shape: bf16[8,768], index: 1, kind: input, shape index: {}]   ;;  %s10185_s2 = inlined_call_operand.vmem [shape: bf16[32,72], index: 2, kind: input, shape index: {}]   ;;  %s10186_s3 = inlined_call_operand.vmem [shape: bf16[32,288], index: 3, kind: input, shape index: {}]   ;;  %s10187_s4 = inlined_call_operand.vmem [shape: bf16[32,288], index: 4, kind: input, shape index: {}]   ;;  %s10188_s5 = inlined_call_operand.vmem [shape: bf16[32,288], index: 5, kind: input, shape index: {}]   ;;  %s10189_s6 = inlined_call_operand.vmem [shape: bf16[8,288], index: 6, kind: input, shape index: {}]   ;;  %s10190_s7 = inlined_call_operand.vmem [shape: f32[8,1], index: 7, kind: input, shape index: {}]   ;;  %s10191_s8 = inlined_call_operand.vmem [shape: f32[32,1], index: 8, kind: input, shape index: {}]   ;;  %s10192_s9 = inlined_call_operand.vmem [shape: f32[32,1], index: 9, kind: input, shape index: {}]   ;;  %s10193_s10 = inlined_call_operand.vmem [shape: f32[32,1], index: 10, kind: input, shape index: {}]   ;;  %s10194_s11 = inlined_call_operand.vmem [shape: f32[32,1], index: 11, kind: input, shape index: {}]   ;;  %s10195_s12 = inlined_call_operand.vmem [shape: f32[32,1], index: 12, kind: input, shape index: {}]   ;;  %s10196_s13 = inlined_call_operand.vmem [shape: f32[32,1], index: 13, kind: input, shape index: {}]   ;;  %s10197_s14 = inlined_call_operand.vmem [shape: f32[32,1], index: 14, kind: input, shape index: {}]   ;;  %s10198_s15 = inlined_call_operand.vmem [shape: f32[32,1], index: 15, kind: input, shape index: {}]   ;;  %s10199_s16 = inlined_call_operand.hbm [shape: f32[8,640], index: 16, kind: output, shape index: {}]  }
   0x1   :  { %10211 = sst [smem:[#allocation10_spill]] %s10183_s0 }
   0x2   :  { %v94_v0 = vld [vmem:[%s10184_s1] sm:$0xff]  ;;  %v95_v1 = vld [vmem:[%s10184_s1 + $0x8] sm:$0xff]  ;;  %s6894_s25 = smov 127   ;;  %s6895_s26 = smov 126  }
   0x3   :  { %v6453_v2 = vcombine.high %v94_v0, %v94_v0  ;;  %v6452_v3 = vcombine.low %v94_v0, %v94_v0  ;;  %v6454_v4 = vcombine.low %v95_v1, %v95_v1  ;;  %v6998_v5 = vcombine.high %v95_v1, %v95_v1  ;;  %s6896_s27 = smov 110  }
   0x5   :  { %114 = vrot.lane.b32.xlu0 %v6453_v2, %s6894_s25  ;;  %112 = vrot.lane.b32.xlu1 %v6452_v3, %s6894_s25  ;;  %90 = vst [vmem:[#allocation3 + $0x8] sm:$0xf] %v6453_v2  ;;  %89 = vst [vmem:[#allocation3] sm:$0xf] %v6452_v3 }
   0x6   :  { %92 = vst [vmem:[#allocation3 + $0x18] sm:$0xf] %v6998_v5  ;;  %91 = vst [vmem:[#allocation3 + $0x10] sm:$0xf] %v6454_v4 }
   0x9   :  { %116 = vrot.lane.b32.xlu0 %v6454_v4, %s6894_s25  ;;  %160 = vrot.lane.b32.xlu1 %v6453_v2, %s6895_s26 }
   0xd   :  { %162 = vrot.lane.b32.xlu0 %v6454_v4, %s6895_s26  ;;  %206 = vrot.lane.b32.xlu1 %v6453_v2, %s6896_s27 }
   0xe   :  { %21 = vsyncpa [#allocation5], 0  ;;  %s6897_s28 = smov 109   ;;  %s6898_s29 = smov 108   ;;  %v96_v6 = vld [vmem:[%s10184_s1 + $0x10] sm:$0xff]  ;;  %v10201_v10 = vmov 0  }
   0xf   :  { %s6899_s30 = smov 92   ;;  %s6900_s0 = smov 91   ;;  %v6456_v7 = vcombine.low %v96_v6, %v96_v6  ;;  %v6808_v8 = vld [vmem:[%s10184_s1 + $0x10] ss:$0 sps:$4 sm:$0xff]   ;;  %v6457_v9 = vcombine.high %v96_v6, %v96_v6  ;;  %55 = vst [vmem:[#allocation2] sm:$0xff] %v10201_v10  ;;  %60 = vst [vmem:[#allocation2 + $0x28] sm:$0xff] %v10201_v10  ;;  %556 = vmatprep.mubr.bf16.mxu0 %v10201_v10  ;;  %609 = vmatprep.mubr.bf16.mxu1 %v10201_v10 }
  0x10   :  { %s6901_s19 = smov 90   ;;  %93 = vst [vmem:[#allocation3 + $0x20] sm:$0xf] %v6808_v8  ;;  %61 = vst [vmem:[#allocation2 + $0x30] sm:$0xff] %v10201_v10  ;;  %6800 = vset.pattern.permute.xlu1 %v10201_v10  ;;  %6801 = vset.pattern.permute.xlu0 %v10201_v10  ;;  %vm124_vm0 = vcmask 1039360   ;;  %vm170_vm1 = vcmask 1031168  }
  0x11   :  { %208 = vrot.lane.b32.xlu0 %v6454_v4, %s6896_s27  ;;  %158 = vrot.lane.b32.xlu1 %v6452_v3, %s6895_s26  ;;  %66 = vst [vmem:[#allocation2 + $0x58] sm:$0xff] %v10201_v10  ;;  %vm216_vm2 = vcmask 900096   ;;  %vm262_vm3 = vcmask 891904   ;;  %vm308_vm4 = vcmask 883712   ;;  %vm354_vm5 = vcmask 752640   ;;  %s10212_s18 = sld [smem:[#allocation10_spill]] }
  0x12   :  { %vm10200_vm6 = vcmask 744448   ;;  %vm10210_vm7 = vcmask 736256   ;;  %vm508_vm8 = vcmask 1043456   ;;  %vm501_vm9 = vcmask 588800  }
  0x15   :  { %204 = vrot.lane.b32.xlu0 %v6452_v3, %s6896_s27  ;;  %252 = vrot.lane.b32.xlu1 %v6453_v2, %s6897_s28 }
  0x19   :  { %254 = vrot.lane.b32.xlu0 %v6454_v4, %s6897_s28  ;;  %298 = vrot.lane.b32.xlu1 %v6453_v2, %s6898_s29 }
  0x1d   :  { %300 = vrot.lane.b32.xlu0 %v6454_v4, %s6898_s29  ;;  %250 = vrot.lane.b32.xlu1 %v6452_v3, %s6897_s28 }
  0x21   :  { %296 = vrot.lane.b32.xlu0 %v6452_v3, %s6898_s29  ;;  %344 = vrot.lane.b32.xlu1 %v6453_v2, %s6899_s30 }
  0x25   :  { %346 = vrot.lane.b32.xlu0 %v6454_v4, %s6899_s30  ;;  %390 = vrot.lane.b32.xlu1 %v6453_v2, %s6900_s0 }
  0x29   :  { %392 = vrot.lane.b32.xlu0 %v6454_v4, %s6900_s0  ;;  %118 = vrot.lane.b32.xlu1 %v6998_v5, %s6894_s25 }
  0x2d   :  { %120 = vrot.lane.b32.xlu0 %v6456_v7, %s6894_s25  ;;  %342 = vrot.lane.b32.xlu1 %v6452_v3, %s6899_s30 }
  0x31   :  { %388 = vrot.lane.b32.xlu0 %v6452_v3, %s6900_s0  ;;  %434 = vrot.lane.b32.xlu1 %v6452_v3, %s6901_s19 }
  0x35   :  { %436 = vrot.lane.b32.xlu0 %v6453_v2, %s6901_s19  ;;  %438 = vrot.lane.b32.xlu1 %v6454_v4, %s6901_s19 }
  0x39   :  { %164 = vrot.lane.b32.xlu0 %v6998_v5, %s6895_s26  ;;  %166 = vrot.lane.b32.xlu1 %v6456_v7, %s6895_s26 }
  0x3d   :  { %210 = vrot.lane.b32.xlu0 %v6998_v5, %s6896_s27  ;;  %212 = vrot.lane.b32.xlu1 %v6456_v7, %s6896_s27 }
  0x41   :  { %122 = vrot.lane.b32.xlu0 %v6457_v9, %s6894_s25  ;;  %256 = vrot.lane.b32.xlu1 %v6998_v5, %s6897_s28 }
  0x45   :  { %258 = vrot.lane.b32.xlu0 %v6456_v7, %s6897_s28  ;;  %302 = vrot.lane.b32.xlu1 %v6998_v5, %s6898_s29 }
  0x49   :  { %304 = vrot.lane.b32.xlu0 %v6456_v7, %s6898_s29  ;;  %168 = vrot.lane.b32.xlu1 %v6457_v9, %s6895_s26 }
  0x4d   :  { %214 = vrot.lane.b32.xlu0 %v6457_v9, %s6896_s27  ;;  %348 = vrot.lane.b32.xlu1 %v6998_v5, %s6899_s30 }
  0x51   :  { %350 = vrot.lane.b32.xlu0 %v6456_v7, %s6899_s30  ;;  %394 = vrot.lane.b32.xlu1 %v6998_v5, %s6900_s0 }
  0x55   :  { %396 = vrot.lane.b32.xlu0 %v6456_v7, %s6900_s0  ;;  %260 = vrot.lane.b32.xlu1 %v6457_v9, %s6897_s28 }
  0x59   :  { %306 = vrot.lane.b32.xlu0 %v6457_v9, %s6898_s29  ;;  %440 = vrot.lane.b32.xlu1 %v6998_v5, %s6901_s19 }
  0x5d   :  { %442 = vrot.lane.b32.xlu0 %v6456_v7, %s6901_s19  ;;  %352 = vrot.lane.b32.xlu1 %v6457_v9, %s6899_s30 }
  0x61   :  { %398 = vrot.lane.b32.xlu0 %v6457_v9, %s6900_s0  ;;  %444 = vrot.lane.b32.xlu1 %v6457_v9, %s6901_s19 }
  0x77   :  { %v115_v11 = vpop.permute.xlu0 %114  ;;  %v113_v12 = vpop.permute.xlu1 %112 }
  0x78   :  { %v125_v13 = vsel %vm124_vm0, %v113_v12, %v115_v11 }
  0x79   :  { %135 = vst [vmem:[#allocation3] sm:$0xf0] %v125_v13  ;;  %v7121_v13 = vld [vmem:[%s10185_s2] sm:$0xff]  }
  0x7b   :  { %v117_v14 = vpop.permute.xlu0 %116  ;;  %v161_v15 = vpop.permute.xlu1 %160 }
  0x7c   :  { %v126_v16 = vsel %vm124_vm0, %v115_v11, %v117_v14 }
  0x7d   :  { %136 = vst [vmem:[#allocation3 + $0x8] sm:$0xf0] %v126_v16 }
  0x7f   :  { %v7073_v17 = vpop.permute.xlu0 %162  ;;  %v207_v18 = vpop.permute.xlu1 %206 }
  0x80   :  { %v172_v19 = vsel %vm170_vm1, %v161_v15, %v7073_v17  ;;  %v466_v25 = vld [vmem:[#allocation3] sm:$0xff] }
  0x81   :  { %182 = vst [vmem:[#allocation3 + $0x30] sm:$0xf] %v172_v19 }
  0x83   :  { %v7077_v20 = vpop.permute.xlu0 %208  ;;  %v159_v21 = vpop.permute.xlu1 %158 }
  0x84   :  { %v218_v22 = vsel %vm216_vm2, %v207_v18, %v7077_v20  ;;  %v171_v23 = vsel %vm170_vm1, %v159_v21, %v161_v15  ;;  %v467_v24 = vld [vmem:[#allocation3 + $0x8] sm:$0xff] }
  0x85   :  { %228 = vst [vmem:[#allocation3 + $0x30] sm:$0xf0] %v218_v22  ;;  %181 = vst [vmem:[#allocation3 + $0x28] sm:$0xf] %v171_v23  ;;  %524 = vmatprep.subr.bf16.mxu0 %v467_v24  ;;  %v7135_v24 = vld [vmem:[%s10185_s2 + $0x8] sm:$0xff]  }
  0x86   :  { %525 = vmatpush1.bf16.msra.mxu0 %v466_v25 }
  0x87   :  { %v205_v26 = vpop.permute.xlu0 %204  ;;  %v253_v27 = vpop.permute.xlu1 %252 }
  0x88   :  { %v217_v28 = vsel %vm216_vm2, %v205_v26, %v207_v18 }
  0x89   :  { %227 = vst [vmem:[#allocation3 + $0x28] sm:$0xf0] %v217_v28 }
  0x8b   :  { %v7083_v29 = vpop.permute.xlu0 %254  ;;  %v299_v30 = vpop.permute.xlu1 %298 }
  0x8c   :  { %v264_v31 = vsel %vm262_vm3, %v253_v27, %v7083_v29  ;;  %v472_v32 = vld [vmem:[#allocation3 + $0x30] sm:$0xff] }
  0x8d   :  { %274 = vst [vmem:[#allocation3 + $0x58] sm:$0xf] %v264_v31  ;;  %526 = vmatprep.subr.bf16.mxu0 %v472_v32 }
  0x8f   :  { %v7087_v33 = vpop.permute.xlu0 %300  ;;  %v251_v34 = vpop.permute.xlu1 %250 }
  0x90   :  { %v310_v35 = vsel %vm308_vm4, %v299_v30, %v7087_v33  ;;  %v263_v36 = vsel %vm262_vm3, %v251_v34, %v253_v27  ;;  %v471_v37 = vld [vmem:[#allocation3 + $0x28] sm:$0xff] }
  0x91   :  { %320 = vst [vmem:[#allocation3 + $0x58] sm:$0xf0] %v310_v35  ;;  %273 = vst [vmem:[#allocation3 + $0x50] sm:$0xf] %v263_v36  ;;  %527 = vmatpush1.bf16.msra.mxu0 %v471_v37 }
  0x93   :  { %v297_v38 = vpop.permute.xlu0 %296  ;;  %v345_v39 = vpop.permute.xlu1 %344 }
  0x94   :  { %v309_v40 = vsel %vm308_vm4, %v297_v38, %v299_v30 }
  0x95   :  { %319 = vst [vmem:[#allocation3 + $0x50] sm:$0xf0] %v309_v40 }
  0x97   :  { %v7093_v41 = vpop.permute.xlu0 %346  ;;  %v391_v42 = vpop.permute.xlu1 %390 }
  0x98   :  { %v356_v43 = vsel %vm354_vm5, %v345_v39, %v7093_v41  ;;  %v477_v44 = vld [vmem:[#allocation3 + $0x58] sm:$0xff] }
  0x99   :  { %366 = vst [vmem:[#allocation3 + $0x80] sm:$0xf] %v356_v43  ;;  %528 = vmatprep.subr.bf16.mxu0 %v477_v44 }
  0x9b   :  { %v7097_v45 = vpop.permute.xlu0 %392  ;;  %v119_v46 = vpop.permute.xlu1 %118 }
  0x9c   :  { %v402_v47 = vsel %vm10200_vm6, %v391_v42, %v7097_v45  ;;  %v127_v48 = vsel %vm124_vm0, %v117_v14, %v119_v46  ;;  %v476_v49 = vld [vmem:[#allocation3 + $0x50] sm:$0xff] }
  0x9d   :  { %412 = vst [vmem:[#allocation3 + $0x80] sm:$0xf0] %v402_v47  ;;  %137 = vst [vmem:[#allocation3 + $0x10] sm:$0xf0] %v127_v48  ;;  %529 = vmatpush1.bf16.msra.mxu0 %v476_v49 }
  0x9f   :  { %v121_v50 = vpop.permute.xlu0 %120  ;;  %v343_v51 = vpop.permute.xlu1 %342 }
  0xa0   :  { %v128_v52 = vsel %vm124_vm0, %v119_v46, %v121_v50  ;;  %v355_v53 = vsel %vm354_vm5, %v343_v51, %v345_v39 }
  0xa1   :  { %138 = vst [vmem:[#allocation3 + $0x18] sm:$0xf0] %v128_v52  ;;  %365 = vst [vmem:[#allocation3 + $0x78] sm:$0xf] %v355_v53 }
  0xa3   :  { %v389_v54 = vpop.permute.xlu0 %388  ;;  %v435_v55 = vpop.permute.xlu1 %434 }
  0xa4   :  { %v401_v56 = vsel %vm10200_vm6, %v389_v54, %v391_v42  ;;  %v482_v57 = vld [vmem:[#allocation3 + $0x80] sm:$0xff]  ;;  %v468_v63 = vld [vmem:[#allocation3 + $0x10] sm:$0xff] }
  0xa5   :  { %411 = vst [vmem:[#allocation3 + $0x78] sm:$0xf0] %v401_v56  ;;  %530 = vmatprep.subr.bf16.mxu0 %v482_v57 }
  0xa7   :  { %v437_v58 = vpop.permute.xlu0 %436  ;;  %v7105_v59 = vpop.permute.xlu1 %438 }
  0xa8   :  { %v447_v60 = vsel %vm10210_vm7, %v435_v55, %v437_v58  ;;  %v448_v61 = vsel %vm10210_vm7, %v437_v58, %v7105_v59  ;;  %v469_v62 = vld [vmem:[#allocation3 + $0x18] sm:$0xff] }
  0xa9   :  { %457 = vst [vmem:[#allocation3 + $0xa0] sm:$0xf] %v447_v60  ;;  %458 = vst [vmem:[#allocation3 + $0xa8] sm:$0xf] %v448_v61  ;;  %577 = vmatprep.subr.bf16.mxu1 %v469_v62 }
  0xaa   :  { %578 = vmatpush1.bf16.msra.mxu1 %v468_v63 }
  0xab   :  { %v165_v0 = vpop.permute.xlu0 %164  ;;  %v167_v1 = vpop.permute.xlu1 %166 }
  0xac   :  { %v173_v2 = vsel %vm170_vm1, %v7073_v17, %v165_v0  ;;  %v174_v3 = vsel %vm170_vm1, %v165_v0, %v167_v1  ;;  %v481_v4 = vld [vmem:[#allocation3 + $0x78] sm:$0xff] }
  0xad   :  { %183 = vst [vmem:[#allocation3 + $0x38] sm:$0xf] %v173_v2  ;;  %184 = vst [vmem:[#allocation3 + $0x40] sm:$0xf] %v174_v3  ;;  %531 = vmatpush1.bf16.msra.mxu0 %v481_v4  ;;  %v680_v2 = vlaneseq }
  0xaf   :  { %v211_v5 = vpop.permute.xlu0 %210  ;;  %v213_v6 = vpop.permute.xlu1 %212  ;;  %v681_v3 = vshrl.u32 %v680_v2, 7 }
  0xb0   :  { %v219_v7 = vsel %vm216_vm2, %v7077_v20, %v211_v5  ;;  %v220_v8 = vsel %vm216_vm2, %v211_v5, %v213_v6  ;;  %v487_v9 = vld [vmem:[#allocation3 + $0xa8] sm:$0xf]  ;;  %v486_v11 = vld [vmem:[#allocation3 + $0xa0] sm:$0xf] }
  0xb1   :  { %229 = vst [vmem:[#allocation3 + $0x38] sm:$0xf0] %v219_v7  ;;  %230 = vst [vmem:[#allocation3 + $0x40] sm:$0xf0] %v220_v8  ;;  %6502 = vmatprep.subr.msk.bf16.mxu0 %vm508_vm8, %v487_v9  ;;  %v510_v12 = vsel %vm508_vm8, %v486_v11, 0  ;;  %v682_v4 = vsub.s32 0, %v681_v3 }
  0xb2   :  { %533 = vmatpush1.bf16.msra.mxu0 %v510_v12  ;;  %v67_v5 = vld [vmem:[%s10212_s18] sm:$0x1f] }
  0xb3   :  { %v123_v14 = vpop.permute.xlu0 %122  ;;  %v257_v15 = vpop.permute.xlu1 %256  ;;  %v7173_v7 = vrot.slane %v67_v5, %v682_v4 }
  0xb4   :  { %v129_v16 = vsel %vm124_vm0, %v121_v50, %v123_v14  ;;  %v265_v17 = vsel %vm262_vm3, %v7083_v29, %v257_v15 }
  0xb5   :  { %139 = vst [vmem:[#allocation3 + $0x20] sm:$0xf0] %v129_v16  ;;  %275 = vst [vmem:[#allocation3 + $0x60] sm:$0xf] %v265_v17  ;;  %6503 = vmatmul.mubr.msk.bf16.vlgmr.msra.gmra.mrb[0].mxu0 %vm501_vm9, %v7121_v13 }
  0xb6   :  { %566 = vmatprep.mubr.bf16.mxu0 %v10201_v10 }
  0xb7   :  { %v259_v18 = vpop.permute.xlu0 %258  ;;  %v303_v19 = vpop.permute.xlu1 %302 }
  0xb8   :  { %v266_v20 = vsel %vm262_vm3, %v257_v15, %v259_v18  ;;  %v311_v21 = vsel %vm308_vm4, %v7087_v33, %v303_v19  ;;  %v474_v22 = vld [vmem:[#allocation3 + $0x40] sm:$0xff]  ;;  %v473_v23 = vld [vmem:[#allocation3 + $0x38] sm:$0xff] }
  0xb9   :  { %276 = vst [vmem:[#allocation3 + $0x68] sm:$0xf] %v266_v20  ;;  %321 = vst [vmem:[#allocation3 + $0x60] sm:$0xf0] %v311_v21  ;;  %579 = vmatprep.subr.bf16.mxu1 %v474_v22 }
  0xba   :  { %580 = vmatpush1.bf16.msra.mxu1 %v473_v23 }
  0xbb   :  { %v305_v25 = vpop.permute.xlu0 %304  ;;  %v169_v26 = vpop.permute.xlu1 %168 }
  0xbc   :  { %v312_v27 = vsel %vm308_vm4, %v303_v19, %v305_v25  ;;  %v175_v28 = vsel %vm170_vm1, %v167_v1, %v169_v26  ;;  %v470_v29 = vld [vmem:[#allocation3 + $0x20] sm:$0xff] }
  0xbd   :  { %322 = vst [vmem:[#allocation3 + $0x68] sm:$0xf0] %v312_v27  ;;  %185 = vst [vmem:[#allocation3 + $0x48] sm:$0xf] %v175_v28  ;;  %6680 = vmatprep.subr.bf16.mxu0 %v470_v29  ;;  %6504 = vmatmul.mubr.msk.bf16.gmra.mrb[4].mxu0 %vm501_vm9, %v7135_v24 }
  0xbe   :  { %6681 = vmatpush3.bf16.msra.mxu0 %v470_v29  ;;  %6690 = vmatprep.mubr.msk.bf16.mxu0 %vm501_vm9, %v7121_v13 }
  0xbf   :  { %v215_v30 = vpop.permute.xlu0 %214  ;;  %v349_v31 = vpop.permute.xlu1 %348 }
  0xc0   :  { %v221_v32 = vsel %vm216_vm2, %v213_v6, %v215_v30  ;;  %v357_v33 = vsel %vm354_vm5, %v7093_v41, %v349_v31  ;;  %v478_v39 = vld [vmem:[#allocation3 + $0x60] sm:$0xff]  ;;  %v686_v6 = vsub.s32 1, %v681_v3 }
  0xc1   :  { %231 = vst [vmem:[#allocation3 + $0x48] sm:$0xf0] %v221_v32  ;;  %367 = vst [vmem:[#allocation3 + $0x88] sm:$0xf] %v357_v33 }
  0xc2   :  { %v7175_v8 = vrot.slane %v67_v5, %v686_v6 }
  0xc3   :  { %v351_v34 = vpop.permute.xlu0 %350  ;;  %v395_v35 = vpop.permute.xlu1 %394 }
  0xc4   :  { %v358_v36 = vsel %vm354_vm5, %v349_v31, %v351_v34  ;;  %v403_v37 = vsel %vm10200_vm6, %v7097_v45, %v395_v35  ;;  %v479_v38 = vld [vmem:[#allocation3 + $0x68] sm:$0xff] }
  0xc5   :  { %368 = vst [vmem:[#allocation3 + $0x90] sm:$0xf] %v358_v36  ;;  %413 = vst [vmem:[#allocation3 + $0x88] sm:$0xf0] %v403_v37  ;;  %581 = vmatprep.subr.bf16.mxu1 %v479_v38 }
  0xc6   :  { %582 = vmatpush1.bf16.msra.mxu1 %v478_v39 }
  0xc7   :  { %v397_v40 = vpop.permute.xlu0 %396  ;;  %v261_v42 = vpop.permute.xlu1 %260 }
  0xc8   :  { %v404_v43 = vsel %vm10200_vm6, %v395_v35, %v397_v40  ;;  %v267_v41 = vsel %vm262_vm3, %v259_v18, %v261_v42  ;;  %v475_v44 = vld [vmem:[#allocation3 + $0x48] sm:$0xff] }
  0xc9   :  { %414 = vst [vmem:[#allocation3 + $0x90] sm:$0xf0] %v404_v43  ;;  %277 = vst [vmem:[#allocation3 + $0x70] sm:$0xf] %v267_v41  ;;  %6682 = vmatprep.subr.bf16.mxu0 %v475_v44  ;;  %v690_v43 = vsub.s32 2, %v681_v3  ;;  %v694_v41 = vsub.s32 3, %v681_v3 }
  0xca   :  { %6683 = vmatpush3.bf16.msra.mxu0 %v475_v44 }
  0xcb   :  { %v307_v46 = vpop.permute.xlu0 %306  ;;  %v441_v47 = vpop.permute.xlu1 %440  ;;  %v7209_v44 = vrot.slane %v67_v5, %v690_v43 }
  0xcc   :  { %v313_v45 = vsel %vm308_vm4, %v305_v25, %v307_v46  ;;  %v449_v48 = vsel %vm10210_vm7, %v7105_v59, %v441_v47  ;;  %v483_v54 = vld [vmem:[#allocation3 + $0x88] sm:$0xff]  ;;  %v7211_v46 = vrot.slane %v67_v5, %v694_v41 }
  0xcd   :  { %323 = vst [vmem:[#allocation3 + $0x70] sm:$0xf0] %v313_v45  ;;  %459 = vst [vmem:[#allocation3 + $0xb0] sm:$0xf] %v449_v48 }
  0xce   :  { %10213 = vst [vmem:[#allocation7_spill] sm:$0xff] %v7209_v44  ;;  %10214 = vst [vmem:[#allocation8_spill] sm:$0xff] %v7211_v46 }
  0xcf   :  { %v443_v49 = vpop.permute.xlu0 %442  ;;  %v353_v50 = vpop.permute.xlu1 %352 }
  0xd0   :  { %v450_v51 = vsel %vm10210_vm7, %v441_v47, %v443_v49  ;;  %v359_v52 = vsel %vm354_vm5, %v351_v34, %v353_v50  ;;  %v484_v53 = vld [vmem:[#allocation3 + $0x90] sm:$0xff] }
  0xd1   :  { %460 = vst [vmem:[#allocation3 + $0xb8] sm:$0xf] %v450_v51  ;;  %369 = vst [vmem:[#allocation3 + $0x98] sm:$0xf] %v359_v52  ;;  %583 = vmatprep.subr.bf16.mxu1 %v484_v53  ;;  %v698_v51 = vsub.s32 4, %v681_v3 }
  0xd2   :  { %584 = vmatpush1.bf16.msra.mxu1 %v483_v54 }
  0xd3   :  { %v399_v55 = vpop.permute.xlu0 %398  ;;  %v445_v56 = vpop.permute.xlu1 %444 }
  0xd4   :  { %v405_v57 = vsel %vm10200_vm6, %v397_v40, %v399_v55  ;;  %v451_v58 = vsel %vm10210_vm7, %v443_v49, %v445_v56  ;;  %v480_v59 = vld [vmem:[#allocation3 + $0x70] sm:$0xff] }
  0xd5   :  { %415 = vst [vmem:[#allocation3 + $0x98] sm:$0xf0] %v405_v57  ;;  %461 = vst [vmem:[#allocation3 + $0xc0] sm:$0xf] %v451_v58  ;;  %6684 = vmatprep.subr.bf16.mxu0 %v480_v59  ;;  %v488_v60 = vld [vmem:[#allocation3 + $0xb0] sm:$0xf] }
  0xd6   :  { %6685 = vmatpush3.bf16.msra.mxu0 %v480_v59  ;;  %v516_v62 = vsel %vm508_vm8, %v488_v60, 0 }
  0xd8   :  { %v489_v61 = vld [vmem:[#allocation3 + $0xb8] sm:$0xf] }
  0xd9   :  { %6505 = vmatprep.subr.msk.bf16.mxu1 %vm508_vm8, %v489_v61 }
  0xda   :  { %586 = vmatpush1.bf16.msra.mxu1 %v516_v62 }
  0xdc   :  { %v485_v63 = vld [vmem:[#allocation3 + $0x98] sm:$0xff]  ;;  %v490_v0 = vld [vmem:[#allocation3 + $0xc0] sm:$0xf] }
  0xdd   :  { %6506 = vmatmul.mubr.msk.bf16.vlgmr.msra.gmra.mrb[0].mxu1 %vm501_vm9, %v7121_v13  ;;  %6686 = vmatprep.subr.bf16.mxu0 %v485_v63  ;;  %v522_v1 = vsel %vm508_vm8, %v490_v0, 0 }
  0xde   :  { %6687 = vmatpush3.bf16.msra.mxu0 %v485_v63  ;;  %619 = vmatprep.mubr.bf16.mxu1 %v10201_v10  ;;  %v7229_v63 = vrot.slane %v67_v5, %v698_v51 }
  0xdf   :  { %6786 = vmatprep.subr.msk.bf16.mxu0 %vm508_vm8, %v490_v0 }
  0xe0   :  { %10215 = vst [vmem:[#allocation9_spill] sm:$0xff] %v7229_v63 }
  0xe2   :  { %6689 = vmatpush3.bf16.msra.mxu0 %v522_v1 }
  0xe5   :  { %6507 = vmatmul.mubr.msk.bf16.gmra.mrb[4].mxu1 %vm501_vm9, %v7135_v24  ;;  %6691 = vmatmul.mubr.msk.bf16.vlgmr.msra.gmra.mrb[8].mxu0 %vm501_vm9, %v7135_v24 }
  0xe6   :  { %1936 = vmatprep.mubr.bf16.mxu0 %v10201_v10 }
 0x188   :  { %v7177_v9 = vpop.f32.mrb[0].mxu0 }
 0x189   :  { %v705_v11 = vmul.f32 %v7173_v7, %v7177_v9  ;;  %v7181_v12 = vpop.f32.mrb[1].mxu0 }
 0x18a   :  { %v706_v13 = vmul.f32 %v7175_v8, %v7181_v12  ;;  %v7185_v14 = vpop.f32.mrb[2].mxu0 }
 0x18b   :  { %v749_v15 = vmul.f32 %v705_v11, %v705_v11  ;;  %v710_v16 = vmul.f32 %v7173_v7, %v7185_v14  ;;  %v7189_v17 = vpop.f32.mrb[3].mxu0 }
 0x18c   :  { %v725_v18 = vadd.f32 %v706_v13, %v705_v11  ;;  %v750_v19 = vmul.f32 %v706_v13, %v706_v13  ;;  %v711_v20 = vmul.f32 %v7175_v8, %v7189_v17 }
 0x18d   :  { %v754_v21 = vmul.f32 %v710_v16, %v710_v16 }
 0x18e   :  { %v769_v22 = vadd.f32 %v750_v19, %v749_v15  ;;  %v731_v23 = vadd.f32 %v711_v20, %v710_v16  ;;  %v755_v24 = vmul.f32 %v711_v20, %v711_v20 }
 0x190   :  { %v775_v25 = vadd.f32 %v755_v24, %v754_v21  ;;  %v7193_v26 = vpop.f32.mrb[4].mxu0 }
 0x191   :  { %v715_v27 = vmul.f32 %v7173_v7, %v7193_v26  ;;  %v7197_v28 = vpop.f32.mrb[5].mxu0 }
 0x192   :  { %v716_v29 = vmul.f32 %v7175_v8, %v7197_v28  ;;  %v7201_v30 = vpop.f32.mrb[6].mxu0 }
 0x193   :  { %v759_v31 = vmul.f32 %v715_v27, %v715_v27  ;;  %v720_v32 = vmul.f32 %v7173_v7, %v7201_v30  ;;  %v7205_v33 = vpop.f32.mrb[7].mxu0 }
 0x194   :  { %v737_v34 = vadd.f32 %v716_v29, %v715_v27  ;;  %v760_v35 = vmul.f32 %v716_v29, %v716_v29  ;;  %v721_v36 = vmul.f32 %v7175_v8, %v7205_v33 }
 0x195   :  { %v764_v37 = vmul.f32 %v720_v32, %v720_v32 }
 0x196   :  { %v781_v38 = vadd.f32 %v760_v35, %v759_v31  ;;  %v743_v39 = vadd.f32 %v721_v36, %v720_v32  ;;  %v765_v40 = vmul.f32 %v721_v36, %v721_v36 }
 0x198   :  { %v787_v42 = vadd.f32 %v765_v40, %v764_v37 }
 0x1b0   :  { %v7213_v47 = vpop.f32.mrb[0].mxu1 }
 0x1b1   :  { %v707_v45 = vmul.f32 %v7209_v44, %v7213_v47  ;;  %v7217_v48 = vpop.f32.mrb[1].mxu1 }
 0x1b2   :  { %v708_v49 = vmul.f32 %v7211_v46, %v7217_v48  ;;  %v7221_v50 = vpop.f32.mrb[2].mxu1 }
 0x1b3   :  { %v726_v52 = vadd.f32 %v725_v18, %v707_v45  ;;  %v751_v53 = vmul.f32 %v707_v45, %v707_v45  ;;  %v712_v54 = vmul.f32 %v7209_v44, %v7221_v50  ;;  %v7225_v55 = vpop.f32.mrb[3].mxu1 }
 0x1b4   :  { %v752_v56 = vmul.f32 %v708_v49, %v708_v49  ;;  %v713_v57 = vmul.f32 %v7211_v46, %v7225_v55 }
 0x1b5   :  { %v732_v58 = vadd.f32 %v731_v23, %v712_v54  ;;  %v756_v59 = vmul.f32 %v712_v54, %v712_v54  ;;  %v727_v60 = vadd.f32 %v726_v52, %v708_v49  ;;  %v770_v61 = vadd.f32 %v769_v22, %v751_v53 }
 0x1b6   :  { %v757_v62 = vmul.f32 %v713_v57, %v713_v57 }
 0x1b7   :  { %v733_v0 = vadd.f32 %v732_v58, %v713_v57  ;;  %v771_v1 = vadd.f32 %v770_v61, %v752_v56  ;;  %v776_v2 = vadd.f32 %v775_v25, %v756_v59 }
 0x1b8   :  { %v7231_v3 = vpop.f32.mrb[4].mxu1  ;;  %v7233_v4 = vpop.f32.mrb[8].mxu0 }
 0x1b9   :  { %v717_v6 = vmul.f32 %v7209_v44, %v7231_v3  ;;  %v7237_v11 = vpop.f32.mrb[5].mxu1  ;;  %v7239_v13 = vpop.f32.mrb[9].mxu0  ;;  %v777_v15 = vadd.f32 %v776_v2, %v757_v62  ;;  %v719_v22 = vmul.f32 %v7233_v4, %v7229_v63 }
 0x1ba   :  { %v718_v16 = vmul.f32 %v7211_v46, %v7237_v11  ;;  %v709_v5 = vmul.f32 %v7229_v63, %v7239_v13  ;;  %v7245_v18 = vpop.f32.mrb[6].mxu1  ;;  %v7247_v19 = vpop.f32.mrb[10].mxu0 }
 0x1bb   :  { %v738_v20 = vadd.f32 %v737_v34, %v717_v6  ;;  %v761_v21 = vmul.f32 %v717_v6, %v717_v6  ;;  %v722_v23 = vmul.f32 %v7209_v44, %v7245_v18  ;;  %v7253_v24 = vpop.f32.mrb[7].mxu1  ;;  %v7255_v25 = vpop.f32.mrb[11].mxu0  ;;  %v724_v40 = vmul.f32 %v7247_v19, %v7229_v63 }
 0x1bc   :  { %v762_v27 = vmul.f32 %v718_v16, %v718_v16  ;;  %v723_v29 = vmul.f32 %v7211_v46, %v7253_v24  ;;  %v714_v31 = vmul.f32 %v7229_v63, %v7255_v25  ;;  %v728_v32 = vadd.f32 %v727_v60, %v709_v5 }
 0x1bd   :  { %v744_v34 = vadd.f32 %v743_v39, %v722_v23  ;;  %v766_v35 = vmul.f32 %v722_v23, %v722_v23  ;;  %v739_v36 = vadd.f32 %v738_v20, %v718_v16  ;;  %v753_v37 = vmul.f32 %v709_v5, %v709_v5 }
 0x1be   :  { %v767_v43 = vmul.f32 %v723_v29, %v723_v29  ;;  %729 = vadd.xlane.f32.xlu0 %v728_v32  ;;  %v734_v41 = vadd.f32 %v733_v0, %v714_v31  ;;  %v782_v45 = vadd.f32 %v781_v38, %v761_v21  ;;  %v758_v53 = vmul.f32 %v714_v31, %v714_v31 }
 0x1bf   :  { %v745_v49 = vadd.f32 %v744_v34, %v723_v29  ;;  %v740_v51 = vadd.f32 %v739_v36, %v719_v22  ;;  %v772_v52 = vadd.f32 %v771_v1, %v753_v37  ;;  %v763_v54 = vmul.f32 %v719_v22, %v719_v22 }
 0x1c0   :  { %735 = vadd.xlane.f32.xlu1 %v734_v41  ;;  %v783_v56 = vadd.f32 %v782_v45, %v762_v27  ;;  %v788_v57 = vadd.f32 %v787_v42, %v766_v35  ;;  %v778_v39 = vadd.f32 %v777_v15, %v758_v53  ;;  %v768_v60 = vmul.f32 %v724_v40, %v724_v40  ;;  %v809_v53 = vld [vmem:[%s10191_s8] sm:$0xff] }
 0x1c1   :  { %v746_v58 = vadd.f32 %v745_v49, %v724_v40 }
 0x1c2   :  { %v784_v59 = vadd.f32 %v783_v56, %v763_v54  ;;  %v789_v61 = vadd.f32 %v788_v57, %v767_v43 }
 0x1c3   :  { %747 = vadd.xlane.f32.xlu0 %v746_v58  ;;  %v810_v58 = vld [vmem:[%s10191_s8 + $0x8] sm:$0xff] }
 0x1c4   :  { %741 = vadd.xlane.f32.xlu1 %v740_v51  ;;  %v790_v62 = vadd.f32 %v789_v61, %v768_v60 }
 0x1c7   :  { %773 = vadd.xlane.f32.xlu0 %v772_v52 }
 0x1c8   :  { %785 = vadd.xlane.f32.xlu1 %v784_v59 }
 0x1cb   :  { %779 = vadd.xlane.f32.xlu0 %v778_v39  ;;  %v811_v39 = vld [vmem:[%s10191_s8 + $0x10] sm:$0xff] }
 0x1cf   :  { %791 = vadd.xlane.f32.xlu0 %v790_v62  ;;  %v812_v62 = vld [vmem:[%s10191_s8 + $0x18] sm:$0xff] }
 0x24b   :  { %v730_v38 = vpop.xlane.xlu0 %729 }
 0x24c   :  { %v793_v2 = vmul.f32 0.001953125, %v730_v38 }
 0x24d   :  { %v736_v0 = vpop.xlane.xlu1 %735 }
 0x24e   :  { %v801_v42 = vmul.f32 %v793_v2, %v793_v2  ;;  %v794_v20 = vmul.f32 0.001953125, %v736_v0 }
 0x250   :  { %v748_v1 = vpop.xlane.xlu0 %747  ;;  %v802_v32 = vmul.f32 %v794_v20, %v794_v20 }
 0x251   :  { %v742_v6 = vpop.xlane.xlu1 %741  ;;  %v796_v34 = vmul.f32 0.001953125, %v748_v1 }
 0x252   :  { %v795_v16 = vmul.f32 0.001953125, %v742_v6  ;;  %v827_v6 = vld [vmem:[%s10195_s12 + $0x10] sm:$0xff] }
 0x253   :  { %v804_v41 = vmul.f32 %v796_v34, %v796_v34 }
 0x254   :  { %v774_v5 = vpop.xlane.xlu0 %773  ;;  %v803_v22 = vmul.f32 %v795_v16, %v795_v16 }
 0x255   :  { %v797_v15 = vmul.f32 0.001953125, %v774_v5  ;;  %v786_v21 = vpop.xlane.xlu1 %785 }
 0x256   :  { %v799_v23 = vmul.f32 0.001953125, %v786_v21 }
 0x257   :  { %v805_v27 = vsub.f32 %v797_v15, %v801_v42  ;;  %v825_v15 = vld [vmem:[%s10195_s12] sm:$0xff] }
 0x258   :  { %v807_v29 = vsub.f32 %v799_v23, %v803_v22  ;;  %v780_v31 = vpop.xlane.xlu0 %779  ;;  %v826_v23 = vld [vmem:[%s10195_s12 + $0x8] sm:$0xff] }
 0x259   :  { %v813_v35 = vadd.f32 1e-05, %v805_v27  ;;  %v798_v36 = vmul.f32 0.001953125, %v780_v31 }
 0x25a   :  { %v815_v37 = vadd.f32 1e-05, %v807_v29  ;;  %v828_v29 = vld [vmem:[%s10195_s12 + $0x18] sm:$0xff]  ;;  %s6903_s12 = smov 19  }
 0x25b   :  { %6838 = vrsqrt.f32 %v813_v35  ;;  %v806_v40 = vsub.f32 %v798_v36, %v802_v32 }
 0x25c   :  { %v792_v43 = vpop.xlane.xlu0 %791  ;;  %6840 = vrsqrt.f32 %v815_v37 }
 0x25d   :  { %v814_v45 = vadd.f32 1e-05, %v806_v40  ;;  %v800_v49 = vmul.f32 0.001953125, %v792_v43 }
 0x25f   :  { %6842 = vrsqrt.f32 %v814_v45  ;;  %v808_v51 = vsub.f32 %v800_v49, %v804_v41 }
 0x261   :  { %v816_v52 = vadd.f32 1e-05, %v808_v51 }
 0x263   :  { %6844 = vrsqrt.f32 %v816_v52 }
 0x265   :  { %v6839_v54 = vpop.eup %6838 }
 0x266   :  { %v821_v56 = vmul.f32 %v6839_v54, %v809_v53  ;;  %v6841_v57 = vpop.eup %6840 }
 0x267   :  { %v823_v61 = vmul.f32 %v6841_v57, %v811_v39 }
 0x268   :  { %839 = vperm.xlu1 %6800, %v821_v56   ;;  %v829_v42 = vmul.f32 %v821_v56, %v793_v2 }
 0x269   :  { %v6843_v59 = vpop.eup %6842  ;;  %v831_v1 = vmul.f32 %v823_v61, %v795_v16 }
 0x26a   :  { %v822_v60 = vmul.f32 %v6843_v59, %v810_v58  ;;  %v833_v21 = vsub.f32 %v825_v15, %v829_v42 }
 0x26b   :  { %v835_v5 = vsub.f32 %v827_v6, %v831_v1 }
 0x26c   :  { %844 = vperm.xlu0 %6801, %v822_v60   ;;  %849 = vperm.xlu1 %6800, %v823_v61   ;;  %v830_v22 = vmul.f32 %v822_v60, %v794_v20 }
 0x26d   :  { %v6845_v38 = vpop.eup %6844 }
 0x26e   :  { %v824_v0 = vmul.f32 %v6845_v38, %v812_v62  ;;  %v834_v16 = vsub.f32 %v826_v23, %v830_v22 }
 0x270   :  { %854 = vperm.xlu1 %6800, %v824_v0   ;;  %v832_v27 = vmul.f32 %v824_v0, %v796_v34 }
 0x272   :  { %v836_v2 = vsub.f32 %v828_v29, %v832_v27 }
 0x274   :  { %889 = vperm.xlu1 %6800, %v835_v5  }
 0x278   :  { %879 = vperm.xlu1 %6800, %v833_v21  }
 0x27c   :  { %884 = vperm.xlu1 %6800, %v834_v16  }
 0x280   :  { %894 = vperm.xlu1 %6800, %v836_v2  }
 0x2e7   :  { %v840_v31 = vpop.permute.xlu1 %839 }
 0x2e8   :  { %v857_v36 = vmul.f32 %v840_v31, %v7177_v9  ;;  %v858_v37 = vmul.f32 %v840_v31, %v7181_v12  ;;  %v859_v40 = vmul.f32 %v840_v31, %v7213_v47  ;;  %v860_v43 = vmul.f32 %v840_v31, %v7217_v48 }
 0x2e9   :  { %v7292_v34 = vmul.f32 %v840_v31, %v7239_v13 }
 0x2eb   :  { %v850_v32 = vpop.permute.xlu1 %849  ;;  %v845_v35 = vpop.permute.xlu0 %844 }
 0x2ec   :  { %v862_v41 = vmul.f32 %v845_v35, %v7185_v14  ;;  %v7296_v45 = vmul.f32 %v845_v35, %v7189_v17  ;;  %v864_v49 = vmul.f32 %v845_v35, %v7221_v50  ;;  %v865_v51 = vmul.f32 %v845_v35, %v7225_v55 }
 0x2ed   :  { %v867_v9 = vmul.f32 %v850_v32, %v7193_v26  ;;  %v868_v12 = vmul.f32 %v850_v32, %v7197_v28  ;;  %v869_v47 = vmul.f32 %v850_v32, %v7231_v3  ;;  %v870_v48 = vmul.f32 %v850_v32, %v7237_v11 }
 0x2ee   :  { %v7305_v13 = vmul.f32 %v845_v35, %v7255_v25  ;;  %v871_v14 = vmul.f32 %v7233_v4, %v850_v32 }
 0x2ef   :  { %v855_v20 = vpop.permute.xlu1 %854 }
 0x2f0   :  { %v872_v17 = vmul.f32 %v855_v20, %v7201_v30  ;;  %v873_v52 = vmul.f32 %v855_v20, %v7205_v33  ;;  %v874_v28 = vmul.f32 %v855_v20, %v7245_v18  ;;  %v875_v3 = vmul.f32 %v855_v20, %v7253_v24 }
 0x2f1   :  { %v876_v11 = vmul.f32 %v7247_v19, %v855_v20 }
 0x2f3   :  { %v890_v50 = vpop.permute.xlu1 %889 }
 0x2f4   :  { %v908_v53 = vadd.f32 %v890_v50, %v868_v12  ;;  %v907_v55 = vadd.f32 %v890_v50, %v867_v9  ;;  %v910_v54 = vadd.f32 %v890_v50, %v870_v48  ;;  %v909_v26 = vadd.f32 %v890_v50, %v869_v47 }
 0x2f5   :  { %v911_v56 = vadd.f32 %v890_v50, %v871_v14 }
 0x2f6   :  { %vm928_vm10 = vcmp.gt.f32.partialorder %v908_v53, 0.0  ;;  %v948_v25 = vmul.f32 0.2, %v908_v53  ;;  %vm927_vm11 = vcmp.gt.f32.partialorder %v907_v55, 0.0  ;;  %v947_v4 = vmul.f32 0.2, %v907_v55 }
 0x2f7   :  { %v7313_v57 = vpop.permute.xlu1 %879  ;;  %vm930_vm12 = vcmp.gt.f32.partialorder %v910_v54, 0.0  ;;  %v950_v30 = vmul.f32 0.2, %v910_v54  ;;  %vm929_vm13 = vcmp.gt.f32.partialorder %v909_v26, 0.0  ;;  %v949_v33 = vmul.f32 0.2, %v909_v26 }
 0x2f8   :  { %v968_v58 = vsel %vm928_vm10, %v908_v53, %v948_v25  ;;  %v967_v39 = vsel %vm927_vm11, %v907_v55, %v947_v4  ;;  %v899_v59 = vadd.f32 %v7313_v57, %v859_v40  ;;  %vm931_vm14 = vcmp.gt.f32.partialorder %v911_v56, 0.0 }
 0x2f9   :  { %v7317_v18 = vmul.f32 %v968_v58, %v7175_v8  ;;  %v7320_v19 = vmul.f32 %v967_v39, %v7173_v7  ;;  %v970_v24 = vsel %vm930_vm12, %v910_v54, %v950_v30  ;;  %v969_v60 = vsel %vm929_vm13, %v909_v26, %v949_v33 }
 0x2fa   :  { %v7323_v61 = vmul.f32 %v970_v24, %v7211_v46  ;;  %v7326_v62 = vmul.f32 %v969_v60, %v7209_v44  ;;  %vm919_vm15 = vcmp.gt.f32.partialorder %v899_v59, 0.0  ;;  %v939_v38 = vmul.f32 0.2, %v899_v59 }
 0x2fb   :  { %v7328_v0 = vpop.permute.xlu1 %884  ;;  %v951_v1 = vmul.f32 0.2, %v911_v56  ;;  %v900_v6 = vadd.f32 %v7313_v57, %v860_v43  ;;  %v897_v5 = vadd.f32 %v7313_v57, %v857_v36  ;;  %v7333_v42 = vadd.f32 %v7313_v57, %v858_v37 }
 0x2fc   :  { %v904_v15 = vadd.f32 %v7328_v0, %v864_v49  ;;  %v959_v21 = vsel %vm919_vm15, %v899_v59, %v939_v38  ;;  %v905_v22 = vadd.f32 %v7328_v0, %v865_v51  ;;  %v902_v23 = vadd.f32 %v7328_v0, %v862_v41 }
 0x2fd   :  { %v7339_v16 = vmul.f32 %v959_v21, %v7209_v44  ;;  %v971_v27 = vsel %vm931_vm14, %v911_v56, %v951_v1  ;;  %vm920_vm8 = vcmp.gt.f32.partialorder %v900_v6, 0.0  ;;  %v940_v29 = vmul.f32 0.2, %v900_v6 }
 0x2fe   :  { %vm924_vm9 = vcmp.gt.f32.partialorder %v904_v15, 0.0  ;;  %v944_v2 = vmul.f32 0.2, %v904_v15  ;;  %v7343_v31 = vmul.f32 %v971_v27, %v7229_v63  ;;  %vm925_vm10 = vcmp.gt.f32.partialorder %v905_v22, 0.0 }
 0x2ff   :  { %v895_v32 = vpop.permute.xlu1 %894  ;;  %v945_v35 = vmul.f32 0.2, %v905_v22  ;;  %v960_v36 = vsel %vm920_vm8, %v900_v6, %v940_v29  ;;  %vm917_vm11 = vcmp.gt.f32.partialorder %v897_v5, 0.0  ;;  %vm922_vm12 = vcmp.gt.f32.partialorder %v902_v23, 0.0 }
 0x300   :  { %v913_v20 = vadd.f32 %v895_v32, %v873_v52  ;;  %v912_v37 = vadd.f32 %v895_v32, %v872_v17  ;;  %v915_v40 = vadd.f32 %v895_v32, %v875_v3  ;;  %v914_v43 = vadd.f32 %v895_v32, %v874_v28 }
 0x301   :  { %v964_v41 = vsel %vm924_vm9, %v904_v15, %v944_v2  ;;  %v916_v49 = vadd.f32 %v895_v32, %v876_v11  ;;  %v965_v51 = vsel %vm925_vm10, %v905_v22, %v945_v35  ;;  %v7346_v9 = vmul.f32 %v960_v36, %v7211_v46 }
 0x302   :  { %vm933_vm13 = vcmp.gt.f32.partialorder %v913_v20, 0.0  ;;  %v953_v12 = vmul.f32 0.2, %v913_v20  ;;  %vm932_vm14 = vcmp.gt.f32.partialorder %v912_v37, 0.0  ;;  %v952_v47 = vmul.f32 0.2, %v912_v37 }
 0x303   :  { %vm935_vm15 = vcmp.gt.f32.partialorder %v915_v40, 0.0  ;;  %v955_v48 = vmul.f32 0.2, %v915_v40  ;;  %vm934_vm6 = vcmp.gt.f32.partialorder %v914_v43, 0.0  ;;  %v954_v14 = vmul.f32 0.2, %v914_v43 }
 0x304   :  { %v973_v50 = vsel %vm933_vm13, %v913_v20, %v953_v12  ;;  %v972_v53 = vsel %vm932_vm14, %v912_v37, %v952_v47  ;;  %v984_v17 = vmul.f32 %v964_v41, %v7209_v44  ;;  %vm936_vm8 = vcmp.gt.f32.partialorder %v916_v49, 0.0 }
 0x305   :  { %v993_v52 = vmul.f32 %v973_v50, %v7175_v8  ;;  %v992_v55 = vmul.f32 %v972_v53, %v7173_v7  ;;  %v975_v54 = vsel %vm935_vm15, %v915_v40, %v955_v48  ;;  %v974_v26 = vsel %vm934_vm6, %v914_v43, %v954_v14 }
 0x306   :  { %v995_v28 = vmul.f32 %v975_v54, %v7211_v46  ;;  %v994_v3 = vmul.f32 %v974_v26, %v7209_v44  ;;  %v999_v11 = vpack.c.bf16 %v984_v17, %v7339_v16  ;;  %v956_v56 = vmul.f32 0.2, %v916_v49 }
 0x307   :  { %v1003_v25 = vpack.c.bf16 %v993_v52, %v7317_v18  ;;  %v1002_v4 = vpack.c.bf16 %v992_v55, %v7320_v19  ;;  %v985_v30 = vmul.f32 %v965_v51, %v7211_v46  ;;  %v937_v33 = vmul.f32 0.2, %v897_v5 }
 0x308   :  { %v1005_v58 = vpack.c.bf16 %v995_v28, %v7323_v61  ;;  %v1004_v39 = vpack.c.bf16 %v994_v3, %v7326_v62  ;;  %v976_v59 = vsel %vm936_vm8, %v916_v49, %v956_v56  ;;  %v942_v24 = vmul.f32 0.2, %v902_v23 }
 0x309   :  { %1029 = vrot.lane.b32.xlu0 %v1003_v25, %s6903_s12  ;;  %1027 = vrot.lane.b32.xlu1 %v1002_v4, %s6903_s12  ;;  %v996_v60 = vmul.f32 %v976_v59, %v7229_v63  ;;  %v1000_v18 = vpack.c.bf16 %v985_v30, %v7346_v9  ;;  %v957_v19 = vsel %vm917_vm11, %v897_v5, %v937_v33  ;;  %vm918_vm6 = vcmp.gt.f32.partialorder %v7333_v42, 0.0 }
 0x30a   :  { %v962_v38 = vsel %vm922_vm12, %v902_v23, %v942_v24  ;;  %v977_v61 = vmul.f32 %v957_v19, %v7173_v7  ;;  %v903_v62 = vadd.f32 %v7328_v0, %v7296_v45  ;;  %v938_v1 = vmul.f32 0.2, %v7333_v42 }
 0x30b   :  { %v1006_v6 = vpack.c.bf16 %v996_v60, %v7343_v31  ;;  %v982_v15 = vmul.f32 %v962_v38, %v7173_v7  ;;  %v901_v21 = vadd.f32 %v7313_v57, %v7292_v34  ;;  %v906_v5 = vadd.f32 %v7328_v0, %v7305_v13 }
 0x30c   :  { %vm923_vm9 = vcmp.gt.f32.partialorder %v903_v62, 0.0  ;;  %v943_v22 = vmul.f32 0.2, %v903_v62  ;;  %v958_v23 = vsel %vm918_vm6, %v7333_v42, %v938_v1  ;;  %vm1058_vm12 = vcmask 1047704  }
 0x30d   :  { %1033 = vrot.lane.b32.xlu0 %v1005_v58, %s6903_s12  ;;  %1031 = vrot.lane.b32.xlu1 %v1004_v39, %s6903_s12  ;;  %v997_v45 = vpack.c.bf16 %v982_v15, %v977_v61  ;;  %vm921_vm10 = vcmp.gt.f32.partialorder %v901_v21, 0.0  ;;  %vm926_vm11 = vcmp.gt.f32.partialorder %v906_v5, 0.0  ;;  %v941_v27 = vmul.f32 0.2, %v901_v21 }
 0x30e   :  { %v963_v16 = vsel %vm923_vm9, %v903_v62, %v943_v22  ;;  %v946_v29 = vmul.f32 0.2, %v906_v5  ;;  %v978_v2 = vmul.f32 %v958_v23, %v7175_v8  ;;  %vm1037_vm13 = vcmask 154624   ;;  %v7609_v23 = vld [vmem:[%s10186_s3 + $0x4] ss:$12 sps:$4 sm:$0xff]  }
 0x30f   :  { %v983_v34 = vmul.f32 %v963_v16, %v7175_v8  ;;  %v961_v57 = vsel %vm921_vm10, %v901_v21, %v941_v27  ;;  %1883 = vmatprep.mubr.bf16.mxu1 %v7609_v23  ;;  %vm10209_vm14 = vcmask 261120   ;;  %vm10217_vm15 = vcmask 744448  }
 0x310   :  { %v966_v13 = vsel %vm926_vm11, %v906_v5, %v946_v29  ;;  %v981_v42 = vmul.f32 %v961_v57, %v7229_v63  ;;  %vm10218_vm8 = vmmov %vm10217_vm15 }
 0x311   :  { %1021 = vrot.lane.b32.xlu0 %v999_v11, %s6903_s12  ;;  %1035 = vrot.lane.b32.xlu1 %v1006_v6, %s6903_s12  ;;  %v998_v0 = vpack.c.bf16 %v983_v34, %v978_v2  ;;  %v986_v31 = vmul.f32 %v966_v13, %v7229_v63  ;;  %vm10219_vm6 = vmmov %vm10218_vm8 }
 0x312   :  { %vm10220_vm9 = vmmov %vm10219_vm6 }
 0x313   :  { %v1001_v32 = vpack.c.bf16 %v986_v31, %v981_v42  ;;  %vm10221_vm10 = vmmov %vm10219_vm6 }
 0x314   :  { %vm10222_vm11 = vmmov %vm10219_vm6 }
 0x315   :  { %1023 = vrot.lane.b32.xlu0 %v1000_v18, %s6903_s12  ;;  %1017 = vrot.lane.b32.xlu1 %v997_v45, %s6903_s12 }
 0x319   :  { %1019 = vrot.lane.b32.xlu1 %v998_v0, %s6903_s12 }
 0x31d   :  { %1025 = vrot.lane.b32.xlu1 %v1001_v32, %s6903_s12 }
 0x37b   :  { %v1028_v35 = vpop.permute.xlu1 %1027  ;;  %v1030_v36 = vpop.permute.xlu0 %1029 }
 0x37c   :  { %1066 = vst.msk [vmem:[#allocation2 + $0x30] sm:$0xff] %vm1058_vm12, %v1028_v35  ;;  %v1042_v53 = vsel %vm1037_vm13, %v1028_v35, %v1030_v36 }
 0x37f   :  { %v1032_v20 = vpop.permute.xlu1 %1031  ;;  %v1034_v40 = vpop.permute.xlu0 %1033 }
 0x380   :  { %v7417_v17 = vsel %vm1037_vm13, %v1030_v36, %v1032_v20  ;;  %v7436_v52 = vsel %vm1037_vm13, %v1032_v20, %v1034_v40 }
 0x383   :  { %v1077_v37 = vld [vmem:[#allocation2 + $0x30] sm:$0xff]  ;;  %v1036_v43 = vpop.permute.xlu1 %1035  ;;  %v7398_v51 = vpop.permute.xlu0 %1021 }
 0x384   :  { %v7391_v41 = vsel %vm1037_vm13, %v1034_v40, %v1036_v43  ;;  %1071 = vst.msk [vmem:[#allocation2 + $0x58] sm:$0xff] %vm1037_vm13, %v1036_v43  ;;  %1674 = vrot.lane.b32.xlu1 %v1077_v37, %s6901_s19 }
 0x385   :  { %1091 = vst [vmem:[#allocation3 + $0x48] sm:$0xff] %v7391_v41 }
 0x387   :  { %v1018_v49 = vpop.permute.xlu1 %1017  ;;  %v7405_v47 = vpop.permute.xlu0 %1023 }
 0x388   :  { %1059 = vst.msk [vmem:[#allocation2] sm:$0xff] %vm1058_vm12, %v1018_v49  ;;  %1128 = vrot.lane.b32.xlu1 %v1077_v37, %s6894_s25  ;;  %v7514_v28 = vsel %vm1037_vm13, %v7398_v51, %v7405_v47 }
 0x38b   :  { %v1020_v9 = vpop.permute.xlu1 %1019  ;;  %v1337_v38 = vld [vmem:[#allocation2 + $0x58] sm:$0xff] }
 0x38c   :  { %v7401_v12 = vsel %vm1037_vm13, %v1018_v49, %v1020_v9  ;;  %1206 = vrot.lane.b32.xlu1 %v1077_v37, %s6895_s26  ;;  %v7478_v55 = vsel %vm1037_vm13, %v1020_v9, %v7398_v51 }
 0x38d   :  { %1851 = vmatprep.subr.bf16.mxu1 %v7401_v12 }
 0x38f   :  { %v1072_v48 = vld [vmem:[#allocation2] sm:$0xff]  ;;  %v1026_v14 = vpop.permute.xlu1 %1025 }
 0x390   :  { %v7409_v50 = vsel %vm1037_vm13, %v7405_v47, %v1026_v14  ;;  %1065 = vst.msk [vmem:[#allocation2 + $0x28] sm:$0xff] %vm1037_vm13, %v1026_v14  ;;  %1284 = vrot.lane.b32.xlu1 %v1077_v37, %s6896_s27  ;;  %1662 = vrot.lane.b32.xlu0 %v1072_v48, %s6901_s19 }
 0x391   :  { %1086 = vst [vmem:[#allocation3 + $0x20] sm:$0xff] %v7409_v50  ;;  %1852 = vmatpush1.bf16.msra.mxu1 %v1072_v48 }
 0x392   :  { %1853 = vmatprep.subr.bf16.mxu1 %v1042_v53 }
 0x394   :  { %1362 = vrot.lane.b32.xlu1 %v1077_v37, %s6897_s28  ;;  %1678 = vrot.lane.b32.xlu0 %v7417_v17, %s6901_s19 }
 0x395   :  { %1854 = vmatpush1.bf16.msra.mxu1 %v1077_v37 }
 0x397   :  { %v7491_v54 = vld [vmem:[#allocation2 + $0x28] sm:$0xff] }
 0x398   :  { %1440 = vrot.lane.b32.xlu1 %v1077_v37, %s6898_s29  ;;  %1116 = vrot.lane.b32.xlu0 %v1072_v48, %s6894_s25 }
 0x39c   :  { %1518 = vrot.lane.b32.xlu1 %v1077_v37, %s6899_s30  ;;  %1132 = vrot.lane.b32.xlu0 %v7417_v17, %s6894_s25 }
 0x3a0   :  { %1596 = vrot.lane.b32.xlu1 %v1077_v37, %s6900_s0  ;;  %1194 = vrot.lane.b32.xlu0 %v1072_v48, %s6895_s26 }
 0x3a4   :  { %1676 = vrot.lane.b32.xlu1 %v1042_v53, %s6901_s19  ;;  %1136 = vrot.lane.b32.xlu0 %v7391_v41, %s6894_s25 }
 0x3a8   :  { %1130 = vrot.lane.b32.xlu1 %v1042_v53, %s6894_s25  ;;  %1210 = vrot.lane.b32.xlu0 %v7417_v17, %s6895_s26 }
 0x3ac   :  { %1134 = vrot.lane.b32.xlu1 %v7436_v52, %s6894_s25  ;;  %1272 = vrot.lane.b32.xlu0 %v1072_v48, %s6896_s27 }
 0x3b0   :  { %1208 = vrot.lane.b32.xlu1 %v1042_v53, %s6895_s26  ;;  %1214 = vrot.lane.b32.xlu0 %v7391_v41, %s6895_s26 }
 0x3b4   :  { %1212 = vrot.lane.b32.xlu1 %v7436_v52, %s6895_s26  ;;  %1288 = vrot.lane.b32.xlu0 %v7417_v17, %s6896_s27 }
 0x3b8   :  { %1286 = vrot.lane.b32.xlu1 %v1042_v53, %s6896_s27  ;;  %1350 = vrot.lane.b32.xlu0 %v1072_v48, %s6897_s28 }
 0x3bc   :  { %1290 = vrot.lane.b32.xlu1 %v7436_v52, %s6896_s27  ;;  %1292 = vrot.lane.b32.xlu0 %v7391_v41, %s6896_s27 }
 0x3c0   :  { %1364 = vrot.lane.b32.xlu1 %v1042_v53, %s6897_s28  ;;  %1366 = vrot.lane.b32.xlu0 %v7417_v17, %s6897_s28 }
 0x3c4   :  { %1368 = vrot.lane.b32.xlu1 %v7436_v52, %s6897_s28  ;;  %1428 = vrot.lane.b32.xlu0 %v1072_v48, %s6898_s29 }
 0x3c8   :  { %1442 = vrot.lane.b32.xlu1 %v1042_v53, %s6898_s29  ;;  %1370 = vrot.lane.b32.xlu0 %v7391_v41, %s6897_s28 }
 0x3cc   :  { %1446 = vrot.lane.b32.xlu1 %v7436_v52, %s6898_s29  ;;  %1444 = vrot.lane.b32.xlu0 %v7417_v17, %s6898_s29 }
 0x3d0   :  { %1520 = vrot.lane.b32.xlu1 %v1042_v53, %s6899_s30  ;;  %1506 = vrot.lane.b32.xlu0 %v1072_v48, %s6899_s30 }
 0x3d4   :  { %1524 = vrot.lane.b32.xlu1 %v7436_v52, %s6899_s30  ;;  %1448 = vrot.lane.b32.xlu0 %v7391_v41, %s6898_s29 }
 0x3d8   :  { %1598 = vrot.lane.b32.xlu1 %v1042_v53, %s6900_s0  ;;  %1522 = vrot.lane.b32.xlu0 %v7417_v17, %s6899_s30 }
 0x3dc   :  { %1666 = vrot.lane.b32.xlu1 %v7478_v55, %s6901_s19  ;;  %1584 = vrot.lane.b32.xlu0 %v1072_v48, %s6900_s0 }
 0x3e0   :  { %1602 = vrot.lane.b32.xlu1 %v7436_v52, %s6900_s0  ;;  %1526 = vrot.lane.b32.xlu0 %v7391_v41, %s6899_s30 }
 0x3e4   :  { %1120 = vrot.lane.b32.xlu1 %v7478_v55, %s6894_s25  ;;  %1600 = vrot.lane.b32.xlu0 %v7417_v17, %s6900_s0 }
 0x3e8   :  { %1124 = vrot.lane.b32.xlu1 %v7409_v50, %s6894_s25  ;;  %1360 = vrot.lane.b32.xlu0 %v7491_v54, %s6897_s28 }
 0x3ec   :  { %1198 = vrot.lane.b32.xlu1 %v7478_v55, %s6895_s26  ;;  %1664 = vrot.lane.b32.xlu0 %v7401_v12, %s6901_s19 }
 0x3f0   :  { %1202 = vrot.lane.b32.xlu1 %v7409_v50, %s6895_s26  ;;  %1604 = vrot.lane.b32.xlu0 %v7391_v41, %s6900_s0 }
 0x3f4   :  { %1276 = vrot.lane.b32.xlu1 %v7478_v55, %s6896_s27  ;;  %1118 = vrot.lane.b32.xlu0 %v7401_v12, %s6894_s25 }
 0x3f6   :  { %v7509_v26 = vpop.permute.xlu1 %1674 }
 0x3f8   :  { %1280 = vrot.lane.b32.xlu1 %v7409_v50, %s6896_s27  ;;  %1122 = vrot.lane.b32.xlu0 %v7514_v28, %s6894_s25 }
 0x3fa   :  { %v7520_v3 = vpop.permute.xlu1 %1128 }
 0x3fc   :  { %1354 = vrot.lane.b32.xlu1 %v7478_v55, %s6897_s28  ;;  %1196 = vrot.lane.b32.xlu0 %v7401_v12, %s6895_s26 }
 0x3fe   :  { %v7526_v11 = vpop.permute.xlu1 %1206 }
 0x400   :  { %1358 = vrot.lane.b32.xlu1 %v7409_v50, %s6897_s28  ;;  %1200 = vrot.lane.b32.xlu0 %v7514_v28, %s6895_s26 }
 0x402   :  { %v7532_v56 = vpop.permute.xlu1 %1284  ;;  %v7534_v25 = vpop.permute.xlu0 %1662 }
 0x404   :  { %1432 = vrot.lane.b32.xlu1 %v7478_v55, %s6898_s29  ;;  %1274 = vrot.lane.b32.xlu0 %v7401_v12, %s6896_s27 }
 0x406   :  { %v7540_v4 = vpop.permute.xlu1 %1362  ;;  %v7542_v30 = vpop.permute.xlu0 %1678 }
 0x408   :  { %1436 = vrot.lane.b32.xlu1 %v7409_v50, %s6898_s29  ;;  %1278 = vrot.lane.b32.xlu0 %v7514_v28, %s6896_s27 }
 0x40a   :  { %v7548_v33 = vpop.permute.xlu1 %1440  ;;  %v7550_v58 = vpop.permute.xlu0 %1116 }
 0x40c   :  { %1510 = vrot.lane.b32.xlu1 %v7478_v55, %s6899_s30  ;;  %1352 = vrot.lane.b32.xlu0 %v7401_v12, %s6897_s28 }
 0x40e   :  { %v7556_v39 = vpop.permute.xlu1 %1518  ;;  %v7558_v59 = vpop.permute.xlu0 %1132 }
 0x410   :  { %1514 = vrot.lane.b32.xlu1 %v7409_v50, %s6899_s30  ;;  %1356 = vrot.lane.b32.xlu0 %v7514_v28, %s6897_s28 }
 0x412   :  { %v7564_v24 = vpop.permute.xlu1 %1596  ;;  %v7566_v60 = vpop.permute.xlu0 %1194 }
 0x414   :  { %1588 = vrot.lane.b32.xlu1 %v7478_v55, %s6900_s0  ;;  %1430 = vrot.lane.b32.xlu0 %v7401_v12, %s6898_s29 }
 0x416   :  { %v7572_v18 = vpop.permute.xlu1 %1676  ;;  %v7574_v19 = vpop.permute.xlu0 %1136 }
 0x417   :  { %v1692_v10 = vsel %vm10210_vm7, %v7572_v18, %v7542_v30  ;;  %v1691_v44 = vsel %vm10210_vm7, %v7509_v26, %v7572_v18 }
 0x418   :  { %1372 = vrot.lane.b32.xlu1 %v1337_v38, %s6897_s28  ;;  %1434 = vrot.lane.b32.xlu0 %v7514_v28, %s6898_s29 }
 0x41a   :  { %v7579_v61 = vpop.permute.xlu1 %1130  ;;  %v7581_v62 = vpop.permute.xlu0 %1210 }
 0x41b   :  { %v1146_v26 = vsel %vm124_vm0, %v7579_v61, %v7558_v59 }
 0x41c   :  { %1592 = vrot.lane.b32.xlu1 %v7409_v50, %s6900_s0  ;;  %1508 = vrot.lane.b32.xlu0 %v7401_v12, %s6899_s30 }
 0x41e   :  { %v7587_v1 = vpop.permute.xlu1 %1134  ;;  %v7589_v6 = vpop.permute.xlu0 %1272 }
 0x420   :  { %1126 = vrot.lane.b32.xlu1 %v7491_v54, %s6894_s25  ;;  %1512 = vrot.lane.b32.xlu0 %v7514_v28, %s6899_s30 }
 0x422   :  { %v7595_v15 = vpop.permute.xlu1 %1208  ;;  %v7597_v21 = vpop.permute.xlu0 %1214 }
 0x424   :  { %1138 = vrot.lane.b32.xlu1 %v1337_v38, %s6894_s25  ;;  %1586 = vrot.lane.b32.xlu0 %v7401_v12, %s6900_s0 }
 0x426   :  { %v7602_v5 = vpop.permute.xlu1 %1212  ;;  %v7604_v22 = vpop.permute.xlu0 %1288 }
 0x428   :  { %1204 = vrot.lane.b32.xlu1 %v7491_v54, %s6895_s26  ;;  %1438 = vrot.lane.b32.xlu0 %v7491_v54, %s6898_s29 }
 0x42a   :  { %v7616_v45 = vpop.permute.xlu1 %1286  ;;  %v7618_v16 = vpop.permute.xlu0 %1350 }
 0x42c   :  { %1670 = vrot.lane.b32.xlu1 %v7409_v50, %s6901_s19  ;;  %1590 = vrot.lane.b32.xlu0 %v7514_v28, %s6900_s0 }
 0x42e   :  { %v7624_v27 = vpop.permute.xlu1 %1290  ;;  %v7626_v29 = vpop.permute.xlu0 %1292 }
 0x430   :  { %1682 = vrot.lane.b32.xlu1 %v7391_v41, %s6901_s19  ;;  %1450 = vrot.lane.b32.xlu0 %v1337_v38, %s6898_s29 }
 0x432   :  { %v7631_v2 = vpop.permute.xlu1 %1364  ;;  %v7633_v34 = vpop.permute.xlu0 %1366 }
 0x434   :  { %1216 = vrot.lane.b32.xlu1 %v1337_v38, %s6895_s26  ;;  %1516 = vrot.lane.b32.xlu0 %v7491_v54, %s6899_s30 }
 0x436   :  { %v7638_v57 = vpop.permute.xlu1 %1368  ;;  %v7640_v13 = vpop.permute.xlu0 %1428 }
 0x438   :  { %1282 = vrot.lane.b32.xlu1 %v7491_v54, %s6896_s27  ;;  %1680 = vrot.lane.b32.xlu0 %v7436_v52, %s6901_s19 }
 0x43a   :  { %v7646_v0 = vpop.permute.xlu1 %1442  ;;  %v7648_v42 = vpop.permute.xlu0 %1370 }
 0x43c   :  { %1294 = vrot.lane.b32.xlu1 %v1337_v38, %s6896_s27  ;;  %1668 = vrot.lane.b32.xlu0 %v7514_v28, %s6901_s19 }
 0x43e   :  { %v7653_v31 = vpop.permute.xlu1 %1446  ;;  %v7655_v32 = vpop.permute.xlu0 %1444 }
 0x440   :  { %1684 = vrot.lane.b32.xlu1 %v1337_v38, %s6901_s19  ;;  %1528 = vrot.lane.b32.xlu0 %v1337_v38, %s6899_s30 }
 0x442   :  { %v7659_v35 = vpop.permute.xlu1 %1520  ;;  %v7661_v36 = vpop.permute.xlu0 %1506 }
 0x444   :  { %1594 = vrot.lane.b32.xlu0 %v7491_v54, %s6900_s0 }
 0x446   :  { %v7665_v20 = vpop.permute.xlu1 %1524  ;;  %v7667_v37 = vpop.permute.xlu0 %1448 }
 0x448   :  { %1606 = vrot.lane.b32.xlu0 %v1337_v38, %s6900_s0 }
 0x44a   :  { %v7670_v40 = vpop.permute.xlu1 %1598  ;;  %v7672_v43 = vpop.permute.xlu0 %1522 }
 0x44c   :  { %1672 = vrot.lane.b32.xlu0 %v7491_v54, %s6901_s19 }
 0x44e   :  { %v7676_v41 = vpop.permute.xlu1 %1666  ;;  %v7678_v49 = vpop.permute.xlu0 %1584 }
 0x452   :  { %v7680_v51 = vpop.permute.xlu1 %1602  ;;  %v7682_v9 = vpop.permute.xlu0 %1526 }
 0x456   :  { %v1121_v12 = vpop.permute.xlu1 %1120  ;;  %v7684_v47 = vpop.permute.xlu0 %1600 }
 0x45a   :  { %v7686_v48 = vpop.permute.xlu1 %1124  ;;  %v7688_v14 = vpop.permute.xlu0 %1360 }
 0x45e   :  { %v1199_v50 = vpop.permute.xlu1 %1198  ;;  %v1665_v53 = vpop.permute.xlu0 %1664 }
 0x45f   :  { %v1686_v54 = vsel %vm10210_vm7, %v7534_v25, %v1665_v53  ;;  %v1687_v38 = vsel %vm10210_vm7, %v1665_v53, %v7676_v41  ;;  %v7707_v25 = vld [vmem:[%s10186_s3 + $0x8] ss:$12 sps:$4 sm:$0xff]  }
 0x460   :  { %1904 = vmatprep.subr.bf16.mxu0 %v1687_v38 }
 0x461   :  { %1905 = vmatpush1.bf16.msra.mxu0 %v1686_v54 }
 0x462   :  { %v7697_v63 = vpop.permute.xlu1 %1202  ;;  %v7699_v46 = vpop.permute.xlu0 %1604  ;;  %1906 = vmatprep.subr.bf16.mxu0 %v1692_v10 }
 0x465   :  { %1907 = vmatpush1.bf16.msra.mxu0 %v1691_v44 }
 0x466   :  { %v7709_v53 = vpop.permute.xlu1 %1276  ;;  %v1119_v38 = vpop.permute.xlu0 %1118  ;;  %1957 = vmatprep.subr.bf16.mxu0 %v7514_v28  ;;  %v10216_v28 = vmov 0  }
 0x467   :  { %v1140_v54 = vsel %vm124_vm0, %v7550_v58, %v1119_v38  ;;  %v1141_v10 = vsel %vm124_vm0, %v1119_v38, %v1121_v12  ;;  %v1145_v58 = vsel %vm124_vm0, %v7520_v3, %v7579_v61  ;;  %v7731_v38 = vld [vmem:[%s10186_s3 + $0x20] ss:$12 sps:$4 sm:$0xff]  }
 0x468   :  { %1855 = vmatprep.subr.bf16.mxu1 %v1141_v10  ;;  %6516 = vmatmul.mubr.msk.bf16.vlgmr.msra.gmra.mrb[12].mxu0 %vm10209_vm14, %v7707_v25 }
 0x469   :  { %1856 = vmatpush1.bf16.msra.mxu1 %v1140_v54  ;;  %1958 = vmatpush1.bf16.msra.mxu0 %v7478_v55 }
 0x46a   :  { %v7721_v44 = vpop.permute.xlu1 %1280  ;;  %v1123_v18 = vpop.permute.xlu0 %1122  ;;  %1959 = vmatprep.subr.bf16.mxu0 %v7436_v52  ;;  %1857 = vmatprep.subr.bf16.mxu1 %v1146_v26  ;;  %v1148_v26 = vsel %vm124_vm0, %v7587_v1, %v7574_v19 }
 0x46b   :  { %1946 = vmatprep.mubr.bf16.mxu0 %v10216_v28  ;;  %v1143_v55 = vsel %vm124_vm0, %v1123_v18, %v7686_v48  ;;  %v1142_v61 = vsel %vm124_vm0, %v1121_v12, %v1123_v18  ;;  %v1147_v12 = vsel %vm124_vm0, %v7558_v59, %v7587_v1  ;;  %v1223_v18 = vsel %vm170_vm1, %v7526_v11, %v7595_v15 }
 0x46c   :  { %v1226_v11 = vsel %vm170_vm1, %v7602_v5, %v7597_v21  ;;  %v1302_v1 = vsel %vm216_vm2, %v7616_v45, %v7604_v22 }
 0x46d   :  { %1858 = vmatpush1.bf16.msra.mxu1 %v1145_v58  ;;  %1960 = vmatpush1.bf16.msra.mxu0 %v7417_v17  ;;  %v1224_v17 = vsel %vm170_vm1, %v7595_v15, %v7581_v62 }
 0x46e   :  { %v7736_v54 = vpop.permute.xlu1 %1354  ;;  %v1197_v52 = vpop.permute.xlu0 %1196  ;;  %1961 = vmatprep.subr.bf16.mxu0 %v1143_v55 }
 0x46f   :  { %v1218_v10 = vsel %vm170_vm1, %v7566_v60, %v1197_v52  ;;  %v1219_v3 = vsel %vm170_vm1, %v1197_v52, %v1199_v50 }
 0x470   :  { %1859 = vmatprep.subr.bf16.mxu1 %v1219_v3  ;;  %6517 = vmatmul.mubr.msk.bf16.gmra.mrb[16].mxu0 %vm10209_vm14, %v7731_v38 }
 0x471   :  { %1860 = vmatpush1.bf16.msra.mxu1 %v1218_v10  ;;  %1962 = vmatpush1.bf16.msra.mxu0 %v1142_v61 }
 0x472   :  { %v7750_v58 = vpop.permute.xlu1 %1358  ;;  %v1201_v60 = vpop.permute.xlu0 %1200  ;;  %1963 = vmatprep.subr.bf16.mxu0 %v1148_v26  ;;  %1861 = vmatprep.subr.bf16.mxu1 %v1224_v17 }
 0x473   :  { %1989 = vmatprep.mubr.bf16.mxu0 %v7609_v23  ;;  %v1221_v55 = vsel %vm170_vm1, %v1201_v60, %v7697_v63  ;;  %v1220_v59 = vsel %vm170_vm1, %v1199_v50, %v1201_v60  ;;  %v1301_v50 = vsel %vm216_vm2, %v7532_v56, %v7616_v45  ;;  %v1304_v56 = vsel %vm216_vm2, %v7624_v27, %v7626_v29 }
 0x475   :  { %1862 = vmatpush1.bf16.msra.mxu1 %v1223_v18  ;;  %1964 = vmatpush1.bf16.msra.mxu0 %v1147_v12 }
 0x476   :  { %v7761_v52 = vpop.permute.xlu1 %1432  ;;  %v1275_v10 = vpop.permute.xlu0 %1274  ;;  %1965 = vmatprep.subr.bf16.mxu0 %v1221_v55 }
 0x477   :  { %v1296_v3 = vsel %vm216_vm2, %v7589_v6, %v1275_v10  ;;  %v1297_v61 = vsel %vm216_vm2, %v1275_v10, %v7709_v53  ;;  %v1225_v6 = vsel %vm170_vm1, %v7581_v62, %v7602_v5  ;;  %v1380_v5 = vsel %vm262_vm3, %v7631_v2, %v7633_v34 }
 0x478   :  { %1863 = vmatprep.subr.bf16.mxu1 %v1297_v61  ;;  %v1379_v10 = vsel %vm262_vm3, %v7540_v4, %v7631_v2  ;;  %v1382_v4 = vsel %vm262_vm3, %v7638_v57, %v7648_v42 }
 0x479   :  { %1864 = vmatpush1.bf16.msra.mxu1 %v1296_v3  ;;  %1966 = vmatpush1.bf16.msra.mxu0 %v1220_v59 }
 0x47a   :  { %v7774_v15 = vpop.permute.xlu1 %1436  ;;  %v1279_v26 = vpop.permute.xlu0 %1278  ;;  %1967 = vmatprep.subr.bf16.mxu0 %v1226_v11  ;;  %1865 = vmatprep.subr.bf16.mxu1 %v1302_v1 }
 0x47b   :  { %v1299_v17 = vsel %vm216_vm2, %v1279_v26, %v7721_v44  ;;  %v1298_v62 = vsel %vm216_vm2, %v7709_v53, %v1279_v26  ;;  %v1303_v53 = vsel %vm216_vm2, %v7604_v22, %v7624_v27  ;;  %v1458_v27 = vsel %vm308_vm4, %v7646_v0, %v7655_v32 }
 0x47d   :  { %1866 = vmatpush1.bf16.msra.mxu1 %v1301_v50  ;;  %1968 = vmatpush1.bf16.msra.mxu0 %v1225_v6 }
 0x47e   :  { %v7784_v60 = vpop.permute.xlu1 %1510  ;;  %v1353_v12 = vpop.permute.xlu0 %1352  ;;  %1969 = vmatprep.subr.bf16.mxu0 %v1299_v17 }
 0x47f   :  { %v1374_v18 = vsel %vm262_vm3, %v7618_v16, %v1353_v12  ;;  %v1375_v55 = vsel %vm262_vm3, %v1353_v12, %v7736_v54 }
 0x480   :  { %1867 = vmatprep.subr.bf16.mxu1 %v1375_v55 }
 0x481   :  { %1868 = vmatpush1.bf16.msra.mxu1 %v1374_v18  ;;  %1970 = vmatpush1.bf16.msra.mxu0 %v1298_v62 }
 0x482   :  { %v7798_v45 = vpop.permute.xlu1 %1514  ;;  %v1357_v16 = vpop.permute.xlu0 %1356  ;;  %1971 = vmatprep.subr.bf16.mxu0 %v1304_v56  ;;  %1869 = vmatprep.subr.bf16.mxu1 %v1380_v5 }
 0x483   :  { %v1377_v3 = vsel %vm262_vm3, %v1357_v16, %v7750_v58  ;;  %v1376_v22 = vsel %vm262_vm3, %v7736_v54, %v1357_v16  ;;  %v1457_v54 = vsel %vm308_vm4, %v7548_v33, %v7646_v0  ;;  %v1460_v33 = vsel %vm308_vm4, %v7653_v31, %v7667_v37 }
 0x485   :  { %1870 = vmatpush1.bf16.msra.mxu1 %v1379_v10  ;;  %1972 = vmatpush1.bf16.msra.mxu0 %v1303_v53  ;;  %v1613_v10 = vsel %vm10220_vm9, %v7564_v24, %v7670_v40  ;;  %vm10225_vm9 = vmmov %vm10219_vm6 }
 0x486   :  { %v7808_v61 = vpop.permute.xlu1 %1588  ;;  %v1431_v59 = vpop.permute.xlu0 %1430  ;;  %1973 = vmatprep.subr.bf16.mxu0 %v1377_v3  ;;  %v7873_v3 = vld [vmem:[%s10186_s3] ss:$12 sps:$4 sm:$0xff]  }
 0x487   :  { %v1452_v11 = vsel %vm308_vm4, %v7640_v13, %v1431_v59  ;;  %v1453_v1 = vsel %vm308_vm4, %v1431_v59, %v7761_v52  ;;  %v1381_v13 = vsel %vm262_vm3, %v7633_v34, %v7638_v57  ;;  %v1536_v57 = vsel %vm354_vm5, %v7659_v35, %v7672_v43 }
 0x488   :  { %1871 = vmatprep.subr.bf16.mxu1 %v1453_v1  ;;  %v1378_v59 = vsel %vm262_vm3, %v7750_v58, %v7688_v14 }
 0x489   :  { %1872 = vmatpush1.bf16.msra.mxu1 %v1452_v11  ;;  %1974 = vmatpush1.bf16.msra.mxu0 %v1376_v22 }
 0x48a   :  { %v1373_v2 = vpop.permute.xlu1 %1372  ;;  %v1435_v26 = vpop.permute.xlu0 %1434  ;;  %1975 = vmatprep.subr.bf16.mxu0 %v1382_v4  ;;  %1873 = vmatprep.subr.bf16.mxu1 %v1458_v27  ;;  %v1733_v4 = vld [vmem:[#allocation3 + $0x48] sm:$0xff]  ;;  %v7902_v27 = vld [vmem:[%s10186_s3 + $0x18] ss:$12 sps:$4 sm:$0xff]  }
 0x48b   :  { %v1455_v6 = vsel %vm308_vm4, %v1435_v26, %v7774_v15  ;;  %v1454_v34 = vsel %vm308_vm4, %v7761_v52, %v1435_v26  ;;  %v1535_v52 = vsel %vm354_vm5, %v7556_v39, %v7659_v35  ;;  %v1538_v39 = vsel %vm354_vm5, %v7665_v20, %v7682_v9 }
 0x48c   :  { %v1383_v58 = vsel %vm262_vm3, %v7648_v42, %v1373_v2 }
 0x48d   :  { %1874 = vmatpush1.bf16.msra.mxu1 %v1457_v54  ;;  %1976 = vmatpush1.bf16.msra.mxu0 %v1381_v13 }
 0x48e   :  { %v7830_v50 = vpop.permute.xlu1 %1592  ;;  %v1509_v17 = vpop.permute.xlu0 %1508  ;;  %1977 = vmatprep.subr.bf16.mxu0 %v1455_v6 }
 0x48f   :  { %v1530_v12 = vsel %vm354_vm5, %v7661_v36, %v1509_v17  ;;  %v1531_v18 = vsel %vm354_vm5, %v1509_v17, %v7784_v60  ;;  %v1459_v36 = vsel %vm308_vm4, %v7655_v32, %v7653_v31  ;;  %v1614_v32 = vsel %vm10219_vm6, %v7670_v40, %v7684_v47 }
 0x490   :  { %1875 = vmatprep.subr.bf16.mxu1 %v1531_v18 }
 0x491   :  { %1876 = vmatpush1.bf16.msra.mxu1 %v1530_v12  ;;  %1978 = vmatpush1.bf16.msra.mxu0 %v1454_v34 }
 0x492   :  { %v1127_v0 = vpop.permute.xlu1 %1126  ;;  %v1513_v55 = vpop.permute.xlu0 %1512  ;;  %1979 = vmatprep.subr.bf16.mxu0 %v1460_v33  ;;  %1877 = vmatprep.subr.bf16.mxu1 %v1536_v57 }
 0x493   :  { %v1533_v62 = vsel %vm354_vm5, %v1513_v55, %v7798_v45  ;;  %v1532_v31 = vsel %vm354_vm5, %v7784_v60, %v1513_v55  ;;  %v1537_v60 = vsel %vm354_vm5, %v7672_v43, %v7665_v20  ;;  %v7885_v20 = vld [vmem:[%s10186_s3 + $0x1c] ss:$12 sps:$4 sm:$0xff]   ;;  %v1728_v43 = vld [vmem:[#allocation3 + $0x20] sm:$0xff]  ;;  %v1144_v13 = vsel %vm124_vm0, %v7686_v48, %v1127_v0 }
 0x495   :  { %1878 = vmatpush1.bf16.msra.mxu1 %v1535_v52  ;;  %1980 = vmatpush1.bf16.msra.mxu0 %v1459_v36 }
 0x496   :  { %v1139_v56 = vpop.permute.xlu1 %1138  ;;  %v1587_v5 = vpop.permute.xlu0 %1586  ;;  %1981 = vmatprep.subr.bf16.mxu0 %v1533_v62 }
 0x497   :  { %v1608_v16 = vsel %vm10217_vm15, %v7678_v49, %v1587_v5  ;;  %v1609_v53 = vsel %vm10218_vm8, %v1587_v5, %v7808_v61  ;;  %vm10223_vm15 = vmmov %vm10219_vm6 }
 0x498   :  { %1879 = vmatprep.subr.bf16.mxu1 %v1609_v53  ;;  %v1616_v14 = vsel %vm10223_vm15, %v7680_v51, %v7699_v46  ;;  %vm10224_vm8 = vmmov %vm10219_vm6 }
 0x499   :  { %1880 = vmatpush1.bf16.msra.mxu1 %v1608_v16  ;;  %1982 = vmatpush1.bf16.msra.mxu0 %v1532_v31  ;;  %v1615_v22 = vsel %vm10224_vm8, %v7684_v47, %v7680_v51 }
 0x49a   :  { %v1439_v35 = vpop.permute.xlu0 %1438  ;;  %1983 = vmatprep.subr.bf16.mxu0 %v1538_v39  ;;  %1881 = vmatprep.subr.bf16.mxu1 %v1614_v32  ;;  %v1205_v49 = vpop.permute.xlu1 %1204 }
 0x49b   :  { %v1456_v42 = vsel %vm308_vm4, %v7774_v15, %v1439_v35  ;;  %v1149_v15 = vsel %vm124_vm0, %v7574_v19, %v1139_v56  ;;  %v1222_v12 = vsel %vm170_vm1, %v7697_v63, %v1205_v49 }
 0x49d   :  { %1882 = vmatpush1.bf16.msra.mxu1 %v1613_v10  ;;  %1984 = vmatpush1.bf16.msra.mxu0 %v1537_v60 }
 0x49e   :  { %v1591_v11 = vpop.permute.xlu0 %1590  ;;  %6559 = vmatprep.subr.bf16.mxu1 %v1378_v59 }
 0x49f   :  { %v1610_v24 = vsel %vm10221_vm10, %v7808_v61, %v1591_v11  ;;  %v1611_v40 = vsel %vm10222_vm11, %v1591_v11, %v7830_v50  ;;  %v7893_v61 = vpop.permute.xlu1 %1670 }
 0x4a0   :  { %1884 = vmatmul.mubr.bf16.vlgmr.msra.gmra.mrb[8].mxu1 %v7873_v3  ;;  %1985 = vmatprep.subr.bf16.mxu0 %v1611_v40 }
 0x4a1   :  { %1986 = vmatpush1.bf16.msra.mxu0 %v1610_v24  ;;  %6560 = vmatpush3.bf16.msra.mxu1 %v1728_v43 }
 0x4a2   :  { %v1451_v1 = vpop.permute.xlu0 %1450  ;;  %1987 = vmatprep.subr.bf16.mxu0 %v1616_v14  ;;  %6561 = vmatprep.subr.bf16.mxu1 %v1383_v58 }
 0x4a3   :  { %1893 = vmatprep.mubr.bf16.mxu1 %v7885_v20  ;;  %v1683_v26 = vpop.permute.xlu1 %1682  ;;  %v1461_v51 = vsel %vm308_vm4, %v7667_v37, %v1451_v1 }
 0x4a5   :  { %1988 = vmatpush1.bf16.msra.mxu0 %v1615_v22  ;;  %6562 = vmatpush3.bf16.msra.mxu1 %v1733_v4 }
 0x4a6   :  { %v1517_v2 = vpop.permute.xlu0 %1516  ;;  %6563 = vmatprep.subr.bf16.mxu1 %v1456_v42 }
 0x4a7   :  { %v1217_v54 = vpop.permute.xlu1 %1216  ;;  %v1534_v48 = vsel %vm354_vm5, %v7798_v45, %v1517_v2 }
 0x4a8   :  { %1894 = vmatmul.mubr.bf16.gmra.mrb[12].mxu1 %v7902_v27  ;;  %1990 = vmatmul.mubr.bf16.vlgmr.msra.gmra.mrb[20].mxu0 %v7873_v3  ;;  %v1227_v18 = vsel %vm170_vm1, %v7597_v21, %v1217_v54 }
 0x4a9   :  { %6564 = vmatpush3.bf16.msra.mxu1 %v1144_v13  ;;  %1999 = vmatprep.mubr.bf16.mxu0 %v7885_v20 }
 0x4aa   :  { %v1681_v47 = vpop.permute.xlu0 %1680  ;;  %6565 = vmatprep.subr.bf16.mxu1 %v1461_v51  ;;  %2095 = vmatprep.mubr.bf16.mxu1 %v7609_v23  ;;  %v10226_v51 = vld [vmem:[#allocation7_spill] sm:$0xff] }
 0x4ab   :  { %v1694_v19 = vsel %vm10210_vm7, %v1681_v47, %v1683_v26  ;;  %v1283_v45 = vpop.permute.xlu1 %1282  ;;  %v1693_v63 = vsel %vm10210_vm7, %v7542_v30, %v1681_v47 }
 0x4ac   :  { %v1300_v57 = vsel %vm216_vm2, %v7721_v44, %v1283_v45 }
 0x4ad   :  { %6566 = vmatpush3.bf16.msra.mxu1 %v1149_v15 }
 0x4ae   :  { %v1669_v6 = vpop.permute.xlu0 %1668  ;;  %6567 = vmatprep.subr.bf16.mxu1 %v1534_v48 }
 0x4af   :  { %v1688_v37 = vsel %vm10210_vm7, %v7676_v41, %v1669_v6  ;;  %v1689_v17 = vsel %vm10210_vm7, %v1669_v6, %v7893_v61 }
 0x4b0   :  { %2000 = vmatmul.mubr.bf16.gmra.mrb[24].mxu0 %v7902_v27  ;;  %2010 = vmatprep.subr.bf16.mxu0 %v1689_v17 }
 0x4b1   :  { %2011 = vmatpush1.bf16.msra.mxu0 %v1688_v37  ;;  %6568 = vmatpush3.bf16.msra.mxu1 %v1222_v12  ;;  %v10227_v37 = vld [vmem:[#allocation8_spill] sm:$0xff] }
 0x4b2   :  { %v1529_v23 = vpop.permute.xlu0 %1528  ;;  %2012 = vmatprep.subr.bf16.mxu0 %v1694_v19  ;;  %2042 = vmatprep.mubr.bf16.mxu0 %v10216_v28 }
 0x4b3   :  { %v1539_v41 = vsel %vm354_vm5, %v7682_v9, %v1529_v23  ;;  %v1295_v9 = vpop.permute.xlu1 %1294 }
 0x4b4   :  { %6569 = vmatprep.subr.bf16.mxu1 %v1539_v41  ;;  %v1305_v0 = vsel %vm216_vm2, %v7626_v29, %v1295_v9 }
 0x4b5   :  { %2013 = vmatpush1.bf16.msra.mxu0 %v1693_v63  ;;  %6570 = vmatpush3.bf16.msra.mxu1 %v1227_v18 }
 0x4b6   :  { %v1595_v34 = vpop.permute.xlu0 %1594 }
 0x4b7   :  { %v1612_v33 = vsel %vm10219_vm6, %v7830_v50, %v1595_v34  ;;  %v1685_v55 = vpop.permute.xlu1 %1684 }
 0x4b8   :  { %6518 = vmatmul.mubr.msk.bf16.vlgmr.msra.gmra.mrb[20].mxu0 %vm10209_vm14, %v7707_v25  ;;  %6571 = vmatprep.subr.bf16.mxu1 %v1612_v33 }
 0x4b9   :  { %6572 = vmatpush3.bf16.msra.mxu1 %v1300_v57  ;;  %2052 = vmatprep.mubr.bf16.mxu0 %v10216_v28 }
 0x4ba   :  { %v1607_v21 = vpop.permute.xlu0 %1606 }
 0x4bb   :  { %v1617_v30 = vsel %vm10225_vm9, %v7699_v46, %v1607_v21  ;;  %v1695_v46 = vsel %vm10210_vm7, %v1683_v26, %v1685_v55 }
 0x4bc   :  { %6573 = vmatprep.subr.bf16.mxu1 %v1617_v30 }
 0x4bd   :  { %6574 = vmatpush3.bf16.msra.mxu1 %v1305_v0 }
 0x4be   :  { %v1673_v50 = vpop.permute.xlu0 %1672 }
 0x4bf   :  { %v1690_v44 = vsel %vm10210_vm7, %v7893_v61, %v1673_v50 }
 0x4c0   :  { %6519 = vmatmul.mubr.msk.bf16.gmra.mrb[24].mxu0 %vm10209_vm14, %v7731_v38  ;;  %2096 = vmatmul.mubr.bf16.vlgmr.msra.gmra.mrb[16].mxu1 %v7873_v3 }
 0x4c1   :  { %6694 = vmatprep.subr.bf16.mxu0 %v1690_v44  ;;  %2103 = vmatprep.mubr.bf16.mxu1 %v7885_v20 }
 0x4c2   :  { %6695 = vmatpush3.bf16.msra.mxu0 %v1690_v44  ;;  %6698 = vmatprep.mubr.msk.bf16.mxu0 %vm10209_vm14, %v7707_v25 }
 0x4c3   :  { %6696 = vmatprep.subr.bf16.mxu0 %v1695_v46 }
 0x4c6   :  { %6697 = vmatpush3.bf16.msra.mxu0 %v1695_v46 }
 0x4c8   :  { %2104 = vmatmul.mubr.bf16.gmra.mrb[20].mxu1 %v7902_v27 }
 0x4c9   :  { %6699 = vmatmul.mubr.msk.bf16.vlgmr.msra.gmra.mrb[28].mxu0 %vm10209_vm14, %v7731_v38 }
 0x53b   :  { %v1938_v29 = vpop.f32.mrb[12].mxu0 }
 0x53c   :  { %v1940_v36 = vpop.f32.mrb[13].mxu0 }
 0x53d   :  { %v1942_v52 = vpop.f32.mrb[14].mxu0 }
 0x53e   :  { %v1944_v62 = vpop.f32.mrb[15].mxu0 }
 0x543   :  { %v1948_v56 = vpop.f32.mrb[16].mxu0 }
 0x544   :  { %v1950_v5 = vpop.f32.mrb[17].mxu0 }
 0x545   :  { %v1952_v16 = vpop.f32.mrb[18].mxu0 }
 0x546   :  { %v1954_v53 = vpop.f32.mrb[19].mxu0 }
 0x573   :  { %v1885_v31 = vpop.f32.mrb[8].mxu1 }
 0x574   :  { %v7956_v39 = vadd.f32 %v1938_v29, %v1885_v31  ;;  %v1887_v32 = vpop.f32.mrb[9].mxu1 }
 0x575   :  { %v7958_v25 = vadd.f32 %v1940_v36, %v1887_v32  ;;  %v1889_v35 = vpop.f32.mrb[10].mxu1 }
 0x576   :  { %v7960_v49 = vadd.f32 %v1942_v52, %v1889_v35  ;;  %v1891_v10 = vpop.f32.mrb[11].mxu1  ;;  %v2161_v14 = vmul.f32 %v7956_v39, %v7173_v7 }
 0x577   :  { %v7962_v60 = vadd.f32 %v1944_v62, %v1891_v10  ;;  %v2162_v58 = vmul.f32 %v7958_v25, %v7175_v8 }
 0x578   :  { %v2166_v61 = vmul.f32 %v7960_v49, %v7173_v7  ;;  %v2205_v22 = vmul.f32 %v2161_v14, %v2161_v14 }
 0x579   :  { %v2167_v1 = vmul.f32 %v7962_v60, %v7175_v8  ;;  %v2206_v4 = vmul.f32 %v2162_v58, %v2162_v58  ;;  %v2181_v26 = vadd.f32 %v2162_v58, %v2161_v14 }
 0x57a   :  { %v2210_v27 = vmul.f32 %v2166_v61, %v2166_v61 }
 0x57b   :  { %v1895_v38 = vpop.f32.mrb[12].mxu1  ;;  %v2211_v42 = vmul.f32 %v2167_v1, %v2167_v1  ;;  %v2225_v13 = vadd.f32 %v2206_v4, %v2205_v22  ;;  %v2187_v54 = vadd.f32 %v2167_v1, %v2166_v61 }
 0x57c   :  { %v7964_v3 = vadd.f32 %v1948_v56, %v1895_v38  ;;  %v1897_v59 = vpop.f32.mrb[13].mxu1 }
 0x57d   :  { %v7966_v11 = vadd.f32 %v1950_v5, %v1897_v59  ;;  %v1899_v24 = vpop.f32.mrb[14].mxu1  ;;  %v2231_v19 = vadd.f32 %v2211_v42, %v2210_v27 }
 0x57e   :  { %v7968_v40 = vadd.f32 %v1952_v16, %v1899_v24  ;;  %v1901_v20 = vpop.f32.mrb[15].mxu1  ;;  %v2171_v48 = vmul.f32 %v7964_v3, %v7173_v7 }
 0x57f   :  { %v7970_v43 = vadd.f32 %v1954_v53, %v1901_v20  ;;  %v2172_v6 = vmul.f32 %v7966_v11, %v7175_v8 }
 0x580   :  { %v2176_v63 = vmul.f32 %v7968_v40, %v7173_v7  ;;  %v2215_v50 = vmul.f32 %v2171_v48, %v2171_v48 }
 0x581   :  { %v2177_v34 = vmul.f32 %v7970_v43, %v7175_v8  ;;  %v2216_v55 = vmul.f32 %v2172_v6, %v2172_v6  ;;  %v2193_v16 = vadd.f32 %v2172_v6, %v2171_v48 }
 0x582   :  { %v2220_v52 = vmul.f32 %v2176_v63, %v2176_v63 }
 0x583   :  { %v2221_v62 = vmul.f32 %v2177_v34, %v2177_v34  ;;  %v2237_v10 = vadd.f32 %v2216_v55, %v2215_v50  ;;  %v2199_v14 = vadd.f32 %v2177_v34, %v2176_v63 }
 0x585   :  { %v2243_v27 = vadd.f32 %v2221_v62, %v2220_v52  ;;  %v10228_v62 = vld [vmem:[#allocation9_spill] sm:$0xff] }
 0x58b   :  { %v7980_v2 = vpop.f32.mrb[20].mxu0 }
 0x58c   :  { %v2163_v47 = vmul.f32 %v7980_v2, %v10226_v51  ;;  %v7984_v15 = vpop.f32.mrb[21].mxu0 }
 0x58d   :  { %v2164_v17 = vmul.f32 %v7984_v15, %v10227_v37  ;;  %v7992_v12 = vpop.f32.mrb[22].mxu0 }
 0x58e   :  { %v2182_v23 = vadd.f32 %v2181_v26, %v2163_v47  ;;  %v2207_v45 = vmul.f32 %v2163_v47, %v2163_v47  ;;  %v2168_v41 = vmul.f32 %v7992_v12, %v10226_v51  ;;  %v7996_v18 = vpop.f32.mrb[23].mxu0 }
 0x58f   :  { %v2208_v33 = vmul.f32 %v2164_v17, %v2164_v17  ;;  %v2169_v57 = vmul.f32 %v7996_v18, %v10227_v37 }
 0x590   :  { %v2226_v9 = vadd.f32 %v2225_v13, %v2207_v45  ;;  %v2183_v21 = vadd.f32 %v2182_v23, %v2164_v17  ;;  %v2188_v30 = vadd.f32 %v2187_v54, %v2168_v41  ;;  %v2212_v0 = vmul.f32 %v2168_v41, %v2168_v41 }
 0x591   :  { %v2213_v44 = vmul.f32 %v2169_v57, %v2169_v57 }
 0x592   :  { %v8004_v46 = vadd.f32 %v2226_v9, %v2208_v33  ;;  %v2232_v29 = vadd.f32 %v2231_v19, %v2212_v0  ;;  %v2189_v36 = vadd.f32 %v2188_v30, %v2169_v57 }
 0x593   :  { %v8006_v56 = vpop.f32.mrb[24].mxu0  ;;  %v6575_v5 = vpop.f32.mrb[16].mxu1 }
 0x594   :  { %v2233_v53 = vadd.f32 %v2232_v29, %v2213_v44  ;;  %v2173_v31 = vmul.f32 %v8006_v56, %v10226_v51  ;;  %v8010_v32 = vpop.f32.mrb[25].mxu0  ;;  %v6576_v35 = vpop.f32.mrb[17].mxu1 }
 0x595   :  { %v2174_v38 = vmul.f32 %v8010_v32, %v10227_v37  ;;  %v6577_v59 = vadd.f32 %v6576_v35, %v6575_v5  ;;  %v8014_v24 = vpop.f32.mrb[26].mxu0  ;;  %v6578_v20 = vpop.f32.mrb[18].mxu1 }
 0x596   :  { %v2194_v58 = vadd.f32 %v2193_v16, %v2173_v31  ;;  %v2217_v61 = vmul.f32 %v2173_v31, %v2173_v31  ;;  %v2178_v1 = vmul.f32 %v8014_v24, %v10226_v51  ;;  %v8018_v22 = vpop.f32.mrb[27].mxu0  ;;  %v6579_v4 = vpop.f32.mrb[19].mxu1 }
 0x597   :  { %v2218_v42 = vmul.f32 %v2174_v38, %v2174_v38  ;;  %v2179_v26 = vmul.f32 %v8018_v22, %v10227_v37  ;;  %v6580_v13 = vadd.f32 %v6579_v4, %v6578_v20 }
 0x598   :  { %v2238_v47 = vadd.f32 %v2237_v10, %v2217_v61  ;;  %v2195_v54 = vadd.f32 %v2194_v58, %v2174_v38  ;;  %v2200_v48 = vadd.f32 %v2199_v14, %v2178_v1  ;;  %v2222_v6 = vmul.f32 %v2178_v1, %v2178_v1 }
 0x599   :  { %v2223_v17 = vmul.f32 %v2179_v26, %v2179_v26 }
 0x59a   :  { %v2239_v19 = vadd.f32 %v2238_v47, %v2218_v42  ;;  %v2244_v23 = vadd.f32 %v2243_v27, %v2222_v6  ;;  %v2201_v45 = vadd.f32 %v2200_v48, %v2179_v26 }
 0x59b   :  { %v6581_v41 = vpop.f32.mrb[20].mxu1 }
 0x59c   :  { %v2245_v63 = vadd.f32 %v2244_v23, %v2223_v17  ;;  %v6700_v34 = vpop.f32.mrb[28].mxu0  ;;  %v6582_v33 = vpop.f32.mrb[21].mxu1 }
 0x59d   :  { %v6583_v57 = vadd.f32 %v6582_v33, %v6581_v41  ;;  %v2146_v9 = vpop.f32.mrb[29].mxu0  ;;  %v6584_v30 = vpop.f32.mrb[22].mxu1 }
 0x59e   :  { %v8022_v0 = vadd.f32 %v6577_v59, %v2146_v9  ;;  %v6701_v50 = vpop.f32.mrb[30].mxu0  ;;  %v6585_v55 = vpop.f32.mrb[23].mxu1 }
 0x59f   :  { %v8024_v44 = vadd.f32 %v6700_v34, %v6583_v57  ;;  %v6586_v29 = vadd.f32 %v6585_v55, %v6584_v30  ;;  %v2149_v52 = vpop.f32.mrb[31].mxu0 }
 0x5a0   :  { %v2165_v5 = vmul.f32 %v8022_v0, %v10228_v62  ;;  %v8028_v16 = vadd.f32 %v6580_v13, %v2149_v52 }
 0x5a1   :  { %v8030_v31 = vadd.f32 %v6701_v50, %v6586_v29  ;;  %v2175_v59 = vmul.f32 %v8024_v44, %v10228_v62 }
 0x5a2   :  { %v2170_v35 = vmul.f32 %v8028_v16, %v10228_v62  ;;  %v2184_v10 = vadd.f32 %v2183_v21, %v2165_v5  ;;  %v2209_v58 = vmul.f32 %v2165_v5, %v2165_v5 }
 0x5a3   :  { %v2180_v38 = vmul.f32 %v8030_v31, %v10228_v62  ;;  %v2196_v61 = vadd.f32 %v2195_v54, %v2175_v59  ;;  %v2219_v1 = vmul.f32 %v2175_v59, %v2175_v59 }
 0x5a4   :  { %2185 = vadd.xlane.f32.xlu0 %v2184_v10  ;;  %v2190_v20 = vadd.f32 %v2189_v36, %v2170_v35  ;;  %v2214_v4 = vmul.f32 %v2170_v35, %v2170_v35  ;;  %v2228_v27 = vadd.f32 %v8004_v46, %v2209_v58 }
 0x5a5   :  { %v2202_v14 = vadd.f32 %v2201_v45, %v2180_v38  ;;  %v2240_v21 = vadd.f32 %v2239_v19, %v2219_v1  ;;  %v2224_v26 = vmul.f32 %v2180_v38, %v2180_v38 }
 0x5a6   :  { %2191 = vadd.xlane.f32.xlu1 %v2190_v20  ;;  %v2234_v42 = vadd.f32 %v2233_v53, %v2214_v4  ;;  %v2266_v4 = vld [vmem:[%s10192_s9 + $0x8] sm:$0xff] }
 0x5a7   :  { %v2246_v13 = vadd.f32 %v2245_v63, %v2224_v26 }
 0x5a8   :  { %2203 = vadd.xlane.f32.xlu0 %v2202_v14  ;;  %v2265_v14 = vld [vmem:[%s10192_s9] sm:$0xff] }
 0x5aa   :  { %2197 = vadd.xlane.f32.xlu1 %v2196_v61 }
 0x5ac   :  { %2229 = vadd.xlane.f32.xlu0 %v2228_v27  ;;  %v2267_v27 = vld [vmem:[%s10192_s9 + $0x10] sm:$0xff] }
 0x5ae   :  { %2241 = vadd.xlane.f32.xlu1 %v2240_v21 }
 0x5b0   :  { %2235 = vadd.xlane.f32.xlu0 %v2234_v42 }
 0x5b4   :  { %2247 = vadd.xlane.f32.xlu0 %v2246_v13  ;;  %v2268_v13 = vld [vmem:[%s10192_s9 + $0x18] sm:$0xff] }
 0x631   :  { %v2186_v47 = vpop.xlane.xlu0 %2185 }
 0x632   :  { %v2249_v6 = vmul.f32 0.001953125, %v2186_v47 }
 0x633   :  { %v2192_v36 = vpop.xlane.xlu1 %2191 }
 0x634   :  { %v2250_v54 = vmul.f32 0.001953125, %v2192_v36  ;;  %v2257_v41 = vmul.f32 %v2249_v6, %v2249_v6 }
 0x635   :  { %v2204_v48 = vpop.xlane.xlu0 %2203 }
 0x636   :  { %v2258_v9 = vmul.f32 %v2250_v54, %v2250_v54  ;;  %v2252_v30 = vmul.f32 0.001953125, %v2204_v48 }
 0x637   :  { %v2198_v17 = vpop.xlane.xlu1 %2197 }
 0x638   :  { %v2251_v23 = vmul.f32 0.001953125, %v2198_v17  ;;  %v2260_v35 = vmul.f32 %v2252_v30, %v2252_v30 }
 0x639   :  { %v2230_v45 = vpop.xlane.xlu0 %2229 }
 0x63a   :  { %v2253_v34 = vmul.f32 0.001953125, %v2230_v45  ;;  %v2259_v46 = vmul.f32 %v2251_v23, %v2251_v23  ;;  %v2283_v45 = vld [vmem:[%s10196_s13 + $0x10] sm:$0xff] }
 0x63b   :  { %v2242_v33 = vpop.xlane.xlu1 %2241 }
 0x63c   :  { %v2261_v57 = vsub.f32 %v2253_v34, %v2257_v41  ;;  %v2255_v19 = vmul.f32 0.001953125, %v2242_v33  ;;  %v2281_v41 = vld [vmem:[%s10196_s13] sm:$0xff] }
 0x63d   :  { %v2236_v53 = vpop.xlane.xlu0 %2235 }
 0x63e   :  { %v2269_v50 = vadd.f32 1e-05, %v2261_v57  ;;  %v2263_v63 = vsub.f32 %v2255_v19, %v2259_v46  ;;  %v2254_v55 = vmul.f32 0.001953125, %v2236_v53  ;;  %v2282_v57 = vld [vmem:[%s10196_s13 + $0x8] sm:$0xff]  ;;  %v2284_v19 = vld [vmem:[%s10196_s13 + $0x18] sm:$0xff] }
 0x640   :  { %6846 = vrsqrt.f32 %v2269_v50  ;;  %v2271_v29 = vadd.f32 1e-05, %v2263_v63  ;;  %v2262_v52 = vsub.f32 %v2254_v55, %v2258_v9 }
 0x641   :  { %v2248_v5 = vpop.xlane.xlu0 %2247 }
 0x642   :  { %6848 = vrsqrt.f32 %v2271_v29  ;;  %v2270_v10 = vadd.f32 1e-05, %v2262_v52  ;;  %v2256_v38 = vmul.f32 0.001953125, %v2248_v5 }
 0x644   :  { %6850 = vrsqrt.f32 %v2270_v10  ;;  %v2264_v59 = vsub.f32 %v2256_v38, %v2260_v35 }
 0x646   :  { %v2272_v20 = vadd.f32 1e-05, %v2264_v59 }
 0x648   :  { %6852 = vrsqrt.f32 %v2272_v20 }
 0x64a   :  { %v6847_v58 = vpop.eup %6846 }
 0x64b   :  { %v2277_v61 = vmul.f32 %v6847_v58, %v2265_v14 }
 0x64c   :  { %v6849_v1 = vpop.eup %6848 }
 0x64d   :  { %2295 = vperm.xlu1 %6800, %v2277_v61   ;;  %v2279_v26 = vmul.f32 %v6849_v1, %v2267_v27  ;;  %v2285_v17 = vmul.f32 %v2277_v61, %v2249_v6 }
 0x64e   :  { %v6851_v21 = vpop.eup %6850 }
 0x64f   :  { %v2278_v42 = vmul.f32 %v6851_v21, %v2266_v4  ;;  %v2287_v48 = vmul.f32 %v2279_v26, %v2251_v23  ;;  %v2289_v33 = vsub.f32 %v2281_v41, %v2285_v17 }
 0x651   :  { %2300 = vperm.xlu0 %6801, %v2278_v42   ;;  %v2291_v34 = vsub.f32 %v2283_v45, %v2287_v48  ;;  %v2286_v46 = vmul.f32 %v2278_v42, %v2250_v54 }
 0x652   :  { %v6853_v47 = vpop.eup %6852 }
 0x653   :  { %v2280_v36 = vmul.f32 %v6853_v47, %v2268_v13  ;;  %v2290_v6 = vsub.f32 %v2282_v57, %v2286_v46 }
 0x655   :  { %2305 = vperm.xlu0 %6801, %v2279_v26   ;;  %2310 = vperm.xlu1 %6800, %v2280_v36   ;;  %v2288_v23 = vmul.f32 %v2280_v36, %v2252_v30 }
 0x657   :  { %v2292_v9 = vsub.f32 %v2284_v19, %v2288_v23 }
 0x659   :  { %2345 = vperm.xlu0 %6801, %v2291_v34   ;;  %2335 = vperm.xlu1 %6800, %v2289_v33  }
 0x65d   :  { %2340 = vperm.xlu1 %6800, %v2290_v6  }
 0x661   :  { %2350 = vperm.xlu1 %6800, %v2292_v9  }
 0x6cc   :  { %v2296_v53 = vpop.permute.xlu1 %2295 }
 0x6cd   :  { %v2313_v63 = vmul.f32 %v2296_v53, %v7956_v39  ;;  %v2314_v54 = vmul.f32 %v2296_v53, %v7958_v25  ;;  %v2315_v55 = vmul.f32 %v2296_v53, %v7980_v2  ;;  %v2316_v5 = vmul.f32 %v2296_v53, %v7984_v15 }
 0x6ce   :  { %v2317_v30 = vmul.f32 %v2296_v53, %v8022_v0 }
 0x6d0   :  { %v2301_v50 = vpop.permute.xlu0 %2300 }
 0x6d1   :  { %v2318_v35 = vmul.f32 %v2301_v50, %v7960_v49  ;;  %v2319_v10 = vmul.f32 %v2301_v50, %v7962_v60  ;;  %v2320_v38 = vmul.f32 %v2301_v50, %v7992_v12  ;;  %v2321_v59 = vmul.f32 %v2301_v50, %v7996_v18 }
 0x6d2   :  { %v2322_v39 = vmul.f32 %v2301_v50, %v8028_v16 }
 0x6d4   :  { %v2311_v29 = vpop.permute.xlu1 %2310  ;;  %v2306_v52 = vpop.permute.xlu0 %2305 }
 0x6d5   :  { %v2328_v25 = vmul.f32 %v2311_v29, %v7968_v40  ;;  %v2329_v2 = vmul.f32 %v2311_v29, %v7970_v43  ;;  %v2330_v20 = vmul.f32 %v2311_v29, %v8014_v24  ;;  %v2331_v15 = vmul.f32 %v2311_v29, %v8018_v22 }
 0x6d6   :  { %v2332_v0 = vmul.f32 %v2311_v29, %v8030_v31  ;;  %v2323_v49 = vmul.f32 %v2306_v52, %v7964_v3  ;;  %v2324_v60 = vmul.f32 %v2306_v52, %v7966_v11  ;;  %v2325_v12 = vmul.f32 %v2306_v52, %v8006_v56 }
 0x6d7   :  { %v2326_v18 = vmul.f32 %v2306_v52, %v8010_v32  ;;  %v2327_v40 = vmul.f32 %v2306_v52, %v8024_v44 }
 0x6d8   :  { %v2336_v14 = vpop.permute.xlu1 %2335  ;;  %v2346_v16 = vpop.permute.xlu0 %2345 }
 0x6d9   :  { %v2353_v58 = vadd.f32 %v2336_v14, %v2313_v63  ;;  %v8083_v43 = vadd.f32 %v2336_v14, %v2314_v54  ;;  %v8085_v24 = vadd.f32 %v2336_v14, %v2315_v55  ;;  %v8087_v22 = vadd.f32 %v2336_v14, %v2316_v5 }
 0x6da   :  { %v8089_v31 = vadd.f32 %v2336_v14, %v2317_v30  ;;  %v2363_v3 = vadd.f32 %v2346_v16, %v2323_v49  ;;  %v2364_v61 = vadd.f32 %v2346_v16, %v2324_v60  ;;  %v2365_v11 = vadd.f32 %v2346_v16, %v2325_v12 }
 0x6db   :  { %v2366_v1 = vadd.f32 %v2346_v16, %v2326_v18  ;;  %v8091_v56 = vadd.f32 %v2346_v16, %v2327_v40  ;;  %vm2373_vm10 = vcmp.gt.f32.partialorder %v2353_v58, 0.0  ;;  %v2393_v26 = vmul.f32 0.2, %v2353_v58 }
 0x6dc   :  { %v2341_v32 = vpop.permute.xlu1 %2340  ;;  %vm2384_vm11 = vcmp.gt.f32.partialorder %v2364_v61, 0.0  ;;  %v2404_v4 = vmul.f32 0.2, %v2364_v61  ;;  %vm2383_vm15 = vcmp.gt.f32.partialorder %v2363_v3, 0.0  ;;  %v2403_v44 = vmul.f32 0.2, %v2363_v3 }
 0x6dd   :  { %v2358_v27 = vadd.f32 %v2341_v32, %v2318_v35  ;;  %v8093_v21 = vadd.f32 %v2341_v32, %v2319_v10  ;;  %v8095_v42 = vadd.f32 %v2341_v32, %v2320_v38  ;;  %v8097_v13 = vadd.f32 %v2341_v32, %v2321_v59 }
 0x6de   :  { %v8099_v47 = vadd.f32 %v2341_v32, %v2322_v39  ;;  %v2424_v36 = vsel %vm2384_vm11, %v2364_v61, %v2404_v4  ;;  %v2423_v48 = vsel %vm2383_vm15, %v2363_v3, %v2403_v44  ;;  %vm2386_vm8 = vcmp.gt.f32.partialorder %v2366_v1, 0.0 }
 0x6df   :  { %v2444_v17 = vmul.f32 %v2424_v36, %v7175_v8  ;;  %v2406_v45 = vmul.f32 0.2, %v2366_v1  ;;  %vm2385_vm6 = vcmp.gt.f32.partialorder %v2365_v11, 0.0  ;;  %v2443_v34 = vmul.f32 %v2423_v48, %v7173_v7 }
 0x6e0   :  { %v2351_v41 = vpop.permute.xlu1 %2350  ;;  %v2405_v33 = vmul.f32 0.2, %v2365_v11  ;;  %vm2378_vm9 = vcmp.gt.f32.partialorder %v2358_v27, 0.0  ;;  %v2398_v46 = vmul.f32 0.2, %v2358_v27  ;;  %v2413_v63 = vsel %vm2373_vm10, %v2353_v58, %v2393_v26 }
 0x6e1   :  { %v2368_v57 = vadd.f32 %v2351_v41, %v2328_v25  ;;  %v2369_v6 = vadd.f32 %v2351_v41, %v2329_v2  ;;  %v2370_v23 = vadd.f32 %v2351_v41, %v2330_v20  ;;  %v2371_v19 = vadd.f32 %v2351_v41, %v2331_v15 }
 0x6e2   :  { %v2372_v9 = vadd.f32 %v2351_v41, %v2332_v0  ;;  %v2426_v53 = vsel %vm2386_vm8, %v2366_v1, %v2406_v45  ;;  %v2425_v50 = vsel %vm2385_vm6, %v2365_v11, %v2405_v33  ;;  %v2418_v52 = vsel %vm2378_vm9, %v2358_v27, %v2398_v46 }
 0x6e3   :  { %vm2389_vm11 = vcmp.gt.f32.partialorder %v2369_v6, 0.0  ;;  %v2409_v54 = vmul.f32 0.2, %v2369_v6  ;;  %vm2388_vm15 = vcmp.gt.f32.partialorder %v2368_v57, 0.0  ;;  %v2408_v55 = vmul.f32 0.2, %v2368_v57 }
 0x6e4   :  { %vm2391_vm14 = vcmp.gt.f32.partialorder %v2371_v19, 0.0  ;;  %v2411_v29 = vmul.f32 0.2, %v2371_v19  ;;  %vm2390_vm7 = vcmp.gt.f32.partialorder %v2370_v23, 0.0  ;;  %v2446_v35 = vmul.f32 %v2426_v53, %v10227_v37 }
 0x6e5   :  { %v2429_v5 = vsel %vm2389_vm11, %v2369_v6, %v2409_v54  ;;  %v2428_v30 = vsel %vm2388_vm15, %v2368_v57, %v2408_v55  ;;  %v2410_v10 = vmul.f32 0.2, %v2370_v23  ;;  %v2445_v25 = vmul.f32 %v2425_v50, %v10226_v51 }
 0x6e6   :  { %v2449_v38 = vmul.f32 %v2429_v5, %v7175_v8  ;;  %v2448_v59 = vmul.f32 %v2428_v30, %v7173_v7  ;;  %v2431_v39 = vsel %vm2391_vm14, %v2371_v19, %v2411_v29  ;;  %v2438_v15 = vmul.f32 %v2418_v52, %v7173_v7 }
 0x6e7   :  { %v2451_v2 = vmul.f32 %v2431_v39, %v10227_v37  ;;  %v2430_v20 = vsel %vm2390_vm7, %v2370_v23, %v2410_v10  ;;  %vm2387_vm10 = vcmp.gt.f32.partialorder %v8091_v56, 0.0  ;;  %vm2392_vm8 = vcmp.gt.f32.partialorder %v2372_v9, 0.0 }
 0x6e8   :  { %v2459_v0 = vpack.c.bf16 %v2449_v38, %v2444_v17  ;;  %v2458_v49 = vpack.c.bf16 %v2448_v59, %v2443_v34  ;;  %v2450_v60 = vmul.f32 %v2430_v20, %v10226_v51  ;;  %v2433_v18 = vmul.f32 %v2413_v63, %v7173_v7 }
 0x6e9   :  { %v2461_v12 = vpack.c.bf16 %v2451_v2, %v2446_v35  ;;  %v2407_v14 = vmul.f32 0.2, %v8091_v56  ;;  %v2412_v16 = vmul.f32 0.2, %v2372_v9  ;;  %vm2375_vm7 = vcmp.gt.f32.partialorder %v8085_v24, 0.0 }
 0x6ea   :  { %2485 = vrot.lane.b32.xlu0 %v2459_v0, %s6903_s12  ;;  %2483 = vrot.lane.b32.xlu1 %v2458_v49, %s6903_s12  ;;  %v2460_v40 = vpack.c.bf16 %v2450_v60, %v2445_v25  ;;  %vm2380_vm14 = vcmp.gt.f32.partialorder %v8095_v42, 0.0  ;;  %v2395_v58 = vmul.f32 0.2, %v8085_v24  ;;  %v2453_v3 = vpack.c.bf16 %v2438_v15, %v2433_v18 }
 0x6eb   :  { %v2427_v61 = vsel %vm2387_vm10, %v8091_v56, %v2407_v14  ;;  %v2432_v11 = vsel %vm2392_vm8, %v2372_v9, %v2412_v16  ;;  %v2400_v1 = vmul.f32 0.2, %v8095_v42  ;;  %vm2374_vm6 = vcmp.gt.f32.partialorder %v8083_v43, 0.0 }
 0x6ec   :  { %v2452_v32 = vmul.f32 %v2432_v11, %v10228_v62  ;;  %v2415_v4 = vsel %vm2375_vm7, %v8085_v24, %v2395_v58  ;;  %vm2379_vm9 = vcmp.gt.f32.partialorder %v8093_v21, 0.0  ;;  %v2447_v44 = vmul.f32 %v2427_v61, %v10228_v62 }
 0x6ed   :  { %v2420_v27 = vsel %vm2380_vm14, %v8095_v42, %v2400_v1  ;;  %v2394_v26 = vmul.f32 0.2, %v8083_v43  ;;  %v2399_v36 = vmul.f32 0.2, %v8093_v21  ;;  %v2435_v56 = vmul.f32 %v2415_v4, %v10226_v51 }
 0x6ee   :  { %2489 = vrot.lane.b32.xlu0 %v2461_v12, %s6903_s12  ;;  %2487 = vrot.lane.b32.xlu1 %v2460_v40, %s6903_s12  ;;  %v2440_v24 = vmul.f32 %v2420_v27, %v10226_v51  ;;  %vm2376_vm11 = vcmp.gt.f32.partialorder %v8087_v22, 0.0  ;;  %vm2381_vm15 = vcmp.gt.f32.partialorder %v8097_v13, 0.0  ;;  %v2396_v17 = vmul.f32 0.2, %v8087_v22 }
 0x6ef   :  { %v2414_v48 = vsel %vm2374_vm6, %v8083_v43, %v2394_v26  ;;  %v2419_v42 = vsel %vm2379_vm9, %v8093_v21, %v2399_v36  ;;  %v2401_v45 = vmul.f32 0.2, %v8097_v13  ;;  %v2462_v41 = vpack.c.bf16 %v2452_v32, %v2447_v44 }
 0x6f0   :  { %v2455_v34 = vpack.c.bf16 %v2440_v24, %v2435_v56  ;;  %v2439_v33 = vmul.f32 %v2419_v42, %v7175_v8  ;;  %vm2377_vm10 = vcmp.gt.f32.partialorder %v8089_v31, 0.0  ;;  %v2416_v46 = vsel %vm2376_vm11, %v8087_v22, %v2396_v17  ;;  %v8344_v56 = vld [vmem:[%s10187_s4 + $0x4] ss:$12 sps:$4 sm:$0xff]  }
 0x6f1   :  { %v2421_v57 = vsel %vm2381_vm15, %v8097_v13, %v2401_v45  ;;  %vm2382_vm8 = vcmp.gt.f32.partialorder %v8099_v47, 0.0  ;;  %v2397_v43 = vmul.f32 0.2, %v8089_v31  ;;  %v2434_v21 = vmul.f32 %v2414_v48, %v7175_v8  ;;  %3335 = vmatprep.mubr.bf16.mxu1 %v8344_v56  ;;  %3441 = vmatprep.mubr.bf16.mxu0 %v8344_v56 }
 0x6f2   :  { %2473 = vrot.lane.b32.xlu0 %v2453_v3, %s6903_s12  ;;  %2491 = vrot.lane.b32.xlu1 %v2462_v41, %s6903_s12  ;;  %v2436_v6 = vmul.f32 %v2416_v46, %v10227_v37  ;;  %v2441_v23 = vmul.f32 %v2421_v57, %v10227_v37  ;;  %v2402_v19 = vmul.f32 0.2, %v8099_v47  ;;  %vm10229_vm7 = vcmask 744448  }
 0x6f3   :  { %v2417_v22 = vsel %vm2377_vm10, %v8089_v31, %v2397_v43  ;;  %v2454_v9 = vpack.c.bf16 %v2439_v33, %v2434_v21  ;;  %vm10230_vm14 = vmmov %vm10229_vm7  ;;  %vm10233_vm11 = vcmask 736256  }
 0x6f4   :  { %v2456_v13 = vpack.c.bf16 %v2441_v23, %v2436_v6  ;;  %v2422_v53 = vsel %vm2382_vm8, %v8099_v47, %v2402_v19  ;;  %v2437_v63 = vmul.f32 %v2417_v22, %v10228_v62  ;;  %vm10231_vm6 = vmmov %vm10229_vm7 }
 0x6f5   :  { %v2442_v50 = vmul.f32 %v2422_v53, %v10228_v62  ;;  %vm10232_vm9 = vmmov %vm10231_vm6 }
 0x6f6   :  { %2477 = vrot.lane.b32.xlu0 %v2455_v34, %s6903_s12  ;;  %2475 = vrot.lane.b32.xlu1 %v2454_v9, %s6903_s12  ;;  %vm10234_vm15 = vmmov %vm10233_vm11 }
 0x6f7   :  { %v2457_v54 = vpack.c.bf16 %v2442_v50, %v2437_v63  ;;  %vm10235_vm10 = vmmov %vm10233_vm11 }
 0x6f8   :  { %vm10236_vm8 = vmmov %vm10235_vm10 }
 0x6fa   :  { %2479 = vrot.lane.b32.xlu0 %v2456_v13, %s6903_s12  ;;  %2481 = vrot.lane.b32.xlu1 %v2457_v54, %s6903_s12 }
 0x75c   :  { %v2486_v55 = vpop.permute.xlu0 %2485  ;;  %v2484_v29 = vpop.permute.xlu1 %2483 }
 0x75d   :  { %2519 = vst.msk [vmem:[#allocation2 + $0x30] sm:$0xff] %vm1058_vm12, %v2484_v29  ;;  %v2497_v0 = vsel %vm1037_vm13, %v2484_v29, %v2486_v55 }
 0x760   :  { %v2490_v31 = vpop.permute.xlu0 %2489  ;;  %v2488_v52 = vpop.permute.xlu1 %2487 }
 0x761   :  { %v8196_v60 = vsel %vm1037_vm13, %v2488_v52, %v2490_v31  ;;  %v2498_v12 = vsel %vm1037_vm13, %v2486_v55, %v2488_v52 }
 0x764   :  { %v2474_v47 = vpop.permute.xlu0 %2473  ;;  %v2492_v5 = vpop.permute.xlu1 %2491  ;;  %v8163_v30 = vld [vmem:[#allocation2 + $0x30] sm:$0xff] }
 0x765   :  { %2513 = vst.msk [vmem:[#allocation2] sm:$0xff] %vm1058_vm12, %v2474_v47  ;;  %v8167_v35 = vsel %vm1037_vm13, %v2490_v31, %v2492_v5  ;;  %2581 = vrot.lane.b32.xlu1 %v8163_v30, %s6894_s25 }
 0x766   :  { %2524 = vst.msk [vmem:[#allocation2 + $0x58] sm:$0xff] %vm1037_vm13, %v2492_v5  ;;  %2523 = vst [vmem:[#allocation2 + $0x50] sm:$0xff] %v8167_v35 }
 0x768   :  { %v2478_v10 = vpop.permute.xlu0 %2477  ;;  %v2476_v38 = vpop.permute.xlu1 %2475 }
 0x769   :  { %v8174_v59 = vsel %vm1037_vm13, %v2474_v47, %v2476_v38  ;;  %2659 = vrot.lane.b32.xlu1 %v8163_v30, %s6895_s26  ;;  %v8191_v49 = vsel %vm1037_vm13, %v2476_v38, %v2478_v10 }
 0x76a   :  { %3303 = vmatprep.subr.bf16.mxu1 %v8174_v59 }
 0x76c   :  { %v2480_v39 = vpop.permute.xlu0 %2479  ;;  %v2482_v25 = vpop.permute.xlu1 %2481  ;;  %v2545_v2 = vld [vmem:[#allocation2] sm:$0xff] }
 0x76d   :  { %v8180_v20 = vsel %vm1037_vm13, %v2478_v10, %v2480_v39  ;;  %v8183_v15 = vsel %vm1037_vm13, %v2480_v39, %v2482_v25  ;;  %2518 = vst.msk [vmem:[#allocation2 + $0x28] sm:$0xff] %vm1037_vm13, %v2482_v25  ;;  %2569 = vrot.lane.b32.xlu0 %v2545_v2, %s6894_s25  ;;  %2737 = vrot.lane.b32.xlu1 %v8163_v30, %s6896_s27  ;;  %v2790_v42 = vld [vmem:[#allocation2 + $0x58] sm:$0xff] }
 0x76e   :  { %2517 = vst [vmem:[#allocation2 + $0x20] sm:$0xff] %v8183_v15  ;;  %3304 = vmatpush1.bf16.msra.mxu1 %v2545_v2  ;;  %3409 = vmatprep.subr.bf16.mxu0 %v8180_v20 }
 0x76f   :  { %3305 = vmatprep.subr.bf16.mxu1 %v2497_v0  ;;  %3410 = vmatpush1.bf16.msra.mxu0 %v8191_v49 }
 0x770   :  { %3411 = vmatprep.subr.bf16.mxu0 %v8196_v60 }
 0x771   :  { %2815 = vrot.lane.b32.xlu1 %v8163_v30, %s6897_s28  ;;  %2585 = vrot.lane.b32.xlu0 %v2498_v12, %s6894_s25 }
 0x772   :  { %3306 = vmatpush1.bf16.msra.mxu1 %v8163_v30 }
 0x773   :  { %3412 = vmatpush1.bf16.msra.mxu0 %v2498_v12 }
 0x774   :  { %v8271_v18 = vld [vmem:[#allocation2 + $0x28] sm:$0xff] }
 0x775   :  { %2893 = vrot.lane.b32.xlu1 %v8163_v30, %s6898_s29  ;;  %2647 = vrot.lane.b32.xlu0 %v2545_v2, %s6895_s26 }
 0x779   :  { %2971 = vrot.lane.b32.xlu1 %v8163_v30, %s6899_s30  ;;  %2663 = vrot.lane.b32.xlu0 %v2498_v12, %s6895_s26 }
 0x77d   :  { %3049 = vrot.lane.b32.xlu1 %v8163_v30, %s6900_s0  ;;  %2725 = vrot.lane.b32.xlu0 %v2545_v2, %s6896_s27 }
 0x781   :  { %2583 = vrot.lane.b32.xlu1 %v2497_v0, %s6894_s25  ;;  %2741 = vrot.lane.b32.xlu0 %v2498_v12, %s6896_s27 }
 0x785   :  { %2661 = vrot.lane.b32.xlu1 %v2497_v0, %s6895_s26  ;;  %2587 = vrot.lane.b32.xlu0 %v8196_v60, %s6894_s25 }
 0x789   :  { %2739 = vrot.lane.b32.xlu1 %v2497_v0, %s6896_s27  ;;  %2803 = vrot.lane.b32.xlu0 %v2545_v2, %s6897_s28 }
 0x78d   :  { %2819 = vrot.lane.b32.xlu0 %v2498_v12, %s6897_s28  ;;  %2589 = vrot.lane.b32.xlu1 %v8167_v35, %s6894_s25 }
 0x791   :  { %2665 = vrot.lane.b32.xlu0 %v8196_v60, %s6895_s26  ;;  %2817 = vrot.lane.b32.xlu1 %v2497_v0, %s6897_s28 }
 0x795   :  { %2881 = vrot.lane.b32.xlu0 %v2545_v2, %s6898_s29  ;;  %2667 = vrot.lane.b32.xlu1 %v8167_v35, %s6895_s26 }
 0x799   :  { %2897 = vrot.lane.b32.xlu0 %v2498_v12, %s6898_s29  ;;  %2895 = vrot.lane.b32.xlu1 %v2497_v0, %s6898_s29 }
 0x79d   :  { %2743 = vrot.lane.b32.xlu0 %v8196_v60, %s6896_s27  ;;  %2745 = vrot.lane.b32.xlu1 %v8167_v35, %s6896_s27 }
 0x7a1   :  { %2959 = vrot.lane.b32.xlu0 %v2545_v2, %s6899_s30  ;;  %2973 = vrot.lane.b32.xlu1 %v2497_v0, %s6899_s30 }
 0x7a5   :  { %2975 = vrot.lane.b32.xlu0 %v2498_v12, %s6899_s30  ;;  %2823 = vrot.lane.b32.xlu1 %v8167_v35, %s6897_s28 }
 0x7a9   :  { %2821 = vrot.lane.b32.xlu0 %v8196_v60, %s6897_s28  ;;  %3051 = vrot.lane.b32.xlu1 %v2497_v0, %s6900_s0 }
 0x7ad   :  { %3037 = vrot.lane.b32.xlu0 %v2545_v2, %s6900_s0  ;;  %2901 = vrot.lane.b32.xlu1 %v8167_v35, %s6898_s29 }
 0x7b1   :  { %3053 = vrot.lane.b32.xlu0 %v2498_v12, %s6900_s0  ;;  %2977 = vrot.lane.b32.xlu1 %v8196_v60, %s6899_s30 }
 0x7b5   :  { %2899 = vrot.lane.b32.xlu0 %v8196_v60, %s6898_s29  ;;  %3129 = vrot.lane.b32.xlu1 %v2497_v0, %s6901_s19 }
 0x7b9   :  { %3115 = vrot.lane.b32.xlu0 %v2545_v2, %s6901_s19  ;;  %2573 = vrot.lane.b32.xlu1 %v8191_v49, %s6894_s25 }
 0x7bd   :  { %2979 = vrot.lane.b32.xlu0 %v8167_v35, %s6899_s30  ;;  %3127 = vrot.lane.b32.xlu1 %v8163_v30, %s6901_s19 }
 0x7c1   :  { %2651 = vrot.lane.b32.xlu1 %v8191_v49, %s6895_s26  ;;  %2571 = vrot.lane.b32.xlu0 %v8174_v59, %s6894_s25 }
 0x7c5   :  { %3055 = vrot.lane.b32.xlu1 %v8196_v60, %s6900_s0  ;;  %3131 = vrot.lane.b32.xlu0 %v2498_v12, %s6901_s19 }
 0x7c9   :  { %2729 = vrot.lane.b32.xlu1 %v8191_v49, %s6896_s27  ;;  %2649 = vrot.lane.b32.xlu0 %v8174_v59, %s6895_s26 }
 0x7cd   :  { %2575 = vrot.lane.b32.xlu1 %v8180_v20, %s6894_s25  ;;  %2813 = vrot.lane.b32.xlu0 %v8271_v18, %s6897_s28 }
 0x7d1   :  { %2807 = vrot.lane.b32.xlu1 %v8191_v49, %s6897_s28  ;;  %2727 = vrot.lane.b32.xlu0 %v8174_v59, %s6896_s27 }
 0x7d5   :  { %2653 = vrot.lane.b32.xlu1 %v8180_v20, %s6895_s26  ;;  %2577 = vrot.lane.b32.xlu0 %v8183_v15, %s6894_s25 }
 0x7d7   :  { %v8285_v14 = vpop.permute.xlu1 %2581 }
 0x7d9   :  { %2885 = vrot.lane.b32.xlu1 %v8191_v49, %s6898_s29  ;;  %2805 = vrot.lane.b32.xlu0 %v8174_v59, %s6897_s28 }
 0x7db   :  { %v8291_v16 = vpop.permute.xlu1 %2659 }
 0x7dd   :  { %2731 = vrot.lane.b32.xlu1 %v8180_v20, %s6896_s27  ;;  %2655 = vrot.lane.b32.xlu0 %v8183_v15, %s6895_s26 }
 0x7df   :  { %v8297_v40 = vpop.permute.xlu0 %2569  ;;  %v8299_v58 = vpop.permute.xlu1 %2737 }
 0x7e1   :  { %2963 = vrot.lane.b32.xlu1 %v8191_v49, %s6899_s30  ;;  %2883 = vrot.lane.b32.xlu0 %v8174_v59, %s6898_s29 }
 0x7e3   :  { %v8305_v3 = vpop.permute.xlu0 %2585  ;;  %v8307_v61 = vpop.permute.xlu1 %2815 }
 0x7e5   :  { %2809 = vrot.lane.b32.xlu1 %v8180_v20, %s6897_s28  ;;  %2733 = vrot.lane.b32.xlu0 %v8183_v15, %s6896_s27 }
 0x7e7   :  { %v8313_v11 = vpop.permute.xlu0 %2647  ;;  %v8315_v1 = vpop.permute.xlu1 %2893 }
 0x7e9   :  { %3041 = vrot.lane.b32.xlu1 %v8191_v49, %s6900_s0  ;;  %2961 = vrot.lane.b32.xlu0 %v8174_v59, %s6899_s30 }
 0x7eb   :  { %v8321_v32 = vpop.permute.xlu0 %2663  ;;  %v8323_v4 = vpop.permute.xlu1 %2971 }
 0x7ed   :  { %2887 = vrot.lane.b32.xlu1 %v8180_v20, %s6898_s29  ;;  %2811 = vrot.lane.b32.xlu0 %v8183_v15, %s6897_s28 }
 0x7ef   :  { %v8329_v44 = vpop.permute.xlu0 %2725  ;;  %v8331_v27 = vpop.permute.xlu1 %3049 }
 0x7f1   :  { %2967 = vrot.lane.b32.xlu1 %v8183_v15, %s6899_s30  ;;  %3039 = vrot.lane.b32.xlu0 %v8174_v59, %s6900_s0 }
 0x7f3   :  { %v8337_v26 = vpop.permute.xlu0 %2741  ;;  %v8339_v36 = vpop.permute.xlu1 %2583 }
 0x7f4   :  { %v2599_v2 = vsel %vm124_vm0, %v8339_v36, %v8305_v3  ;;  %v2598_v0 = vsel %vm124_vm0, %v8285_v14, %v8339_v36 }
 0x7f5   :  { %3119 = vrot.lane.b32.xlu1 %v8191_v49, %s6901_s19  ;;  %3057 = vrot.lane.b32.xlu0 %v8167_v35, %s6900_s0 }
 0x7f7   :  { %v8352_v24 = vpop.permute.xlu0 %2587  ;;  %v8354_v48 = vpop.permute.xlu1 %2661 }
 0x7f8   :  { %v2676_v14 = vsel %vm170_vm1, %v8291_v16, %v8354_v48 }
 0x7f9   :  { %2825 = vrot.lane.b32.xlu1 %v2790_v42, %s6897_s28  ;;  %2889 = vrot.lane.b32.xlu0 %v8183_v15, %s6898_s29 }
 0x7fb   :  { %v8359_v17 = vpop.permute.xlu0 %2803  ;;  %v8361_v45 = vpop.permute.xlu1 %2739 }
 0x7fd   :  { %3045 = vrot.lane.b32.xlu1 %v8183_v15, %s6900_s0  ;;  %2965 = vrot.lane.b32.xlu0 %v8180_v20, %s6899_s30 }
 0x7ff   :  { %v8367_v41 = vpop.permute.xlu0 %2819  ;;  %v8369_v34 = vpop.permute.xlu1 %2589 }
 0x801   :  { %2579 = vrot.lane.b32.xlu1 %v8271_v18, %s6894_s25  ;;  %3117 = vrot.lane.b32.xlu0 %v8174_v59, %s6901_s19 }
 0x803   :  { %v8375_v33 = vpop.permute.xlu0 %2665  ;;  %v8377_v46 = vpop.permute.xlu1 %2817 }
 0x805   :  { %2591 = vrot.lane.b32.xlu1 %v2790_v42, %s6894_s25  ;;  %2891 = vrot.lane.b32.xlu0 %v8271_v18, %s6898_s29 }
 0x807   :  { %v8382_v57 = vpop.permute.xlu0 %2881  ;;  %v8384_v43 = vpop.permute.xlu1 %2667 }
 0x809   :  { %2657 = vrot.lane.b32.xlu1 %v8271_v18, %s6895_s26  ;;  %3043 = vrot.lane.b32.xlu0 %v8180_v20, %s6900_s0 }
 0x80b   :  { %v8390_v21 = vpop.permute.xlu0 %2897  ;;  %v8392_v6 = vpop.permute.xlu1 %2895 }
 0x80d   :  { %3123 = vrot.lane.b32.xlu1 %v8183_v15, %s6901_s19  ;;  %2903 = vrot.lane.b32.xlu0 %v2790_v42, %s6898_s29 }
 0x80f   :  { %v8397_v23 = vpop.permute.xlu0 %2743  ;;  %v8399_v19 = vpop.permute.xlu1 %2745 }
 0x811   :  { %3135 = vrot.lane.b32.xlu1 %v8167_v35, %s6901_s19  ;;  %2969 = vrot.lane.b32.xlu0 %v8271_v18, %s6899_s30 }
 0x813   :  { %v8405_v22 = vpop.permute.xlu0 %2959  ;;  %v8407_v9 = vpop.permute.xlu1 %2973 }
 0x815   :  { %2669 = vrot.lane.b32.xlu1 %v2790_v42, %s6895_s26  ;;  %3133 = vrot.lane.b32.xlu0 %v8196_v60, %s6901_s19 }
 0x817   :  { %v8412_v13 = vpop.permute.xlu0 %2975  ;;  %v8414_v53 = vpop.permute.xlu1 %2823 }
 0x819   :  { %2735 = vrot.lane.b32.xlu1 %v8271_v18, %s6896_s27  ;;  %3121 = vrot.lane.b32.xlu0 %v8180_v20, %s6901_s19 }
 0x81b   :  { %v8420_v50 = vpop.permute.xlu0 %2821  ;;  %v8422_v63 = vpop.permute.xlu1 %3051 }
 0x81d   :  { %2747 = vrot.lane.b32.xlu1 %v2790_v42, %s6896_s27  ;;  %2981 = vrot.lane.b32.xlu0 %v2790_v42, %s6899_s30 }
 0x81f   :  { %v8426_v54 = vpop.permute.xlu0 %3037  ;;  %v8428_v55 = vpop.permute.xlu1 %2901 }
 0x821   :  { %3137 = vrot.lane.b32.xlu1 %v2790_v42, %s6901_s19  ;;  %3047 = vrot.lane.b32.xlu0 %v8271_v18, %s6900_s0 }
 0x823   :  { %v8433_v29 = vpop.permute.xlu0 %3053  ;;  %v8435_v31 = vpop.permute.xlu1 %2977 }
 0x825   :  { %3059 = vrot.lane.b32.xlu0 %v2790_v42, %s6900_s0 }
 0x827   :  { %v8438_v52 = vpop.permute.xlu0 %2899  ;;  %v8440_v47 = vpop.permute.xlu1 %3129 }
 0x829   :  { %3125 = vrot.lane.b32.xlu0 %v8271_v18, %s6901_s19 }
 0x82b   :  { %v8444_v5 = vpop.permute.xlu0 %3115  ;;  %v2574_v30 = vpop.permute.xlu1 %2573 }
 0x82f   :  { %v8446_v35 = vpop.permute.xlu0 %2979  ;;  %v8448_v10 = vpop.permute.xlu1 %3127 }
 0x833   :  { %v2572_v38 = vpop.permute.xlu0 %2571  ;;  %v2652_v59 = vpop.permute.xlu1 %2651 }
 0x834   :  { %v2593_v39 = vsel %vm124_vm0, %v8297_v40, %v2572_v38  ;;  %v2594_v25 = vsel %vm124_vm0, %v2572_v38, %v2574_v30  ;;  %v2677_v40 = vsel %vm170_vm1, %v8354_v48, %v8321_v32 }
 0x835   :  { %3307 = vmatprep.subr.bf16.mxu1 %v2594_v25 }
 0x836   :  { %3308 = vmatpush1.bf16.msra.mxu1 %v2593_v39 }
 0x837   :  { %v8456_v20 = vpop.permute.xlu0 %3131  ;;  %v8458_v15 = vpop.permute.xlu1 %3055  ;;  %3309 = vmatprep.subr.bf16.mxu1 %v2599_v2  ;;  %v2755_v2 = vsel %vm216_vm2, %v8361_v45, %v8337_v26 }
 0x83a   :  { %3310 = vmatpush1.bf16.msra.mxu1 %v2598_v0 }
 0x83b   :  { %v2650_v49 = vpop.permute.xlu0 %2649  ;;  %v8463_v60 = vpop.permute.xlu1 %2729 }
 0x83c   :  { %v2671_v12 = vsel %vm170_vm1, %v8313_v11, %v2650_v49  ;;  %v2672_v18 = vsel %vm170_vm1, %v2650_v49, %v2652_v59 }
 0x83d   :  { %3311 = vmatprep.subr.bf16.mxu1 %v2672_v18 }
 0x83e   :  { %3312 = vmatpush1.bf16.msra.mxu1 %v2671_v12  ;;  %v2601_v12 = vsel %vm124_vm0, %v8352_v24, %v8369_v34 }
 0x83f   :  { %v8471_v42 = vpop.permute.xlu0 %2813  ;;  %v2576_v38 = vpop.permute.xlu1 %2575  ;;  %3313 = vmatprep.subr.bf16.mxu1 %v2677_v40 }
 0x840   :  { %v2595_v48 = vsel %vm124_vm0, %v2574_v30, %v2576_v38 }
 0x842   :  { %3314 = vmatpush1.bf16.msra.mxu1 %v2676_v14 }
 0x843   :  { %v2728_v36 = vpop.permute.xlu0 %2727  ;;  %v8476_v39 = vpop.permute.xlu1 %2807 }
 0x844   :  { %v2749_v11 = vsel %vm216_vm2, %v8329_v44, %v2728_v36  ;;  %v2750_v25 = vsel %vm216_vm2, %v2728_v36, %v8463_v60  ;;  %v2754_v44 = vsel %vm216_vm2, %v8299_v58, %v8361_v45  ;;  %v2600_v58 = vsel %vm124_vm0, %v8305_v3, %v8352_v24 }
 0x845   :  { %3315 = vmatprep.subr.bf16.mxu1 %v2750_v25  ;;  %v2833_v45 = vsel %vm262_vm3, %v8377_v46, %v8367_v41  ;;  %v2679_v24 = vsel %vm170_vm1, %v8375_v33, %v8384_v43 }
 0x846   :  { %3316 = vmatpush1.bf16.msra.mxu1 %v2749_v11  ;;  %v2832_v11 = vsel %vm262_vm3, %v8307_v61, %v8377_v46  ;;  %v2678_v61 = vsel %vm170_vm1, %v8321_v32, %v8375_v33  ;;  %v2911_v46 = vsel %vm308_vm4, %v8392_v6, %v8390_v21  ;;  %v2757_v33 = vsel %vm216_vm2, %v8397_v23, %v8399_v19 }
 0x847   :  { %v8485_v0 = vpop.permute.xlu0 %2577  ;;  %v2654_v49 = vpop.permute.xlu1 %2653  ;;  %3317 = vmatprep.subr.bf16.mxu1 %v2755_v2 }
 0x848   :  { %v2596_v16 = vsel %vm124_vm0, %v2576_v38, %v8485_v0  ;;  %v2673_v3 = vsel %vm170_vm1, %v2652_v59, %v2654_v49 }
 0x849   :  { %3413 = vmatprep.subr.bf16.mxu0 %v2596_v16 }
 0x84a   :  { %3318 = vmatpush1.bf16.msra.mxu1 %v2754_v44  ;;  %3414 = vmatpush1.bf16.msra.mxu0 %v2595_v48  ;;  %v2910_v48 = vsel %vm308_vm4, %v8315_v1, %v8392_v6  ;;  %v2756_v6 = vsel %vm216_vm2, %v8337_v26, %v8397_v23  ;;  %v2835_v23 = vsel %vm262_vm3, %v8420_v50, %v8414_v53 }
 0x84b   :  { %v2806_v18 = vpop.permute.xlu0 %2805  ;;  %v8496_v40 = vpop.permute.xlu1 %2885  ;;  %3415 = vmatprep.subr.bf16.mxu0 %v2601_v12 }
 0x84c   :  { %v2827_v14 = vsel %vm262_vm3, %v8359_v17, %v2806_v18  ;;  %v2828_v36 = vsel %vm262_vm3, %v2806_v18, %v8476_v39 }
 0x84d   :  { %3319 = vmatprep.subr.bf16.mxu1 %v2828_v36 }
 0x84e   :  { %3320 = vmatpush1.bf16.msra.mxu1 %v2827_v14  ;;  %3416 = vmatpush1.bf16.msra.mxu0 %v2600_v58 }
 0x84f   :  { %v8508_v30 = vpop.permute.xlu0 %2655  ;;  %v2732_v38 = vpop.permute.xlu1 %2731  ;;  %3321 = vmatprep.subr.bf16.mxu1 %v2833_v45  ;;  %v2988_v45 = vsel %vm354_vm5, %v8323_v4, %v8407_v9 }
 0x850   :  { %v2674_v17 = vsel %vm170_vm1, %v2654_v49, %v8508_v30  ;;  %v2751_v32 = vsel %vm216_vm2, %v8463_v60, %v2732_v38  ;;  %v2989_v60 = vsel %vm354_vm5, %v8407_v9, %v8412_v13  ;;  %v2834_v9 = vsel %vm262_vm3, %v8367_v41, %v8420_v50  ;;  %v8589_v41 = vld [vmem:[%s10187_s4] ss:$12 sps:$4 sm:$0xff]   ;;  %v8594_v50 = vld [vmem:[%s10187_s4 + $0x1c] ss:$12 sps:$4 sm:$0xff]  }
 0x851   :  { %3417 = vmatprep.subr.bf16.mxu0 %v2674_v17 }
 0x852   :  { %3322 = vmatpush1.bf16.msra.mxu1 %v2832_v11  ;;  %3418 = vmatpush1.bf16.msra.mxu0 %v2673_v3 }
 0x853   :  { %v2884_v25 = vpop.permute.xlu0 %2883  ;;  %v8519_v2 = vpop.permute.xlu1 %2963  ;;  %3419 = vmatprep.subr.bf16.mxu0 %v2679_v24 }
 0x854   :  { %v2905_v16 = vsel %vm308_vm4, %v8382_v57, %v2884_v25  ;;  %v2906_v44 = vsel %vm308_vm4, %v2884_v25, %v8496_v40 }
 0x855   :  { %3323 = vmatprep.subr.bf16.mxu1 %v2906_v44 }
 0x856   :  { %3324 = vmatpush1.bf16.msra.mxu1 %v2905_v16  ;;  %3420 = vmatpush1.bf16.msra.mxu0 %v2678_v61 }
 0x857   :  { %v8531_v59 = vpop.permute.xlu0 %2733  ;;  %v2810_v49 = vpop.permute.xlu1 %2809  ;;  %3325 = vmatprep.subr.bf16.mxu1 %v2911_v46 }
 0x858   :  { %v2752_v57 = vsel %vm216_vm2, %v2732_v38, %v8531_v59  ;;  %v2829_v26 = vsel %vm262_vm3, %v8476_v39, %v2810_v49  ;;  %v3067_v39 = vsel %vm10231_vm6, %v8422_v63, %v8433_v29 }
 0x859   :  { %3421 = vmatprep.subr.bf16.mxu0 %v2752_v57 }
 0x85a   :  { %3326 = vmatpush1.bf16.msra.mxu1 %v2910_v48  ;;  %3422 = vmatpush1.bf16.msra.mxu0 %v2751_v32 }
 0x85b   :  { %v2962_v12 = vpop.permute.xlu0 %2961  ;;  %v8543_v18 = vpop.permute.xlu1 %3041  ;;  %3423 = vmatprep.subr.bf16.mxu0 %v2757_v33 }
 0x85c   :  { %v2983_v14 = vsel %vm354_vm5, %v8405_v22, %v2962_v12  ;;  %v2984_v1 = vsel %vm354_vm5, %v2962_v12, %v8519_v2 }
 0x85d   :  { %3327 = vmatprep.subr.bf16.mxu1 %v2984_v1 }
 0x85e   :  { %3328 = vmatpush1.bf16.msra.mxu1 %v2983_v14  ;;  %3424 = vmatpush1.bf16.msra.mxu0 %v2756_v6  ;;  %v3145_v14 = vsel %vm10235_vm10, %v8440_v47, %v8456_v20  ;;  %v3144_v6 = vsel %vm10236_vm8, %v8448_v10, %v8440_v47  ;;  %v2529_v47 = vld [vmem:[#allocation2 + $0x20] sm:$0xff]  ;;  %vm10243_vm10 = vmmov %vm10236_vm8 }
 0x85f   :  { %v8555_v36 = vpop.permute.xlu0 %2811  ;;  %v2888_v58 = vpop.permute.xlu1 %2887  ;;  %3329 = vmatprep.subr.bf16.mxu1 %v2989_v60  ;;  %v8639_v60 = vld [vmem:[%s10187_s4 + $0x8] ss:$12 sps:$4 sm:$0xff]  }
 0x860   :  { %v2830_v22 = vsel %vm262_vm3, %v2810_v49, %v8555_v36  ;;  %v2907_v61 = vsel %vm308_vm4, %v8496_v40, %v2888_v58  ;;  %v2912_v49 = vsel %vm308_vm4, %v8390_v21, %v8438_v52  ;;  %v8612_v40 = vld [vmem:[%s10187_s4 + $0x18] ss:$12 sps:$4 sm:$0xff]  }
 0x861   :  { %3425 = vmatprep.subr.bf16.mxu0 %v2830_v22 }
 0x862   :  { %3330 = vmatpush1.bf16.msra.mxu1 %v2988_v45  ;;  %3426 = vmatpush1.bf16.msra.mxu0 %v2829_v26 }
 0x863   :  { %v3040_v38 = vpop.permute.xlu0 %3039  ;;  %v8567_v17 = vpop.permute.xlu1 %2967  ;;  %3427 = vmatprep.subr.bf16.mxu0 %v2835_v23  ;;  %v2534_v23 = vld [vmem:[#allocation2 + $0x50] sm:$0xff] }
 0x864   :  { %v3061_v11 = vsel %vm10229_vm7, %v8426_v54, %v3040_v38  ;;  %v3062_v4 = vsel %vm10230_vm14, %v3040_v38, %v8543_v18  ;;  %v3066_v54 = vsel %vm10232_vm9, %v8331_v27, %v8422_v63  ;;  %v2913_v27 = vsel %vm308_vm4, %v8438_v52, %v8428_v55  ;;  %vm10237_vm7 = vmmov %vm10231_vm6  ;;  %v8662_v38 = vld [vmem:[%s10187_s4 + $0x20] ss:$12 sps:$4 sm:$0xff]  }
 0x865   :  { %3331 = vmatprep.subr.bf16.mxu1 %v3062_v4  ;;  %v2991_v52 = vsel %vm354_vm5, %v8435_v31, %v8446_v35  ;;  %vm10238_vm14 = vmmov %vm10231_vm6  ;;  %vm10239_vm6 = vcmask 261120  }
 0x866   :  { %3332 = vmatpush1.bf16.msra.mxu1 %v3061_v11  ;;  %3428 = vmatpush1.bf16.msra.mxu0 %v2834_v9  ;;  %vm10240_vm9 = vmmov %vm10237_vm7 }
 0x867   :  { %v8579_v3 = vpop.permute.xlu0 %3057  ;;  %v8581_v24 = vpop.permute.xlu1 %3119  ;;  %3333 = vmatprep.subr.bf16.mxu1 %v3067_v39 }
 0x868   :  { %v3069_v10 = vsel %vm10240_vm9, %v8458_v15, %v8579_v3 }
 0x86a   :  { %3334 = vmatpush1.bf16.msra.mxu1 %v3066_v54 }
 0x86b   :  { %v2890_v25 = vpop.permute.xlu0 %2889  ;;  %v2826_v16 = vpop.permute.xlu1 %2825 }
 0x86c   :  { %v2908_v44 = vsel %vm308_vm4, %v2888_v58, %v2890_v25  ;;  %v2831_v58 = vsel %vm262_vm3, %v8555_v36, %v8471_v42  ;;  %v2836_v42 = vsel %vm262_vm3, %v8414_v53, %v2826_v16 }
 0x86d   :  { %3336 = vmatmul.mubr.bf16.vlgmr.msra.gmra.mrb[24].mxu1 %v8589_v41  ;;  %3429 = vmatprep.subr.bf16.mxu0 %v2908_v44 }
 0x86e   :  { %3430 = vmatpush1.bf16.msra.mxu0 %v2907_v61  ;;  %3345 = vmatprep.mubr.bf16.mxu1 %v8594_v50 }
 0x86f   :  { %v2966_v63 = vpop.permute.xlu0 %2965  ;;  %v8604_v46 = vpop.permute.xlu1 %3045  ;;  %3431 = vmatprep.subr.bf16.mxu0 %v2913_v27 }
 0x870   :  { %v2986_v57 = vsel %vm354_vm5, %v2966_v63, %v8567_v17  ;;  %v2985_v21 = vsel %vm354_vm5, %v8519_v2, %v2966_v63  ;;  %v2990_v2 = vsel %vm354_vm5, %v8412_v13, %v8435_v31 }
 0x872   :  { %3432 = vmatpush1.bf16.msra.mxu0 %v2912_v49 }
 0x873   :  { %v3118_v48 = vpop.permute.xlu0 %3117  ;;  %v2580_v32 = vpop.permute.xlu1 %2579  ;;  %3433 = vmatprep.subr.bf16.mxu0 %v2986_v57 }
 0x874   :  { %v3139_v33 = vsel %vm10233_vm11, %v8444_v5, %v3118_v48  ;;  %v3140_v12 = vsel %vm10234_vm15, %v3118_v48, %v8581_v24  ;;  %vm10241_vm11 = vmmov %vm10237_vm7  ;;  %v2597_v9 = vsel %vm124_vm0, %v8485_v0, %v2580_v32 }
 0x875   :  { %3346 = vmatmul.mubr.bf16.gmra.mrb[28].mxu1 %v8612_v40  ;;  %3356 = vmatprep.subr.bf16.mxu1 %v3140_v12  ;;  %vm10242_vm15 = vmmov %vm10239_vm6 }
 0x876   :  { %3357 = vmatpush1.bf16.msra.mxu1 %v3139_v33  ;;  %3434 = vmatpush1.bf16.msra.mxu0 %v2985_v21 }
 0x877   :  { %v2892_v5 = vpop.permute.xlu0 %2891  ;;  %v2592_v1 = vpop.permute.xlu1 %2591  ;;  %3358 = vmatprep.subr.bf16.mxu1 %v3145_v14  ;;  %3435 = vmatprep.subr.bf16.mxu0 %v2991_v52 }
 0x878   :  { %3388 = vmatprep.mubr.bf16.mxu1 %v10216_v28  ;;  %v2909_v53 = vsel %vm308_vm4, %v2890_v25, %v2892_v5  ;;  %v2602_v39 = vsel %vm124_vm0, %v8369_v34, %v2592_v1 }
 0x87a   :  { %3359 = vmatpush1.bf16.msra.mxu1 %v3144_v6  ;;  %3436 = vmatpush1.bf16.msra.mxu0 %v2990_v2 }
 0x87b   :  { %v3044_v22 = vpop.permute.xlu0 %3043  ;;  %v2658_v45 = vpop.permute.xlu1 %2657  ;;  %6591 = vmatprep.subr.bf16.mxu1 %v2831_v58 }
 0x87c   :  { %v3063_v13 = vsel %vm10237_vm7, %v8543_v18, %v3044_v22  ;;  %v3064_v31 = vsel %vm10238_vm14, %v3044_v22, %v8604_v46  ;;  %v3068_v18 = vsel %vm10241_vm11, %v8433_v29, %v8458_v15  ;;  %v2675_v44 = vsel %vm170_vm1, %v8508_v30, %v2658_v45  ;;  %vm10244_vm7 = vmmov %vm10236_vm8 }
 0x87d   :  { %6528 = vmatmul.mubr.msk.bf16.vlgmr.msra.gmra.mrb[24].mxu1 %vm10239_vm6, %v8639_v60  ;;  %3437 = vmatprep.subr.bf16.mxu0 %v3064_v31  ;;  %vm10245_vm14 = vmmov %vm10244_vm7 }
 0x87e   :  { %3438 = vmatpush1.bf16.msra.mxu0 %v3063_v13  ;;  %6592 = vmatpush3.bf16.msra.mxu1 %v2529_v47  ;;  %vm10246_vm6 = vmmov %vm10240_vm9 }
 0x87f   :  { %v2904_v36 = vpop.permute.xlu0 %2903  ;;  %v3124_v26 = vpop.permute.xlu1 %3123  ;;  %3439 = vmatprep.subr.bf16.mxu0 %v3069_v10  ;;  %6593 = vmatprep.subr.bf16.mxu1 %v2836_v42  ;;  %vm10247_vm9 = vmmov %vm10242_vm15 }
 0x880   :  { %3398 = vmatprep.mubr.bf16.mxu1 %v10216_v28  ;;  %v2914_v29 = vsel %vm308_vm4, %v8428_v55, %v2904_v36  ;;  %vm10248_vm11 = vmmov %vm10246_vm6 }
 0x882   :  { %3440 = vmatpush1.bf16.msra.mxu0 %v3068_v18  ;;  %6594 = vmatpush3.bf16.msra.mxu1 %v2534_v23 }
 0x883   :  { %v2970_v11 = vpop.permute.xlu0 %2969  ;;  %6595 = vmatprep.subr.bf16.mxu1 %v2909_v53  ;;  %v3136_v4 = vpop.permute.xlu1 %3135 }
 0x884   :  { %v2987_v0 = vsel %vm354_vm5, %v8567_v17, %v2970_v11 }
 0x885   :  { %6529 = vmatmul.mubr.msk.bf16.gmra.mrb[28].mxu1 %vm10242_vm15, %v8662_v38  ;;  %3442 = vmatmul.mubr.bf16.vlgmr.msra.gmra.mrb[32].mxu0 %v8589_v41  ;;  %vm10249_vm15 = vmmov %vm10244_vm7 }
 0x886   :  { %6596 = vmatpush3.bf16.msra.mxu1 %v2597_v9  ;;  %3451 = vmatprep.mubr.bf16.mxu0 %v8594_v50 }
 0x887   :  { %v3134_v15 = vpop.permute.xlu0 %3133  ;;  %6597 = vmatprep.subr.bf16.mxu1 %v2914_v29  ;;  %3547 = vmatprep.mubr.bf16.mxu1 %v8344_v56  ;;  %v2670_v54 = vpop.permute.xlu1 %2669 }
 0x888   :  { %v3147_v56 = vsel %vm10244_vm7, %v3134_v15, %v3136_v4  ;;  %v3146_v61 = vsel %vm10245_vm14, %v8456_v20, %v3134_v15  ;;  %v2680_v30 = vsel %vm170_vm1, %v8384_v43, %v2670_v54 }
 0x88a   :  { %6598 = vmatpush3.bf16.msra.mxu1 %v2602_v39 }
 0x88b   :  { %v3122_v25 = vpop.permute.xlu0 %3121  ;;  %6599 = vmatprep.subr.bf16.mxu1 %v2987_v0  ;;  %v2736_v17 = vpop.permute.xlu1 %2735 }
 0x88c   :  { %v3141_v55 = vsel %vm10243_vm10, %v8581_v24, %v3122_v25  ;;  %v3142_v16 = vsel %vm10236_vm8, %v3122_v25, %v3124_v26  ;;  %v2753_v49 = vsel %vm216_vm2, %v8531_v59, %v2736_v17  ;;  %vm10250_vm10 = vmmov %vm10247_vm9 }
 0x88d   :  { %3452 = vmatmul.mubr.bf16.gmra.mrb[36].mxu0 %v8612_v40  ;;  %3462 = vmatprep.subr.bf16.mxu0 %v3142_v16  ;;  %vm10251_vm8 = vmmov %vm10244_vm7 }
 0x88e   :  { %3463 = vmatpush1.bf16.msra.mxu0 %v3141_v55  ;;  %6600 = vmatpush3.bf16.msra.mxu1 %v2675_v44  ;;  %vm10252_vm7 = vmmov %vm10247_vm9 }
 0x88f   :  { %v2982_v34 = vpop.permute.xlu0 %2981  ;;  %3464 = vmatprep.subr.bf16.mxu0 %v3147_v56  ;;  %3494 = vmatprep.mubr.bf16.mxu0 %v10216_v28  ;;  %vm10253_vm14 = vmmov %vm10252_vm7 }
 0x890   :  { %v2992_v24 = vsel %vm354_vm5, %v8446_v35, %v2982_v34  ;;  %v2748_v35 = vpop.permute.xlu1 %2747 }
 0x891   :  { %6601 = vmatprep.subr.bf16.mxu1 %v2992_v24  ;;  %v2758_v57 = vsel %vm216_vm2, %v8399_v19, %v2748_v35 }
 0x892   :  { %3465 = vmatpush1.bf16.msra.mxu0 %v3146_v61  ;;  %6602 = vmatpush3.bf16.msra.mxu1 %v2680_v30 }
 0x893   :  { %v3048_v27 = vpop.permute.xlu0 %3047 }
 0x894   :  { %v3065_v63 = vsel %vm10246_vm6, %v8604_v46, %v3048_v27  ;;  %v3138_v48 = vpop.permute.xlu1 %3137 }
 0x895   :  { %6530 = vmatmul.mubr.msk.bf16.vlgmr.msra.gmra.mrb[32].mxu0 %vm10247_vm9, %v8639_v60  ;;  %6603 = vmatprep.subr.bf16.mxu1 %v3065_v63  ;;  %v3148_v32 = vsel %vm10251_vm8, %v3136_v4, %v3138_v48 }
 0x896   :  { %6604 = vmatpush3.bf16.msra.mxu1 %v2753_v49  ;;  %3504 = vmatprep.mubr.bf16.mxu0 %v10216_v28 }
 0x897   :  { %v3060_v20 = vpop.permute.xlu0 %3059 }
 0x898   :  { %v3070_v43 = vsel %vm10248_vm11, %v8579_v3, %v3060_v20 }
 0x899   :  { %6605 = vmatprep.subr.bf16.mxu1 %v3070_v43 }
 0x89a   :  { %6606 = vmatpush3.bf16.msra.mxu1 %v2758_v57 }
 0x89b   :  { %v3126_v46 = vpop.permute.xlu0 %3125 }
 0x89c   :  { %v3143_v59 = vsel %vm10249_vm15, %v3124_v26, %v3126_v46 }
 0x89d   :  { %6531 = vmatmul.mubr.msk.bf16.gmra.mrb[36].mxu0 %vm10250_vm10, %v8662_v38  ;;  %3548 = vmatmul.mubr.bf16.vlgmr.msra.gmra.mrb[32].mxu1 %v8589_v41 }
 0x89e   :  { %6702 = vmatprep.subr.bf16.mxu0 %v3143_v59  ;;  %3555 = vmatprep.mubr.bf16.mxu1 %v8594_v50 }
 0x89f   :  { %6703 = vmatpush3.bf16.msra.mxu0 %v3143_v59  ;;  %6706 = vmatprep.mubr.msk.bf16.mxu0 %vm10252_vm7, %v8639_v60 }
 0x8a0   :  { %6704 = vmatprep.subr.bf16.mxu0 %v3148_v32 }
 0x8a3   :  { %6705 = vmatpush3.bf16.msra.mxu0 %v3148_v32 }
 0x8a5   :  { %3556 = vmatmul.mubr.bf16.gmra.mrb[36].mxu1 %v8612_v40 }
 0x8a6   :  { %6707 = vmatmul.mubr.msk.bf16.vlgmr.msra.gmra.mrb[40].mxu0 %vm10253_vm14, %v8662_v38 }
 0x950   :  { %v8714_v19 = vpop.f32.mrb[24].mxu1 }
 0x951   :  { %v3613_v3 = vmul.f32 %v8714_v19, %v7173_v7  ;;  %v8718_v41 = vpop.f32.mrb[25].mxu1 }
 0x952   :  { %v3614_v50 = vmul.f32 %v8718_v41, %v7175_v8  ;;  %v8722_v33 = vpop.f32.mrb[26].mxu1 }
 0x953   :  { %v3657_v12 = vmul.f32 %v3613_v3, %v3613_v3  ;;  %v3618_v21 = vmul.f32 %v8722_v33, %v7173_v7  ;;  %v8726_v40 = vpop.f32.mrb[27].mxu1 }
 0x954   :  { %v3633_v52 = vadd.f32 %v3614_v50, %v3613_v3  ;;  %v3658_v14 = vmul.f32 %v3614_v50, %v3614_v50  ;;  %v3619_v5 = vmul.f32 %v8726_v40, %v7175_v8 }
 0x955   :  { %v3662_v1 = vmul.f32 %v3618_v21, %v3618_v21 }
 0x956   :  { %v3677_v2 = vadd.f32 %v3658_v14, %v3657_v12  ;;  %v3639_v6 = vadd.f32 %v3619_v5, %v3618_v21  ;;  %v3663_v60 = vmul.f32 %v3619_v5, %v3619_v5 }
 0x958   :  { %v3683_v58 = vadd.f32 %v3663_v60, %v3662_v1  ;;  %v8730_v22 = vpop.f32.mrb[28].mxu1 }
 0x959   :  { %v3623_v45 = vmul.f32 %v8730_v22, %v7173_v7  ;;  %v8734_v13 = vpop.f32.mrb[29].mxu1 }
 0x95a   :  { %v3624_v31 = vmul.f32 %v8734_v13, %v7175_v8  ;;  %v8738_v47 = vpop.f32.mrb[30].mxu1 }
 0x95b   :  { %v3667_v10 = vmul.f32 %v3623_v45, %v3623_v45  ;;  %v3628_v42 = vmul.f32 %v8738_v47, %v7173_v7  ;;  %v8742_v36 = vpop.f32.mrb[31].mxu1 }
 0x95c   :  { %v3645_v26 = vadd.f32 %v3624_v31, %v3623_v45  ;;  %v3668_v18 = vmul.f32 %v3624_v31, %v3624_v31  ;;  %v3629_v23 = vmul.f32 %v8742_v36, %v7175_v8 }
 0x95d   :  { %v3672_v38 = vmul.f32 %v3628_v42, %v3628_v42 }
 0x95e   :  { %v3689_v53 = vadd.f32 %v3668_v18, %v3667_v10  ;;  %v3651_v11 = vadd.f32 %v3629_v23, %v3628_v42  ;;  %v3673_v4 = vmul.f32 %v3629_v23, %v3629_v23 }
 0x960   :  { %v3695_v9 = vadd.f32 %v3673_v4, %v3672_v38 }
 0x968   :  { %v8746_v29 = vpop.f32.mrb[32].mxu0 }
 0x969   :  { %v3615_v15 = vmul.f32 %v8746_v29, %v10226_v51  ;;  %v8750_v39 = vpop.f32.mrb[33].mxu0 }
 0x96a   :  { %v3616_v0 = vmul.f32 %v8750_v39, %v10227_v37  ;;  %v8754_v54 = vpop.f32.mrb[34].mxu0 }
 0x96b   :  { %v3634_v25 = vadd.f32 %v3633_v52, %v3615_v15  ;;  %v3659_v55 = vmul.f32 %v3615_v15, %v3615_v15  ;;  %v3620_v16 = vmul.f32 %v8754_v54, %v10226_v51  ;;  %v8758_v44 = vpop.f32.mrb[35].mxu0 }
 0x96c   :  { %v3660_v56 = vmul.f32 %v3616_v0, %v3616_v0  ;;  %v3621_v34 = vmul.f32 %v8758_v44, %v10227_v37 }
 0x96d   :  { %v3678_v17 = vadd.f32 %v3677_v2, %v3659_v55  ;;  %v3635_v24 = vadd.f32 %v3634_v25, %v3616_v0  ;;  %v3640_v61 = vadd.f32 %v3639_v6, %v3620_v16  ;;  %v3664_v30 = vmul.f32 %v3620_v16, %v3620_v16 }
 0x96e   :  { %v3665_v27 = vmul.f32 %v3621_v34, %v3621_v34 }
 0x96f   :  { %v3679_v63 = vadd.f32 %v3678_v17, %v3660_v56  ;;  %v3684_v49 = vadd.f32 %v3683_v58, %v3664_v30  ;;  %v3641_v35 = vadd.f32 %v3640_v61, %v3621_v34 }
 0x970   :  { %v8762_v20 = vpop.f32.mrb[36].mxu0  ;;  %v6607_v43 = vpop.f32.mrb[32].mxu1 }
 0x971   :  { %v3685_v57 = vadd.f32 %v3684_v49, %v3665_v27  ;;  %v3625_v46 = vmul.f32 %v8762_v20, %v10226_v51  ;;  %v8766_v48 = vpop.f32.mrb[37].mxu0  ;;  %v6608_v59 = vpop.f32.mrb[33].mxu1 }
 0x972   :  { %v3626_v32 = vmul.f32 %v8766_v48, %v10227_v37  ;;  %v8770_v3 = vpop.f32.mrb[38].mxu0  ;;  %v6609_v50 = vadd.f32 %v6608_v59, %v6607_v43  ;;  %v6610_v12 = vpop.f32.mrb[34].mxu1 }
 0x973   :  { %v3646_v21 = vadd.f32 %v3645_v26, %v3625_v46  ;;  %v3669_v52 = vmul.f32 %v3625_v46, %v3625_v46  ;;  %v3630_v14 = vmul.f32 %v8770_v3, %v10226_v51  ;;  %v8774_v5 = vpop.f32.mrb[39].mxu0  ;;  %v6611_v1 = vpop.f32.mrb[35].mxu1 }
 0x974   :  { %v3670_v2 = vmul.f32 %v3626_v32, %v3626_v32  ;;  %v3631_v6 = vmul.f32 %v8774_v5, %v10227_v37  ;;  %v6612_v60 = vadd.f32 %v6611_v1, %v6610_v12 }
 0x975   :  { %v3690_v58 = vadd.f32 %v3689_v53, %v3669_v52  ;;  %v3647_v45 = vadd.f32 %v3646_v21, %v3626_v32  ;;  %v3652_v31 = vadd.f32 %v3651_v11, %v3630_v14  ;;  %v3674_v10 = vmul.f32 %v3630_v14, %v3630_v14 }
 0x976   :  { %v3675_v42 = vmul.f32 %v3631_v6, %v3631_v6 }
 0x977   :  { %v3691_v18 = vadd.f32 %v3690_v58, %v3670_v2  ;;  %v3696_v23 = vadd.f32 %v3695_v9, %v3674_v10  ;;  %v3653_v26 = vadd.f32 %v3652_v31, %v3631_v6 }
 0x978   :  { %v6613_v38 = vpop.f32.mrb[36].mxu1 }
 0x979   :  { %v3697_v4 = vadd.f32 %v3696_v23, %v3675_v42  ;;  %v6708_v15 = vpop.f32.mrb[40].mxu0  ;;  %v6614_v0 = vpop.f32.mrb[37].mxu1 }
 0x97a   :  { %v6615_v25 = vadd.f32 %v6614_v0, %v6613_v38  ;;  %v3598_v55 = vpop.f32.mrb[41].mxu0  ;;  %v6616_v16 = vpop.f32.mrb[38].mxu1 }
 0x97b   :  { %v8778_v56 = vadd.f32 %v6609_v50, %v3598_v55  ;;  %v6709_v34 = vpop.f32.mrb[42].mxu0  ;;  %v6617_v17 = vpop.f32.mrb[39].mxu1 }
 0x97c   :  { %v8780_v61 = vadd.f32 %v6708_v15, %v6615_v25  ;;  %v6618_v53 = vadd.f32 %v6617_v17, %v6616_v16  ;;  %v3601_v11 = vpop.f32.mrb[43].mxu0 }
 0x97d   :  { %v3617_v30 = vmul.f32 %v8778_v56, %v10228_v62  ;;  %v8784_v9 = vadd.f32 %v6612_v60, %v3601_v11 }
 0x97e   :  { %v8786_v27 = vadd.f32 %v6709_v34, %v6618_v53  ;;  %v3627_v59 = vmul.f32 %v8780_v61, %v10228_v62 }
 0x97f   :  { %v3661_v49 = vmul.f32 %v3617_v30, %v3617_v30  ;;  %v3622_v43 = vmul.f32 %v8784_v9, %v10228_v62  ;;  %v3636_v46 = vadd.f32 %v3635_v24, %v3617_v30 }
 0x980   :  { %v3648_v21 = vadd.f32 %v3647_v45, %v3627_v59  ;;  %v3671_v52 = vmul.f32 %v3627_v59, %v3627_v59  ;;  %v3632_v14 = vmul.f32 %v8786_v27, %v10228_v62 }
 0x981   :  { %3637 = vadd.xlane.f32.xlu0 %v3636_v46  ;;  %v3642_v32 = vadd.f32 %v3641_v35, %v3622_v43  ;;  %v3666_v50 = vmul.f32 %v3622_v43, %v3622_v43  ;;  %v3680_v12 = vadd.f32 %v3679_v63, %v3661_v49 }
 0x982   :  { %v3692_v2 = vadd.f32 %v3691_v18, %v3671_v52  ;;  %v3654_v24 = vadd.f32 %v3653_v26, %v3632_v14  ;;  %v3676_v6 = vmul.f32 %v3632_v14, %v3632_v14  ;;  %v3733_v52 = vld [vmem:[%s10197_s14] sm:$0xff]  ;;  %v3718_v14 = vld [vmem:[%s10193_s10 + $0x8] sm:$0xff] }
 0x983   :  { %3643 = vadd.xlane.f32.xlu1 %v3642_v32  ;;  %v3686_v1 = vadd.f32 %v3685_v57, %v3666_v50  ;;  %v3717_v32 = vld [vmem:[%s10193_s10] sm:$0xff] }
 0x984   :  { %v3698_v60 = vadd.f32 %v3697_v4, %v3676_v6 }
 0x985   :  { %3681 = vadd.xlane.f32.xlu0 %v3680_v12 }
 0x987   :  { %3649 = vadd.xlane.f32.xlu1 %v3648_v21 }
 0x989   :  { %3687 = vadd.xlane.f32.xlu0 %v3686_v1 }
 0x98b   :  { %3693 = vadd.xlane.f32.xlu1 %v3692_v2 }
 0x98d   :  { %3655 = vadd.xlane.f32.xlu0 %v3654_v24  ;;  %v3719_v24 = vld [vmem:[%s10193_s10 + $0x10] sm:$0xff] }
 0x991   :  { %3699 = vadd.xlane.f32.xlu0 %v3698_v60 }
 0xa0e   :  { %v3638_v35 = vpop.xlane.xlu0 %3637 }
 0xa0f   :  { %v3701_v58 = vmul.f32 0.001953125, %v3638_v35 }
 0xa10   :  { %v3644_v31 = vpop.xlane.xlu1 %3643 }
 0xa11   :  { %v3709_v10 = vmul.f32 %v3701_v58, %v3701_v58  ;;  %v3702_v45 = vmul.f32 0.001953125, %v3644_v31  ;;  %v3734_v31 = vld [vmem:[%s10197_s14 + $0x8] sm:$0xff] }
 0xa12   :  { %v3682_v63 = vpop.xlane.xlu0 %3681 }
 0xa13   :  { %v3705_v42 = vmul.f32 0.001953125, %v3682_v63  ;;  %v3710_v57 = vmul.f32 %v3702_v45, %v3702_v45 }
 0xa14   :  { %v3650_v23 = vpop.xlane.xlu1 %3649 }
 0xa15   :  { %v3713_v38 = vsub.f32 %v3705_v42, %v3709_v10  ;;  %v3703_v15 = vmul.f32 0.001953125, %v3650_v23 }
 0xa16   :  { %v3688_v0 = vpop.xlane.xlu0 %3687 }
 0xa17   :  { %v3721_v25 = vadd.f32 1e-05, %v3713_v38  ;;  %v3706_v18 = vmul.f32 0.001953125, %v3688_v0  ;;  %v3711_v26 = vmul.f32 %v3703_v15, %v3703_v15  ;;  %v3720_v38 = vld [vmem:[%s10193_s10 + $0x18] sm:$0xff] }
 0xa18   :  { %v3694_v55 = vpop.xlane.xlu1 %3693 }
 0xa19   :  { %6854 = vrsqrt.f32 %v3721_v25  ;;  %v3714_v16 = vsub.f32 %v3706_v18, %v3710_v57  ;;  %v3707_v4 = vmul.f32 0.001953125, %v3694_v55  ;;  %v3736_v18 = vld [vmem:[%s10197_s14 + $0x18] sm:$0xff] }
 0xa1a   :  { %v3656_v34 = vpop.xlane.xlu0 %3655 }
 0xa1b   :  { %v3722_v17 = vadd.f32 1e-05, %v3714_v16  ;;  %v3715_v53 = vsub.f32 %v3707_v4, %v3711_v26  ;;  %v3704_v11 = vmul.f32 0.001953125, %v3656_v34 }
 0xa1d   :  { %6856 = vrsqrt.f32 %v3722_v17  ;;  %v3723_v30 = vadd.f32 1e-05, %v3715_v53  ;;  %v3712_v43 = vmul.f32 %v3704_v11, %v3704_v11 }
 0xa1e   :  { %v3700_v49 = vpop.xlane.xlu0 %3699 }
 0xa1f   :  { %6858 = vrsqrt.f32 %v3723_v30  ;;  %v3708_v46 = vmul.f32 0.001953125, %v3700_v49 }
 0xa21   :  { %v3716_v59 = vsub.f32 %v3708_v46, %v3712_v43 }
 0xa23   :  { %v6855_v50 = vpop.eup %6854  ;;  %v3724_v12 = vadd.f32 1e-05, %v3716_v59 }
 0xa24   :  { %v3729_v21 = vmul.f32 %v6855_v50, %v3717_v32 }
 0xa25   :  { %6860 = vrsqrt.f32 %v3724_v12 }
 0xa26   :  { %3747 = vperm.xlu1 %6800, %v3729_v21   ;;  %v3737_v1 = vmul.f32 %v3729_v21, %v3701_v58  ;;  %v3735_v58 = vld [vmem:[%s10197_s14 + $0x10] sm:$0xff] }
 0xa27   :  { %v6857_v2 = vpop.eup %6856 }
 0xa28   :  { %v3741_v6 = vsub.f32 %v3733_v52, %v3737_v1  ;;  %v3730_v60 = vmul.f32 %v6857_v2, %v3718_v14 }
 0xa29   :  { %v6859_v35 = vpop.eup %6858 }
 0xa2a   :  { %3787 = vperm.xlu1 %6800, %v3741_v6   ;;  %3752 = vperm.xlu0 %6801, %v3730_v60   ;;  %v3731_v63 = vmul.f32 %v6859_v35, %v3719_v24  ;;  %v3738_v10 = vmul.f32 %v3730_v60, %v3702_v45 }
 0xa2c   :  { %v3742_v42 = vsub.f32 %v3734_v31, %v3738_v10  ;;  %v3739_v23 = vmul.f32 %v3731_v63, %v3703_v15 }
 0xa2e   :  { %3757 = vperm.xlu0 %6801, %v3731_v63   ;;  %3792 = vperm.xlu1 %6800, %v3742_v42   ;;  %v3743_v57 = vsub.f32 %v3735_v58, %v3739_v23 }
 0xa2f   :  { %v6861_v0 = vpop.eup %6860 }
 0xa30   :  { %v3732_v25 = vmul.f32 %v6861_v0, %v3720_v38 }
 0xa32   :  { %3797 = vperm.xlu0 %6801, %v3743_v57   ;;  %3762 = vperm.xlu1 %6800, %v3732_v25   ;;  %v3740_v45 = vmul.f32 %v3732_v25, %v3704_v11 }
 0xa34   :  { %v3744_v15 = vsub.f32 %v3736_v18, %v3740_v45 }
 0xa36   :  { %3802 = vperm.xlu1 %6800, %v3744_v15  }
 0xaa5   :  { %v3748_v55 = vpop.permute.xlu1 %3747 }
 0xaa6   :  { %v3765_v26 = vmul.f32 %v3748_v55, %v8714_v19  ;;  %v3766_v16 = vmul.f32 %v3748_v55, %v8718_v41  ;;  %v3767_v4 = vmul.f32 %v3748_v55, %v8746_v29  ;;  %v3768_v34 = vmul.f32 %v3748_v55, %v8750_v39 }
 0xaa7   :  { %v3769_v17 = vmul.f32 %v3748_v55, %v8778_v56 }
 0xaa9   :  { %v3788_v53 = vpop.permute.xlu1 %3787  ;;  %v3753_v30 = vpop.permute.xlu0 %3752 }
 0xaaa   :  { %v3805_v49 = vadd.f32 %v3788_v53, %v3765_v26  ;;  %v3806_v43 = vadd.f32 %v3788_v53, %v3766_v16  ;;  %v8823_v46 = vadd.f32 %v3788_v53, %v3767_v4  ;;  %v8825_v11 = vadd.f32 %v3788_v53, %v3768_v34 }
 0xaab   :  { %v3809_v59 = vadd.f32 %v3788_v53, %v3769_v17  ;;  %v3770_v32 = vmul.f32 %v3753_v30, %v8722_v33  ;;  %v3771_v19 = vmul.f32 %v3753_v30, %v8726_v40  ;;  %v3772_v41 = vmul.f32 %v3753_v30, %v8754_v54 }
 0xaac   :  { %v3773_v29 = vmul.f32 %v3753_v30, %v8758_v44  ;;  %v3774_v39 = vmul.f32 %v3753_v30, %v8784_v9  ;;  %vm3826_vm6 = vcmp.gt.f32.partialorder %v3806_v43, 0.0  ;;  %v3846_v56 = vmul.f32 0.2, %v3806_v43 }
 0xaad   :  { %v3793_v50 = vpop.permute.xlu1 %3792  ;;  %v3758_v12 = vpop.permute.xlu0 %3757  ;;  %vm3825_vm9 = vcmp.gt.f32.partialorder %v3805_v49, 0.0  ;;  %v3845_v21 = vmul.f32 0.2, %v3805_v49  ;;  %vm3829_vm11 = vcmp.gt.f32.partialorder %v3809_v59, 0.0  ;;  %v3849_v52 = vmul.f32 0.2, %v3809_v59 }
 0xaae   :  { %v3810_v14 = vadd.f32 %v3793_v50, %v3770_v32  ;;  %v3811_v1 = vadd.f32 %v3793_v50, %v3771_v19  ;;  %v3812_v2 = vadd.f32 %v3793_v50, %v3772_v41  ;;  %v8832_v33 = vadd.f32 %v3793_v50, %v3773_v29 }
 0xaaf   :  { %v3814_v40 = vadd.f32 %v3793_v50, %v3774_v39  ;;  %v3775_v54 = vmul.f32 %v3758_v12, %v8730_v22  ;;  %v3776_v44 = vmul.f32 %v3758_v12, %v8734_v13  ;;  %v3777_v9 = vmul.f32 %v3758_v12, %v8762_v20 }
 0xab0   :  { %v3778_v24 = vmul.f32 %v3758_v12, %v8766_v48  ;;  %v3779_v6 = vmul.f32 %v3758_v12, %v8780_v61  ;;  %vm3831_vm15 = vcmp.gt.f32.partialorder %v3811_v1, 0.0  ;;  %v3851_v60 = vmul.f32 0.2, %v3811_v1 }
 0xab1   :  { %v3763_v35 = vpop.permute.xlu1 %3762  ;;  %v3798_v31 = vpop.permute.xlu0 %3797  ;;  %v3866_v63 = vsel %vm3826_vm6, %v3806_v43, %v3846_v56  ;;  %vm3830_vm10 = vcmp.gt.f32.partialorder %v3810_v14, 0.0  ;;  %v3850_v10 = vmul.f32 0.2, %v3810_v14  ;;  %v3865_v42 = vsel %vm3825_vm9, %v3805_v49, %v3845_v21 }
 0xab2   :  { %v3780_v22 = vmul.f32 %v3763_v35, %v8738_v47  ;;  %v3781_v13 = vmul.f32 %v3763_v35, %v8742_v36  ;;  %v3782_v20 = vmul.f32 %v3763_v35, %v8770_v3  ;;  %v3783_v48 = vmul.f32 %v3763_v35, %v8774_v5 }
 0xab3   :  { %v3784_v61 = vmul.f32 %v3763_v35, %v8786_v27  ;;  %v3815_v23 = vadd.f32 %v3798_v31, %v3775_v54  ;;  %v3816_v58 = vadd.f32 %v3798_v31, %v3776_v44  ;;  %v8846_v38 = vadd.f32 %v3798_v31, %v3777_v9 }
 0xab4   :  { %v8848_v0 = vadd.f32 %v3798_v31, %v3778_v24  ;;  %v8850_v57 = vadd.f32 %v3798_v31, %v3779_v6  ;;  %v3871_v25 = vsel %vm3831_vm15, %v3811_v1, %v3851_v60  ;;  %v3886_v47 = vmul.f32 %v3866_v63, %v7175_v8 }
 0xab5   :  { %v3803_v18 = vpop.permute.xlu1 %3802  ;;  %v3891_v36 = vmul.f32 %v3871_v25, %v7175_v8  ;;  %v3870_v3 = vsel %vm3830_vm10, %v3810_v14, %v3850_v10  ;;  %v3885_v5 = vmul.f32 %v3865_v42, %v7173_v7  ;;  %vm3834_vm8 = vcmp.gt.f32.partialorder %v3814_v40, 0.0 }
 0xab6   :  { %v3820_v27 = vadd.f32 %v3803_v18, %v3780_v22  ;;  %v3821_v45 = vadd.f32 %v3803_v18, %v3781_v13  ;;  %v3822_v15 = vadd.f32 %v3803_v18, %v3782_v20  ;;  %v8857_v55 = vadd.f32 %v3803_v18, %v3783_v48 }
 0xab7   :  { %v8859_v26 = vadd.f32 %v3803_v18, %v3784_v61  ;;  %v3906_v16 = vpack.c.bf16 %v3891_v36, %v3886_v47  ;;  %v3890_v4 = vmul.f32 %v3870_v3, %v7173_v7  ;;  %v3854_v34 = vmul.f32 0.2, %v3814_v40 }
 0xab8   :  { %v3869_v17 = vsel %vm3829_vm11, %v3809_v59, %v3849_v52  ;;  %vm3827_vm7 = vcmp.gt.f32.partialorder %v8823_v46, 0.0  ;;  %vm3832_vm14 = vcmp.gt.f32.partialorder %v3812_v2, 0.0  ;;  %v3847_v53 = vmul.f32 0.2, %v8823_v46 }
 0xab9   :  { %3927 = vrot.lane.b32.xlu1 %v3906_v16, %s6903_s12  ;;  %v3905_v30 = vpack.c.bf16 %v3890_v4, %v3885_v5  ;;  %v3874_v49 = vsel %vm3834_vm8, %v3814_v40, %v3854_v34  ;;  %v3889_v43 = vmul.f32 %v3869_v17, %v10228_v62  ;;  %v3852_v32 = vmul.f32 0.2, %v3812_v2 }
 0xaba   :  { %v3894_v19 = vmul.f32 %v3874_v49, %v10228_v62  ;;  %v3867_v41 = vsel %vm3827_vm7, %v8823_v46, %v3847_v53  ;;  %vm3828_vm6 = vcmp.gt.f32.partialorder %v8825_v11, 0.0  ;;  %vm3833_vm9 = vcmp.gt.f32.partialorder %v8832_v33, 0.0 }
 0xabb   :  { %3925 = vrot.lane.b32.xlu0 %v3905_v30, %s6903_s12  ;;  %v3872_v59 = vsel %vm3832_vm14, %v3812_v2, %v3852_v32  ;;  %v3887_v29 = vmul.f32 %v3867_v41, %v10226_v51  ;;  %v3848_v39 = vmul.f32 0.2, %v8825_v11  ;;  %v3853_v56 = vmul.f32 0.2, %v8832_v33 }
 0xabc   :  { %v3909_v50 = vpack.c.bf16 %v3894_v19, %v3889_v43  ;;  %v3892_v12 = vmul.f32 %v3872_v59, %v10226_v51  ;;  %vm3835_vm11 = vcmp.gt.f32.partialorder %v3815_v23, 0.0  ;;  %vm3840_vm15 = vcmp.gt.f32.partialorder %v3820_v27, 0.0 }
 0xabd   :  { %v3868_v46 = vsel %vm3828_vm6, %v8825_v11, %v3848_v39  ;;  %v3873_v21 = vsel %vm3833_vm9, %v8832_v33, %v3853_v56  ;;  %v3855_v52 = vmul.f32 0.2, %v3815_v23  ;;  %v3860_v14 = vmul.f32 0.2, %v3820_v27 }
 0xabe   :  { %3933 = vrot.lane.b32.xlu1 %v3909_v50, %s6903_s12  ;;  %v3907_v1 = vpack.c.bf16 %v3892_v12, %v3887_v29  ;;  %v3888_v2 = vmul.f32 %v3868_v46, %v10227_v37  ;;  %v3893_v40 = vmul.f32 %v3873_v21, %v10227_v37  ;;  %vm3836_vm10 = vcmp.gt.f32.partialorder %v3816_v58, 0.0 }
 0xabf   :  { %v3875_v54 = vsel %vm3835_vm11, %v3815_v23, %v3855_v52  ;;  %v3880_v44 = vsel %vm3840_vm15, %v3820_v27, %v3860_v14  ;;  %vm3841_vm8 = vcmp.gt.f32.partialorder %v3821_v45, 0.0  ;;  %v3856_v9 = vmul.f32 0.2, %v3816_v58 }
 0xac0   :  { %3929 = vrot.lane.b32.xlu0 %v3907_v1, %s6903_s12  ;;  %v3908_v24 = vpack.c.bf16 %v3893_v40, %v3888_v2  ;;  %v3895_v11 = vmul.f32 %v3875_v54, %v7173_v7  ;;  %v3900_v33 = vmul.f32 %v3880_v44, %v7173_v7  ;;  %v3861_v6 = vmul.f32 0.2, %v3821_v45 }
 0xac1   :  { %v3876_v60 = vsel %vm3836_vm10, %v3816_v58, %v3856_v9  ;;  %vm3837_vm7 = vcmp.gt.f32.partialorder %v8846_v38, 0.0  ;;  %vm3842_vm14 = vcmp.gt.f32.partialorder %v3822_v15, 0.0  ;;  %v3857_v35 = vmul.f32 0.2, %v8846_v38 }
 0xac2   :  { %v3910_v31 = vpack.c.bf16 %v3900_v33, %v3895_v11  ;;  %v3881_v63 = vsel %vm3841_vm8, %v3821_v45, %v3861_v6  ;;  %v3896_v10 = vmul.f32 %v3876_v60, %v7175_v8  ;;  %v3862_v42 = vmul.f32 0.2, %v3822_v15 }
 0xac3   :  { %v3901_v22 = vmul.f32 %v3881_v63, %v7175_v8  ;;  %v3877_v13 = vsel %vm3837_vm7, %v8846_v38, %v3857_v35  ;;  %vm3838_vm6 = vcmp.gt.f32.partialorder %v8848_v0, 0.0  ;;  %vm3843_vm9 = vcmp.gt.f32.partialorder %v8857_v55, 0.0 }
 0xac4   :  { %3931 = vrot.lane.b32.xlu0 %v3908_v24, %s6903_s12  ;;  %3935 = vrot.lane.b32.xlu1 %v3910_v31, %s6903_s12  ;;  %v3882_v20 = vsel %vm3842_vm14, %v3822_v15, %v3862_v42  ;;  %v3897_v48 = vmul.f32 %v3877_v13, %v10226_v51  ;;  %v3858_v61 = vmul.f32 0.2, %v8848_v0  ;;  %v3863_v23 = vmul.f32 0.2, %v8857_v55  ;;  %v9093_v42 = vld [vmem:[%s10188_s5 + $0x4] ss:$12 sps:$4 sm:$0xff]  }
 0xac5   :  { %v3911_v58 = vpack.c.bf16 %v3901_v22, %v3896_v10  ;;  %v3902_v25 = vmul.f32 %v3882_v20, %v10226_v51  ;;  %vm3839_vm11 = vcmp.gt.f32.partialorder %v8850_v57, 0.0  ;;  %vm3844_vm15 = vcmp.gt.f32.partialorder %v8859_v26, 0.0  ;;  %4787 = vmatprep.mubr.bf16.mxu0 %v9093_v42  ;;  %4893 = vmatprep.mubr.bf16.mxu1 %v9093_v42 }
 0xac6   :  { %v3878_v38 = vsel %vm3838_vm6, %v8848_v0, %v3858_v61  ;;  %v3883_v47 = vsel %vm3843_vm9, %v8857_v55, %v3863_v23  ;;  %v3859_v18 = vmul.f32 0.2, %v8850_v57  ;;  %v3864_v36 = vmul.f32 0.2, %v8859_v26 }
 0xac7   :  { %v3912_v3 = vpack.c.bf16 %v3902_v25, %v3897_v48  ;;  %v3898_v5 = vmul.f32 %v3878_v38, %v10227_v37  ;;  %v3903_v27 = vmul.f32 %v3883_v47, %v10227_v37  ;;  %vm10254_vm10 = vcmask 744448  }
 0xac8   :  { %3937 = vrot.lane.b32.xlu0 %v3911_v58, %s6903_s12  ;;  %v3879_v45 = vsel %vm3839_vm11, %v8850_v57, %v3859_v18  ;;  %v3884_v15 = vsel %vm3844_vm15, %v8859_v26, %v3864_v36  ;;  %vm10255_vm8 = vmmov %vm10254_vm10  ;;  %vm10258_vm6 = vcmask 736256  }
 0xac9   :  { %3939 = vrot.lane.b32.xlu1 %v3912_v3, %s6903_s12  ;;  %v3913_v0 = vpack.c.bf16 %v3903_v27, %v3898_v5  ;;  %v3899_v55 = vmul.f32 %v3879_v45, %v10228_v62  ;;  %v3904_v16 = vmul.f32 %v3884_v15, %v10228_v62  ;;  %vm10256_vm7 = vmmov %vm10255_vm8 }
 0xaca   :  { %vm10257_vm14 = vmmov %vm10256_vm7 }
 0xacb   :  { %v3914_v4 = vpack.c.bf16 %v3904_v16, %v3899_v55  ;;  %vm10259_vm9 = vmmov %vm10258_vm6 }
 0xacc   :  { %3941 = vrot.lane.b32.xlu0 %v3913_v0, %s6903_s12  ;;  %vm10260_vm11 = vmmov %vm10258_vm6 }
 0xacd   :  { %3943 = vrot.lane.b32.xlu1 %v3914_v4, %s6903_s12  ;;  %vm10261_vm15 = vmmov %vm10258_vm6 }
 0xb2b   :  { %v3928_v34 = vpop.permute.xlu1 %3927 }
 0xb2d   :  { %v3926_v17 = vpop.permute.xlu0 %3925 }
 0xb2e   :  { %v8914_v53 = vsel %vm1037_vm13, %v3926_v17, %v3928_v34  ;;  %3965 = vst.msk [vmem:[#allocation2] sm:$0xff] %vm1058_vm12, %v3926_v17 }
 0xb2f   :  { %4755 = vmatprep.subr.bf16.mxu0 %v8914_v53 }
 0xb30   :  { %v3934_v57 = vpop.permute.xlu1 %3933 }
 0xb31   :  { %3970 = vst.msk [vmem:[#allocation2 + $0x28] sm:$0xff] %vm1037_vm13, %v3934_v57 }
 0xb32   :  { %v3930_v26 = vpop.permute.xlu0 %3929 }
 0xb33   :  { %v3946_v30 = vsel %vm1037_vm13, %v3928_v34, %v3930_v26 }
 0xb34   :  { %4025 = vrot.lane.b32.xlu1 %v3946_v30, %s6894_s25 }
 0xb35   :  { %v3997_v49 = vld [vmem:[#allocation2] sm:$0xff] }
 0xb36   :  { %v3936_v43 = vpop.permute.xlu1 %3935  ;;  %v3932_v32 = vpop.permute.xlu0 %3931  ;;  %4021 = vrot.lane.b32.xlu0 %v3997_v49, %s6894_s25  ;;  %4756 = vmatpush1.bf16.msra.mxu0 %v3997_v49 }
 0xb37   :  { %3971 = vst.msk [vmem:[#allocation2 + $0x30] sm:$0xff] %vm1058_vm12, %v3936_v43  ;;  %v8924_v19 = vsel %vm1037_vm13, %v3930_v26, %v3932_v32  ;;  %v8927_v41 = vsel %vm1037_vm13, %v3932_v32, %v3934_v57 }
 0xb38   :  { %3969 = vst [vmem:[#allocation2 + $0x20] sm:$0xff] %v8927_v41  ;;  %4103 = vrot.lane.b32.xlu1 %v3946_v30, %s6895_s26  ;;  %4861 = vmatprep.subr.bf16.mxu1 %v8924_v19  ;;  %v9026_v1 = vld [vmem:[#allocation2 + $0x28] sm:$0xff] }
 0xb39   :  { %4862 = vmatpush1.bf16.msra.mxu1 %v3946_v30 }
 0xb3a   :  { %v3938_v59 = vpop.permute.xlu0 %3937  ;;  %4099 = vrot.lane.b32.xlu0 %v3997_v49, %s6895_s26 }
 0xb3b   :  { %v3940_v29 = vpop.permute.xlu1 %3939  ;;  %v8934_v39 = vsel %vm1037_vm13, %v3936_v43, %v3938_v59 }
 0xb3c   :  { %4181 = vrot.lane.b32.xlu1 %v3946_v30, %s6896_s27  ;;  %4757 = vmatprep.subr.bf16.mxu0 %v8934_v39  ;;  %v8943_v21 = vsel %vm1037_vm13, %v3938_v59, %v3940_v29 }
 0xb3e   :  { %v3942_v56 = vpop.permute.xlu0 %3941  ;;  %4177 = vrot.lane.b32.xlu0 %v3997_v49, %s6896_s27  ;;  %v3982_v50 = vld [vmem:[#allocation2 + $0x30] sm:$0xff] }
 0xb3f   :  { %v3944_v12 = vpop.permute.xlu1 %3943  ;;  %v8940_v46 = vsel %vm1037_vm13, %v3940_v29, %v3942_v56  ;;  %4758 = vmatpush1.bf16.msra.mxu0 %v3982_v50 }
 0xb40   :  { %3976 = vst.msk [vmem:[#allocation2 + $0x58] sm:$0xff] %vm1037_vm13, %v3944_v12  ;;  %v8947_v52 = vsel %vm1037_vm13, %v3942_v56, %v3944_v12  ;;  %4027 = vrot.lane.b32.xlu1 %v8924_v19, %s6894_s25  ;;  %4863 = vmatprep.subr.bf16.mxu1 %v8940_v46 }
 0xb41   :  { %3975 = vst [vmem:[#allocation2 + $0x50] sm:$0xff] %v8947_v52  ;;  %4864 = vmatpush1.bf16.msra.mxu1 %v8943_v21 }
 0xb42   :  { %4255 = vrot.lane.b32.xlu0 %v3997_v49, %s6897_s28 }
 0xb44   :  { %4259 = vrot.lane.b32.xlu1 %v3946_v30, %s6897_s28 }
 0xb46   :  { %4333 = vrot.lane.b32.xlu0 %v3997_v49, %s6898_s29 }
 0xb47   :  { %v9022_v14 = vld [vmem:[#allocation2 + $0x58] sm:$0xff] }
 0xb48   :  { %4105 = vrot.lane.b32.xlu1 %v8924_v19, %s6895_s26 }
 0xb4a   :  { %4411 = vrot.lane.b32.xlu0 %v3997_v49, %s6899_s30 }
 0xb4c   :  { %4337 = vrot.lane.b32.xlu1 %v3946_v30, %s6898_s29 }
 0xb4e   :  { %4489 = vrot.lane.b32.xlu0 %v3997_v49, %s6900_s0 }
 0xb50   :  { %4183 = vrot.lane.b32.xlu1 %v8924_v19, %s6896_s27 }
 0xb52   :  { %4567 = vrot.lane.b32.xlu0 %v3997_v49, %s6901_s19 }
 0xb54   :  { %4415 = vrot.lane.b32.xlu1 %v3946_v30, %s6899_s30 }
 0xb56   :  { %4023 = vrot.lane.b32.xlu0 %v8914_v53, %s6894_s25 }
 0xb58   :  { %4261 = vrot.lane.b32.xlu1 %v8924_v19, %s6897_s28 }
 0xb5a   :  { %4101 = vrot.lane.b32.xlu0 %v8914_v53, %s6895_s26 }
 0xb5c   :  { %4493 = vrot.lane.b32.xlu1 %v3946_v30, %s6900_s0 }
 0xb5e   :  { %4179 = vrot.lane.b32.xlu0 %v8914_v53, %s6896_s27 }
 0xb60   :  { %4339 = vrot.lane.b32.xlu1 %v8924_v19, %s6898_s29 }
 0xb62   :  { %4029 = vrot.lane.b32.xlu0 %v8927_v41, %s6894_s25 }
 0xb64   :  { %4419 = vrot.lane.b32.xlu1 %v8927_v41, %s6899_s30 }
 0xb66   :  { %4257 = vrot.lane.b32.xlu0 %v8914_v53, %s6897_s28 }
 0xb68   :  { %4571 = vrot.lane.b32.xlu1 %v3946_v30, %s6901_s19 }
 0xb6a   :  { %4107 = vrot.lane.b32.xlu0 %v8927_v41, %s6895_s26 }
 0xb6c   :  { %4033 = vrot.lane.b32.xlu1 %v3982_v50, %s6894_s25 }
 0xb6e   :  { %4335 = vrot.lane.b32.xlu0 %v8914_v53, %s6898_s29 }
 0xb70   :  { %4111 = vrot.lane.b32.xlu1 %v3982_v50, %s6895_s26 }
 0xb72   :  { %4185 = vrot.lane.b32.xlu0 %v8927_v41, %s6896_s27 }
 0xb74   :  { %4189 = vrot.lane.b32.xlu1 %v3982_v50, %s6896_s27 }
 0xb76   :  { %4413 = vrot.lane.b32.xlu0 %v8914_v53, %s6899_s30 }
 0xb78   :  { %4267 = vrot.lane.b32.xlu1 %v3982_v50, %s6897_s28 }
 0xb7a   :  { %4263 = vrot.lane.b32.xlu0 %v8927_v41, %s6897_s28 }
 0xb7c   :  { %4345 = vrot.lane.b32.xlu1 %v3982_v50, %s6898_s29 }
 0xb7e   :  { %4491 = vrot.lane.b32.xlu0 %v8914_v53, %s6900_s0 }
 0xb80   :  { %4423 = vrot.lane.b32.xlu1 %v3982_v50, %s6899_s30 }
 0xb82   :  { %4341 = vrot.lane.b32.xlu0 %v8927_v41, %s6898_s29 }
 0xb84   :  { %4501 = vrot.lane.b32.xlu1 %v3982_v50, %s6900_s0 }
 0xb86   :  { %4417 = vrot.lane.b32.xlu0 %v8924_v19, %s6899_s30 }
 0xb88   :  { %4579 = vrot.lane.b32.xlu1 %v3982_v50, %s6901_s19 }
 0xb8a   :  { %4569 = vrot.lane.b32.xlu0 %v8914_v53, %s6901_s19 }
 0xb8c   :  { %4035 = vrot.lane.b32.xlu1 %v8934_v39, %s6894_s25 }
 0xb8e   :  { %4037 = vrot.lane.b32.xlu0 %v8943_v21, %s6894_s25 }
 0xb90   :  { %4497 = vrot.lane.b32.xlu1 %v8927_v41, %s6900_s0 }
 0xb92   :  { %4495 = vrot.lane.b32.xlu0 %v8924_v19, %s6900_s0 }
 0xb94   :  { %4113 = vrot.lane.b32.xlu1 %v8934_v39, %s6895_s26 }
 0xb96   :  { %4115 = vrot.lane.b32.xlu0 %v8943_v21, %s6895_s26 }
 0xb98   :  { %4277 = vrot.lane.b32.xlu1 %v9022_v14, %s6897_s28 }
 0xb9a   :  { %4265 = vrot.lane.b32.xlu0 %v9026_v1, %s6897_s28 }
 0xb9c   :  { %4191 = vrot.lane.b32.xlu1 %v8934_v39, %s6896_s27 }
 0xb9e   :  { %4193 = vrot.lane.b32.xlu0 %v8943_v21, %s6896_s27 }
 0xba0   :  { %4041 = vrot.lane.b32.xlu1 %v8947_v52, %s6894_s25 }
 0xba2   :  { %4039 = vrot.lane.b32.xlu0 %v8940_v46, %s6894_s25 }
 0xba4   :  { %4269 = vrot.lane.b32.xlu1 %v8934_v39, %s6897_s28 }
 0xba6   :  { %4271 = vrot.lane.b32.xlu0 %v8943_v21, %s6897_s28  ;;  %v4026_v2 = vpop.permute.xlu1 %4025 }
 0xba8   :  { %v4022_v40 = vpop.permute.xlu0 %4021  ;;  %4119 = vrot.lane.b32.xlu1 %v8947_v52, %s6895_s26 }
 0xbaa   :  { %4117 = vrot.lane.b32.xlu0 %v8940_v46, %s6895_s26  ;;  %v9046_v54 = vpop.permute.xlu1 %4103 }
 0xbac   :  { %v9048_v44 = vpop.permute.xlu0 %4099  ;;  %4347 = vrot.lane.b32.xlu1 %v8934_v39, %s6898_s29 }
 0xbae   :  { %4349 = vrot.lane.b32.xlu0 %v8943_v21, %s6898_s29  ;;  %v9054_v9 = vpop.permute.xlu1 %4181 }
 0xbb0   :  { %v9056_v24 = vpop.permute.xlu0 %4177  ;;  %4197 = vrot.lane.b32.xlu1 %v8947_v52, %s6896_s27 }
 0xbb2   :  { %4195 = vrot.lane.b32.xlu0 %v8940_v46, %s6896_s27  ;;  %v4028_v11 = vpop.permute.xlu1 %4027 }
 0xbb3   :  { %v4047_v5 = vsel %vm124_vm0, %v4026_v2, %v4028_v11 }
 0xbb4   :  { %v9062_v33 = vpop.permute.xlu0 %4255  ;;  %4425 = vrot.lane.b32.xlu1 %v8934_v39, %s6899_s30 }
 0xbb6   :  { %4427 = vrot.lane.b32.xlu0 %v8943_v21, %s6899_s30  ;;  %v9068_v6 = vpop.permute.xlu1 %4259 }
 0xbb8   :  { %v9070_v60 = vpop.permute.xlu0 %4333  ;;  %4275 = vrot.lane.b32.xlu1 %v8947_v52, %s6897_s28 }
 0xbba   :  { %4273 = vrot.lane.b32.xlu0 %v8940_v46, %s6897_s28  ;;  %v9076_v35 = vpop.permute.xlu1 %4105 }
 0xbbc   :  { %v9078_v31 = vpop.permute.xlu0 %4411  ;;  %4503 = vrot.lane.b32.xlu1 %v8934_v39, %s6900_s0 }
 0xbbe   :  { %4505 = vrot.lane.b32.xlu0 %v8943_v21, %s6900_s0  ;;  %v9084_v63 = vpop.permute.xlu1 %4337 }
 0xbc0   :  { %v9086_v10 = vpop.permute.xlu0 %4489  ;;  %4353 = vrot.lane.b32.xlu1 %v8947_v52, %s6898_s29 }
 0xbc2   :  { %4343 = vrot.lane.b32.xlu0 %v9026_v1, %s6898_s29  ;;  %v9097_v22 = vpop.permute.xlu1 %4183 }
 0xbc4   :  { %v9101_v13 = vpop.permute.xlu0 %4567  ;;  %4429 = vrot.lane.b32.xlu1 %v8940_v46, %s6899_s30 }
 0xbc6   :  { %4351 = vrot.lane.b32.xlu0 %v8940_v46, %s6898_s29  ;;  %v9107_v20 = vpop.permute.xlu1 %4415 }
 0xbc8   :  { %v4024_v48 = vpop.permute.xlu0 %4023  ;;  %4581 = vrot.lane.b32.xlu1 %v8934_v39, %s6901_s19 }
 0xbc9   :  { %v4045_v61 = vsel %vm124_vm0, %v4022_v40, %v4024_v48  ;;  %v4046_v23 = vsel %vm124_vm0, %v4024_v48, %v4026_v2 }
 0xbca   :  { %4431 = vrot.lane.b32.xlu0 %v8947_v52, %s6899_s30  ;;  %v9115_v58 = vpop.permute.xlu1 %4261  ;;  %4759 = vmatprep.subr.bf16.mxu0 %v4046_v23 }
 0xbcb   :  { %4760 = vmatpush1.bf16.msra.mxu0 %v4045_v61 }
 0xbcc   :  { %v4102_v25 = vpop.permute.xlu0 %4101  ;;  %4031 = vrot.lane.b32.xlu1 %v9026_v1, %s6894_s25 }
 0xbce   :  { %4583 = vrot.lane.b32.xlu0 %v8943_v21, %s6901_s19  ;;  %v9121_v38 = vpop.permute.xlu1 %4493  ;;  %v4124_v21 = vsel %vm170_vm1, %v4102_v25, %v9046_v54 }
 0xbd0   :  { %v9123_v47 = vpop.permute.xlu0 %4179  ;;  %4507 = vrot.lane.b32.xlu1 %v8940_v46, %s6900_s0 }
 0xbd1   :  { %v4202_v61 = vsel %vm216_vm2, %v9123_v47, %v9054_v9 }
 0xbd2   :  { %4355 = vrot.lane.b32.xlu0 %v9022_v14, %s6898_s29  ;;  %v9129_v18 = vpop.permute.xlu1 %4339 }
 0xbd4   :  { %v9131_v36 = vpop.permute.xlu0 %4029  ;;  %4043 = vrot.lane.b32.xlu1 %v9022_v14, %s6894_s25 }
 0xbd5   :  { %v4048_v3 = vsel %vm124_vm0, %v4028_v11, %v9131_v36 }
 0xbd6   :  { %4509 = vrot.lane.b32.xlu0 %v8947_v52, %s6900_s0  ;;  %v9140_v27 = vpop.permute.xlu1 %4419  ;;  %4865 = vmatprep.subr.bf16.mxu1 %v4048_v3 }
 0xbd7   :  { %4866 = vmatpush1.bf16.msra.mxu1 %v4047_v5 }
 0xbd8   :  { %v9142_v45 = vpop.permute.xlu0 %4257  ;;  %4575 = vrot.lane.b32.xlu1 %v8927_v41, %s6901_s19 }
 0xbda   :  { %4573 = vrot.lane.b32.xlu0 %v8924_v19, %s6901_s19  ;;  %v9148_v15 = vpop.permute.xlu1 %4571 }
 0xbdc   :  { %v9150_v0 = vpop.permute.xlu0 %4107  ;;  %4109 = vrot.lane.b32.xlu1 %v9026_v1, %s6895_s26 }
 0xbde   :  { %4421 = vrot.lane.b32.xlu0 %v9026_v1, %s6899_s30  ;;  %v4034_v55 = vpop.permute.xlu1 %4033 }
 0xbe0   :  { %v9156_v16 = vpop.permute.xlu0 %4335  ;;  %4587 = vrot.lane.b32.xlu1 %v8947_v52, %s6901_s19 }
 0xbe2   :  { %4433 = vrot.lane.b32.xlu0 %v9022_v14, %s6899_s30  ;;  %v4112_v4 = vpop.permute.xlu1 %4111 }
 0xbe4   :  { %v9162_v34 = vpop.permute.xlu0 %4185  ;;  %4121 = vrot.lane.b32.xlu1 %v9022_v14, %s6895_s26 }
 0xbe6   :  { %4585 = vrot.lane.b32.xlu0 %v8940_v46, %s6901_s19  ;;  %v4190_v17 = vpop.permute.xlu1 %4189 }
 0xbe8   :  { %v9168_v53 = vpop.permute.xlu0 %4413  ;;  %4187 = vrot.lane.b32.xlu1 %v9026_v1, %s6896_s27 }
 0xbea   :  { %4499 = vrot.lane.b32.xlu0 %v9026_v1, %s6900_s0  ;;  %v4268_v57 = vpop.permute.xlu1 %4267 }
 0xbec   :  { %v9174_v26 = vpop.permute.xlu0 %4263  ;;  %4199 = vrot.lane.b32.xlu1 %v9022_v14, %s6896_s27 }
 0xbee   :  { %4511 = vrot.lane.b32.xlu0 %v9022_v14, %s6900_s0  ;;  %v9180_v30 = vpop.permute.xlu1 %4345 }
 0xbf0   :  { %v9182_v49 = vpop.permute.xlu0 %4491  ;;  %4589 = vrot.lane.b32.xlu1 %v9022_v14, %s6901_s19  ;;  %v4123_v14 = vsel %vm170_vm1, %v9048_v44, %v4102_v25  ;;  %v4201_v44 = vsel %vm216_vm2, %v9056_v24, %v9123_v47  ;;  %v4279_v47 = vsel %vm262_vm3, %v9062_v33, %v9142_v45  ;;  %v4358_v33 = vsel %vm308_vm4, %v9156_v16, %v9084_v63 }
 0xbf2   :  { %4577 = vrot.lane.b32.xlu0 %v9026_v1, %s6901_s19  ;;  %v9188_v43 = vpop.permute.xlu1 %4423 }
 0xbf4   :  { %v9190_v32 = vpop.permute.xlu0 %4341 }
 0xbf6   :  { %v9192_v19 = vpop.permute.xlu1 %4501 }
 0xbf8   :  { %v9194_v41 = vpop.permute.xlu0 %4417 }
 0xbfa   :  { %v9196_v59 = vpop.permute.xlu1 %4579 }
 0xbfc   :  { %v9198_v29 = vpop.permute.xlu0 %4569 }
 0xbfe   :  { %v4036_v39 = vpop.permute.xlu1 %4035 }
 0xbff   :  { %v4050_v12 = vsel %vm124_vm0, %v4034_v55, %v4036_v39 }
 0xc00   :  { %v4038_v56 = vpop.permute.xlu0 %4037 }
 0xc01   :  { %v4051_v50 = vsel %vm124_vm0, %v4036_v39, %v4038_v56  ;;  %v4280_v39 = vsel %vm262_vm3, %v9142_v45, %v9068_v6 }
 0xc02   :  { %v9202_v46 = vpop.permute.xlu1 %4497  ;;  %4761 = vmatprep.subr.bf16.mxu0 %v4051_v50 }
 0xc03   :  { %4762 = vmatpush1.bf16.msra.mxu0 %v4050_v12 }
 0xc04   :  { %v9206_v52 = vpop.permute.xlu0 %4495  ;;  %4763 = vmatprep.subr.bf16.mxu0 %v4124_v21  ;;  %v4126_v21 = vsel %vm170_vm1, %v9076_v35, %v9150_v0 }
 0xc06   :  { %v4114_v1 = vpop.permute.xlu1 %4113 }
 0xc07   :  { %4764 = vmatpush1.bf16.msra.mxu0 %v4123_v14  ;;  %v4128_v11 = vsel %vm170_vm1, %v4112_v4, %v4114_v1 }
 0xc08   :  { %v4116_v2 = vpop.permute.xlu0 %4115 }
 0xc09   :  { %v4129_v40 = vsel %vm170_vm1, %v4114_v1, %v4116_v2 }
 0xc0a   :  { %v9212_v48 = vpop.permute.xlu1 %4277  ;;  %4765 = vmatprep.subr.bf16.mxu0 %v4129_v40 }
 0xc0b   :  { %4766 = vmatpush1.bf16.msra.mxu0 %v4128_v11 }
 0xc0c   :  { %v9217_v23 = vpop.permute.xlu0 %4265  ;;  %4767 = vmatprep.subr.bf16.mxu0 %v4202_v61 }
 0xc0e   :  { %v4192_v25 = vpop.permute.xlu1 %4191 }
 0xc0f   :  { %4768 = vmatpush1.bf16.msra.mxu0 %v4201_v44  ;;  %v4206_v55 = vsel %vm216_vm2, %v4190_v17, %v4192_v25 }
 0xc10   :  { %v4194_v3 = vpop.permute.xlu0 %4193 }
 0xc11   :  { %v4207_v5 = vsel %vm216_vm2, %v4192_v25, %v4194_v3 }
 0xc12   :  { %v9224_v4 = vpop.permute.xlu1 %4041  ;;  %4769 = vmatprep.subr.bf16.mxu0 %v4207_v5 }
 0xc13   :  { %4770 = vmatpush1.bf16.msra.mxu0 %v4206_v55 }
 0xc14   :  { %v4040_v50 = vpop.permute.xlu0 %4039  ;;  %4771 = vmatprep.subr.bf16.mxu0 %v4280_v39 }
 0xc15   :  { %v4052_v12 = vsel %vm124_vm0, %v4038_v56, %v4040_v50  ;;  %v4053_v24 = vsel %vm124_vm0, %v4040_v50, %v9224_v4  ;;  %v4125_v56 = vsel %vm170_vm1, %v9046_v54, %v9076_v35  ;;  %v4357_v54 = vsel %vm308_vm4, %v9070_v60, %v9156_v16 }
 0xc16   :  { %v4270_v17 = vpop.permute.xlu1 %4269  ;;  %4867 = vmatprep.subr.bf16.mxu1 %v4053_v24  ;;  %v4436_v16 = vsel %vm354_vm5, %v9168_v53, %v9107_v20 }
 0xc17   :  { %4772 = vmatpush1.bf16.msra.mxu0 %v4279_v47  ;;  %4868 = vmatpush1.bf16.msra.mxu1 %v4052_v12  ;;  %v4284_v40 = vsel %vm262_vm3, %v4268_v57, %v4270_v17  ;;  %v4204_v57 = vsel %vm216_vm2, %v9097_v22, %v9162_v34 }
 0xc18   :  { %v4272_v14 = vpop.permute.xlu0 %4271  ;;  %4869 = vmatprep.subr.bf16.mxu1 %v4126_v21 }
 0xc19   :  { %v4285_v1 = vsel %vm262_vm3, %v4270_v17, %v4272_v14 }
 0xc1a   :  { %v9243_v11 = vpop.permute.xlu1 %4119  ;;  %4773 = vmatprep.subr.bf16.mxu0 %v4285_v1 }
 0xc1b   :  { %4774 = vmatpush1.bf16.msra.mxu0 %v4284_v40  ;;  %4870 = vmatpush1.bf16.msra.mxu1 %v4125_v56 }
 0xc1c   :  { %v4118_v45 = vpop.permute.xlu0 %4117  ;;  %4775 = vmatprep.subr.bf16.mxu0 %v4358_v33 }
 0xc1d   :  { %v4130_v61 = vsel %vm170_vm1, %v4116_v2, %v4118_v45  ;;  %v4131_v44 = vsel %vm170_vm1, %v4118_v45, %v9243_v11  ;;  %v4203_v2 = vsel %vm216_vm2, %v9054_v9, %v9097_v22  ;;  %v4435_v9 = vsel %vm354_vm5, %v9078_v31, %v9168_v53 }
 0xc1e   :  { %v4348_v35 = vpop.permute.xlu1 %4347  ;;  %4871 = vmatprep.subr.bf16.mxu1 %v4131_v44  ;;  %v4514_v53 = vsel %vm10254_vm10, %v9182_v49, %v9121_v38  ;;  %vm10262_vm10 = vmmov %vm10256_vm7 }
 0xc1f   :  { %4776 = vmatpush1.bf16.msra.mxu0 %v4357_v54  ;;  %4872 = vmatpush1.bf16.msra.mxu1 %v4130_v61  ;;  %v4362_v55 = vsel %vm308_vm4, %v9180_v30, %v4348_v35  ;;  %v4282_v30 = vsel %vm262_vm3, %v9115_v58, %v9174_v26  ;;  %v4592_v61 = vsel %vm10258_vm6, %v9198_v29, %v9148_v15 }
 0xc20   :  { %v4350_v25 = vpop.permute.xlu0 %4349  ;;  %4873 = vmatprep.subr.bf16.mxu1 %v4204_v57 }
 0xc21   :  { %v4363_v5 = vsel %vm308_vm4, %v4348_v35, %v4350_v25 }
 0xc22   :  { %v9263_v60 = vpop.permute.xlu1 %4197  ;;  %4777 = vmatprep.subr.bf16.mxu0 %v4363_v5 }
 0xc23   :  { %4778 = vmatpush1.bf16.msra.mxu0 %v4362_v55  ;;  %4874 = vmatpush1.bf16.msra.mxu1 %v4203_v2  ;;  %v9329_v2 = vld [vmem:[%s10188_s5 + $0x18] ss:$12 sps:$4 sm:$0xff]  }
 0xc24   :  { %v4196_v39 = vpop.permute.xlu0 %4195  ;;  %4779 = vmatprep.subr.bf16.mxu0 %v4436_v16 }
 0xc25   :  { %v4208_v50 = vsel %vm216_vm2, %v4194_v3, %v4196_v39  ;;  %v4209_v12 = vsel %vm216_vm2, %v4196_v39, %v9263_v60  ;;  %v4281_v3 = vsel %vm262_vm3, %v9068_v6, %v9115_v58  ;;  %v4513_v6 = vsel %vm10255_vm8, %v9086_v10, %v9182_v49  ;;  %v9308_v49 = vld [vmem:[%s10188_s5] ss:$12 sps:$4 sm:$0xff]   ;;  %vm10263_vm8 = vmmov %vm10256_vm7 }
 0xc26   :  { %v4426_v22 = vpop.permute.xlu1 %4425  ;;  %4875 = vmatprep.subr.bf16.mxu1 %v4209_v12  ;;  %vm10266_vm6 = vmmov %vm10263_vm8 }
 0xc27   :  { %4780 = vmatpush1.bf16.msra.mxu0 %v4435_v9  ;;  %4876 = vmatpush1.bf16.msra.mxu1 %v4208_v50  ;;  %v4440_v17 = vsel %vm354_vm5, %v9188_v43, %v4426_v22  ;;  %v4360_v43 = vsel %vm308_vm4, %v9129_v18, %v9190_v32  ;;  %v9353_v9 = vld [vmem:[%s10188_s5 + $0x8] ss:$12 sps:$4 sm:$0xff]  }
 0xc28   :  { %v4428_v24 = vpop.permute.xlu0 %4427  ;;  %4877 = vmatprep.subr.bf16.mxu1 %v4282_v30  ;;  %v4283_v30 = vsel %vm262_vm3, %v9174_v26, %v9217_v23 }
 0xc29   :  { %v4441_v47 = vsel %vm354_vm5, %v4426_v22, %v4428_v24  ;;  %v4516_v22 = vsel %vm10262_vm10, %v9206_v52, %v9202_v46  ;;  %vm10269_vm10 = vmmov %vm10259_vm9 }
 0xc2a   :  { %v9283_v31 = vpop.permute.xlu1 %4275  ;;  %4781 = vmatprep.subr.bf16.mxu0 %v4441_v47 }
 0xc2b   :  { %4782 = vmatpush1.bf16.msra.mxu0 %v4440_v17  ;;  %4878 = vmatpush1.bf16.msra.mxu1 %v4281_v3  ;;  %v3981_v3 = vld [vmem:[#allocation2 + $0x20] sm:$0xff]  ;;  %v4288_v17 = vsel %vm262_vm3, %v9283_v31, %v9212_v48 }
 0xc2c   :  { %v4274_v21 = vpop.permute.xlu0 %4273  ;;  %4783 = vmatprep.subr.bf16.mxu0 %v4514_v53 }
 0xc2d   :  { %v4286_v1 = vsel %vm262_vm3, %v4272_v14, %v4274_v21  ;;  %v4287_v56 = vsel %vm262_vm3, %v4274_v21, %v9283_v31  ;;  %v4359_v14 = vsel %vm308_vm4, %v9084_v63, %v9129_v18  ;;  %v9316_v63 = vld [vmem:[%s10188_s5 + $0x1c] ss:$12 sps:$4 sm:$0xff]   ;;  %v9375_v21 = vld [vmem:[%s10188_s5 + $0x20] ss:$12 sps:$4 sm:$0xff]  }
 0xc2e   :  { %v4504_v58 = vpop.permute.xlu1 %4503  ;;  %4879 = vmatprep.subr.bf16.mxu1 %v4287_v56 }
 0xc2f   :  { %4784 = vmatpush1.bf16.msra.mxu0 %v4513_v6  ;;  %4880 = vmatpush1.bf16.msra.mxu1 %v4286_v1  ;;  %v4518_v45 = vsel %vm10257_vm14, %v9192_v19, %v4504_v58  ;;  %v4591_v19 = vsel %vm10259_vm9, %v9101_v13, %v9198_v29  ;;  %v4438_v13 = vsel %vm354_vm5, %v9194_v41, %v9140_v27  ;;  %vm10265_vm14 = vmmov %vm10263_vm8 }
 0xc30   :  { %v4506_v40 = vpop.permute.xlu0 %4505  ;;  %4881 = vmatprep.subr.bf16.mxu1 %v4360_v43 }
 0xc31   :  { %v4519_v33 = vsel %vm10256_vm7, %v4504_v58, %v4506_v40  ;;  %vm10264_vm7 = vcmask 261120  }
 0xc32   :  { %v9303_v10 = vpop.permute.xlu1 %4353  ;;  %4785 = vmatprep.subr.bf16.mxu0 %v4519_v33 }
 0xc33   :  { %4786 = vmatpush1.bf16.msra.mxu0 %v4518_v45  ;;  %4882 = vmatpush1.bf16.msra.mxu1 %v4359_v14 }
 0xc34   :  { %v4344_v18 = vpop.permute.xlu0 %4343  ;;  %4808 = vmatprep.subr.bf16.mxu0 %v4592_v61 }
 0xc35   :  { %v4361_v48 = vsel %vm308_vm4, %v9190_v32, %v4344_v18 }
 0xc36   :  { %v4430_v44 = vpop.permute.xlu1 %4429  ;;  %4788 = vmatmul.mubr.bf16.vlgmr.msra.gmra.mrb[44].mxu0 %v9308_v49 }
 0xc37   :  { %4809 = vmatpush1.bf16.msra.mxu0 %v4591_v19  ;;  %4797 = vmatprep.mubr.bf16.mxu0 %v9316_v63  ;;  %v4442_v12 = vsel %vm354_vm5, %v4428_v24, %v4430_v44 }
 0xc38   :  { %v4352_v54 = vpop.permute.xlu0 %4351 }
 0xc39   :  { %v4364_v35 = vsel %vm308_vm4, %v4350_v25, %v4352_v54  ;;  %v4365_v57 = vsel %vm308_vm4, %v4352_v54, %v9303_v10  ;;  %v4437_v25 = vsel %vm354_vm5, %v9107_v20, %v9194_v41 }
 0xc3a   :  { %v4582_v5 = vpop.permute.xlu1 %4581  ;;  %4883 = vmatprep.subr.bf16.mxu1 %v4365_v57 }
 0xc3b   :  { %4884 = vmatpush1.bf16.msra.mxu1 %v4364_v35  ;;  %v4596_v20 = vsel %vm10261_vm15, %v9196_v59, %v4582_v5  ;;  %v4515_v59 = vsel %vm10263_vm8, %v9121_v38, %v9206_v52  ;;  %v3986_v52 = vld [vmem:[#allocation2 + $0x50] sm:$0xff]  ;;  %vm10268_vm15 = vmmov %vm10264_vm7 }
 0xc3c   :  { %v9334_v29 = vpop.permute.xlu0 %4431  ;;  %4885 = vmatprep.subr.bf16.mxu1 %v4438_v13  ;;  %vm10270_vm8 = vmmov %vm10259_vm9 }
 0xc3d   :  { %v4443_v16 = vsel %vm354_vm5, %v4430_v44, %v9334_v29 }
 0xc3e   :  { %v4032_v55 = vpop.permute.xlu1 %4031  ;;  %4798 = vmatmul.mubr.bf16.gmra.mrb[48].mxu0 %v9329_v2 }
 0xc3f   :  { %4886 = vmatpush1.bf16.msra.mxu1 %v4437_v25  ;;  %4840 = vmatprep.mubr.bf16.mxu0 %v10216_v28  ;;  %v4049_v6 = vsel %vm124_vm0, %v9131_v36, %v4032_v55 }
 0xc40   :  { %v9343_v39 = vpop.permute.xlu0 %4583  ;;  %4887 = vmatprep.subr.bf16.mxu1 %v4443_v16 }
 0xc41   :  { %v4597_v50 = vsel %vm10260_vm11, %v4582_v5, %v9343_v39  ;;  %vm10267_vm11 = vmmov %vm10259_vm9 }
 0xc42   :  { %v4508_v41 = vpop.permute.xlu1 %4507  ;;  %4810 = vmatprep.subr.bf16.mxu0 %v4597_v50 }
 0xc43   :  { %4811 = vmatpush1.bf16.msra.mxu0 %v4596_v20  ;;  %4888 = vmatpush1.bf16.msra.mxu1 %v4442_v12  ;;  %v4520_v53 = vsel %vm10266_vm6, %v4506_v40, %v4508_v41 }
 0xc44   :  { %v4356_v24 = vpop.permute.xlu0 %4355  ;;  %4889 = vmatprep.subr.bf16.mxu1 %v4516_v22  ;;  %6623 = vmatprep.subr.bf16.mxu0 %v4283_v30 }
 0xc45   :  { %v4366_v32 = vsel %vm308_vm4, %v9303_v10, %v4356_v24 }
 0xc46   :  { %v4044_v47 = vpop.permute.xlu1 %4043  ;;  %6540 = vmatmul.mubr.msk.bf16.vlgmr.msra.gmra.mrb[44].mxu0 %vm10264_vm7, %v9353_v9  ;;  %vm10271_vm7 = vmmov %vm10266_vm6 }
 0xc47   :  { %4890 = vmatpush1.bf16.msra.mxu1 %v4515_v59  ;;  %6624 = vmatpush3.bf16.msra.mxu0 %v3981_v3  ;;  %v4054_v36 = vsel %vm124_vm0, %v9224_v4, %v4044_v47 }
 0xc48   :  { %v4510_v26 = vpop.permute.xlu0 %4509  ;;  %6625 = vmatprep.subr.bf16.mxu0 %v4288_v17  ;;  %4850 = vmatprep.mubr.bf16.mxu0 %v10216_v28 }
 0xc49   :  { %v4521_v23 = vsel %vm10265_vm14, %v4508_v41, %v4510_v26  ;;  %vm10272_vm14 = vmmov %vm10268_vm15 }
 0xc4a   :  { %v4576_v38 = vpop.permute.xlu1 %4575  ;;  %4891 = vmatprep.subr.bf16.mxu1 %v4521_v23 }
 0xc4b   :  { %4892 = vmatpush1.bf16.msra.mxu1 %v4520_v53  ;;  %6626 = vmatpush3.bf16.msra.mxu0 %v3986_v52 }
 0xc4c   :  { %v4574_v31 = vpop.permute.xlu0 %4573  ;;  %6627 = vmatprep.subr.bf16.mxu0 %v4361_v48 }
 0xc4d   :  { %v4593_v1 = vsel %vm10259_vm9, %v9148_v15, %v4574_v31  ;;  %v4594_v56 = vsel %vm10267_vm11, %v4574_v31, %v4576_v38  ;;  %vm10273_vm9 = vmmov %vm10270_vm8 }
 0xc4e   :  { %v4110_v58 = vpop.permute.xlu1 %4109  ;;  %4894 = vmatmul.mubr.bf16.vlgmr.msra.gmra.mrb[40].mxu1 %v9308_v49  ;;  %6541 = vmatmul.mubr.msk.bf16.gmra.mrb[48].mxu0 %vm10268_vm15, %v9375_v21  ;;  %vm10274_vm11 = vmmov %vm10272_vm14 }
 0xc4f   :  { %4914 = vmatprep.subr.bf16.mxu1 %v4594_v56  ;;  %6628 = vmatpush3.bf16.msra.mxu0 %v4049_v6  ;;  %v4127_v14 = vsel %vm170_vm1, %v9150_v0, %v4110_v58  ;;  %vm10275_vm15 = vmmov %vm10270_vm8 }
 0xc50   :  { %v4422_v43 = vpop.permute.xlu0 %4421  ;;  %4915 = vmatpush1.bf16.msra.mxu1 %v4593_v1  ;;  %6629 = vmatprep.subr.bf16.mxu0 %v4366_v32 }
 0xc51   :  { %4903 = vmatprep.mubr.bf16.mxu1 %v9316_v63  ;;  %4999 = vmatprep.mubr.bf16.mxu0 %v9093_v42  ;;  %v4439_v40 = vsel %vm354_vm5, %v9140_v27, %v4422_v43 }
 0xc52   :  { %v4588_v15 = vpop.permute.xlu1 %4587 }
 0xc53   :  { %6630 = vmatpush3.bf16.msra.mxu0 %v4054_v36 }
 0xc54   :  { %v4434_v33 = vpop.permute.xlu0 %4433  ;;  %6631 = vmatprep.subr.bf16.mxu0 %v4439_v40 }
 0xc55   :  { %v4444_v10 = vsel %vm354_vm5, %v9334_v29, %v4434_v33 }
 0xc56   :  { %v4122_v45 = vpop.permute.xlu1 %4121  ;;  %4904 = vmatmul.mubr.bf16.gmra.mrb[44].mxu1 %v9329_v2 }
 0xc57   :  { %6632 = vmatpush3.bf16.msra.mxu0 %v4127_v14  ;;  %4946 = vmatprep.mubr.bf16.mxu1 %v10216_v28  ;;  %v4132_v61 = vsel %vm170_vm1, %v9243_v11, %v4122_v45 }
 0xc58   :  { %v4586_v42 = vpop.permute.xlu0 %4585  ;;  %6633 = vmatprep.subr.bf16.mxu0 %v4444_v10 }
 0xc59   :  { %v4598_v27 = vsel %vm10269_vm10, %v9343_v39, %v4586_v42  ;;  %v4599_v4 = vsel %vm10270_vm8, %v4586_v42, %v4588_v15  ;;  %vm10276_vm10 = vmmov %vm10274_vm11 }
 0xc5a   :  { %v4188_v0 = vpop.permute.xlu1 %4187  ;;  %4916 = vmatprep.subr.bf16.mxu1 %v4599_v4  ;;  %vm10277_vm8 = vmmov %vm10276_vm10 }
 0xc5b   :  { %4917 = vmatpush1.bf16.msra.mxu1 %v4598_v27  ;;  %6634 = vmatpush3.bf16.msra.mxu0 %v4132_v61  ;;  %v4205_v44 = vsel %vm216_vm2, %v9162_v34, %v4188_v0 }
 0xc5c   :  { %v4500_v18 = vpop.permute.xlu0 %4499 }
 0xc5d   :  { %v4517_v19 = vsel %vm10271_vm7, %v9202_v46, %v4500_v18 }
 0xc5e   :  { %v4200_v54 = vpop.permute.xlu1 %4199  ;;  %6542 = vmatmul.mubr.msk.bf16.vlgmr.msra.gmra.mrb[40].mxu1 %vm10272_vm14, %v9353_v9  ;;  %6635 = vmatprep.subr.bf16.mxu0 %v4517_v19 }
 0xc5f   :  { %6636 = vmatpush3.bf16.msra.mxu0 %v4205_v44  ;;  %4956 = vmatprep.mubr.bf16.mxu1 %v10216_v28  ;;  %v4210_v57 = vsel %vm216_vm2, %v9263_v60, %v4200_v54 }
 0xc60   :  { %v4512_v11 = vpop.permute.xlu0 %4511 }
 0xc61   :  { %v4522_v35 = vsel %vm10266_vm6, %v4510_v26, %v4512_v11 }
 0xc62   :  { %6637 = vmatprep.subr.bf16.mxu0 %v4522_v35  ;;  %v4590_v5 = vpop.permute.xlu1 %4589 }
 0xc63   :  { %6638 = vmatpush3.bf16.msra.mxu0 %v4210_v57  ;;  %v4600_v13 = vsel %vm10275_vm15, %v4588_v15, %v4590_v5 }
 0xc64   :  { %v4578_v46 = vpop.permute.xlu0 %4577 }
 0xc65   :  { %v4595_v34 = vsel %vm10273_vm9, %v4576_v38, %v4578_v46 }
 0xc66   :  { %6710 = vmatprep.subr.bf16.mxu1 %v4595_v34  ;;  %6543 = vmatmul.mubr.msk.bf16.gmra.mrb[44].mxu1 %vm10274_vm11, %v9375_v21 }
 0xc67   :  { %6711 = vmatpush3.bf16.msra.mxu1 %v4595_v34  ;;  %5000 = vmatmul.mubr.bf16.vlgmr.msra.gmra.mrb[52].mxu0 %v9308_v49 }
 0xc68   :  { %6712 = vmatprep.subr.bf16.mxu1 %v4600_v13  ;;  %6714 = vmatprep.mubr.msk.bf16.mxu1 %vm10276_vm10, %v9353_v9 }
 0xc69   :  { %5007 = vmatprep.mubr.bf16.mxu0 %v9316_v63 }
 0xc6b   :  { %6713 = vmatpush3.bf16.msra.mxu1 %v4600_v13 }
 0xc6e   :  { %6715 = vmatmul.mubr.msk.bf16.vlgmr.msra.gmra.mrb[48].mxu1 %vm10277_vm8, %v9375_v21 }
 0xc6f   :  { %5008 = vmatmul.mubr.bf16.gmra.mrb[56].mxu0 %v9329_v2 }
 0xd19   :  { %v9427_v60 = vpop.f32.mrb[44].mxu0 }
 0xd1a   :  { %v5065_v29 = vmul.f32 %v9427_v60, %v7173_v7  ;;  %v9431_v25 = vpop.f32.mrb[45].mxu0 }
 0xd1b   :  { %v5066_v49 = vmul.f32 %v9431_v25, %v7175_v8  ;;  %v9435_v55 = vpop.f32.mrb[46].mxu0 }
 0xd1c   :  { %v5109_v16 = vmul.f32 %v5065_v29, %v5065_v29  ;;  %v5070_v63 = vmul.f32 %v9435_v55, %v7173_v7  ;;  %v9439_v39 = vpop.f32.mrb[47].mxu0 }
 0xd1d   :  { %v5085_v50 = vadd.f32 %v5066_v49, %v5065_v29  ;;  %v5110_v2 = vmul.f32 %v5066_v49, %v5066_v49  ;;  %v5071_v12 = vmul.f32 %v9439_v39, %v7175_v8 }
 0xd1e   :  { %v5114_v20 = vmul.f32 %v5070_v63, %v5070_v63 }
 0xd1f   :  { %v5129_v41 = vadd.f32 %v5110_v2, %v5109_v16  ;;  %v5091_v9 = vadd.f32 %v5071_v12, %v5070_v63  ;;  %v5115_v22 = vmul.f32 %v5071_v12, %v5071_v12 }
 0xd21   :  { %v5135_v30 = vadd.f32 %v5115_v22, %v5114_v20  ;;  %v9443_v24 = vpop.f32.mrb[48].mxu0 }
 0xd22   :  { %v5075_v59 = vmul.f32 %v9443_v24, %v7173_v7  ;;  %v9447_v47 = vpop.f32.mrb[49].mxu0 }
 0xd23   :  { %v5076_v3 = vmul.f32 %v9447_v47, %v7175_v8  ;;  %v9451_v17 = vpop.f32.mrb[50].mxu0 }
 0xd24   :  { %v5119_v26 = vmul.f32 %v5075_v59, %v5075_v59  ;;  %v5080_v23 = vmul.f32 %v9451_v17, %v7173_v7  ;;  %v9455_v53 = vpop.f32.mrb[51].mxu0 }
 0xd25   :  { %v5097_v38 = vadd.f32 %v5076_v3, %v5075_v59  ;;  %v5120_v52 = vmul.f32 %v5076_v3, %v5076_v3  ;;  %v5081_v21 = vmul.f32 %v9455_v53, %v7175_v8 }
 0xd26   :  { %v5124_v48 = vmul.f32 %v5080_v23, %v5080_v23 }
 0xd27   :  { %v5141_v31 = vadd.f32 %v5120_v52, %v5119_v26  ;;  %v5103_v1 = vadd.f32 %v5081_v21, %v5080_v23  ;;  %v5125_v56 = vmul.f32 %v5081_v21, %v5081_v21 }
 0xd29   :  { %v5147_v6 = vadd.f32 %v5125_v56, %v5124_v48 }
 0xd31   :  { %v9459_v58 = vpop.f32.mrb[40].mxu1 }
 0xd32   :  { %v5067_v32 = vmul.f32 %v9459_v58, %v10226_v51  ;;  %v9463_v43 = vpop.f32.mrb[41].mxu1 }
 0xd33   :  { %v5068_v36 = vmul.f32 %v9463_v43, %v10227_v37  ;;  %v9467_v15 = vpop.f32.mrb[42].mxu1 }
 0xd34   :  { %v5086_v40 = vadd.f32 %v5085_v50, %v5067_v32  ;;  %v5111_v33 = vmul.f32 %v5067_v32, %v5067_v32  ;;  %v5072_v14 = vmul.f32 %v9467_v15, %v10226_v51  ;;  %v9471_v45 = vpop.f32.mrb[43].mxu1 }
 0xd35   :  { %v5112_v10 = vmul.f32 %v5068_v36, %v5068_v36  ;;  %v5073_v42 = vmul.f32 %v9471_v45, %v10227_v37 }
 0xd36   :  { %v5130_v27 = vadd.f32 %v5129_v41, %v5111_v33  ;;  %v5087_v4 = vadd.f32 %v5086_v40, %v5068_v36  ;;  %v5092_v61 = vadd.f32 %v5091_v9, %v5072_v14  ;;  %v5116_v0 = vmul.f32 %v5072_v14, %v5072_v14 }
 0xd37   :  { %v5117_v18 = vmul.f32 %v5073_v42, %v5073_v42 }
 0xd38   :  { %v5131_v19 = vadd.f32 %v5130_v27, %v5112_v10  ;;  %v5136_v44 = vadd.f32 %v5135_v30, %v5116_v0  ;;  %v5093_v54 = vadd.f32 %v5092_v61, %v5073_v42 }
 0xd39   :  { %v9475_v11 = vpop.f32.mrb[44].mxu1 }
 0xd3a   :  { %v5137_v35 = vadd.f32 %v5136_v44, %v5117_v18  ;;  %v5077_v57 = vmul.f32 %v9475_v11, %v10226_v51  ;;  %v9479_v46 = vpop.f32.mrb[45].mxu1  ;;  %v6639_v5 = vpop.f32.mrb[52].mxu0 }
 0xd3b   :  { %v5078_v34 = vmul.f32 %v9479_v46, %v10227_v37  ;;  %v9483_v13 = vpop.f32.mrb[46].mxu1  ;;  %v6640_v29 = vpop.f32.mrb[53].mxu0 }
 0xd3c   :  { %v5098_v49 = vadd.f32 %v5097_v38, %v5077_v57  ;;  %v5121_v16 = vmul.f32 %v5077_v57, %v5077_v57  ;;  %v5082_v63 = vmul.f32 %v9483_v13, %v10226_v51  ;;  %v9487_v50 = vpop.f32.mrb[47].mxu1  ;;  %v6641_v2 = vadd.f32 %v6640_v29, %v6639_v5  ;;  %v6642_v12 = vpop.f32.mrb[54].mxu0 }
 0xd3d   :  { %v5122_v20 = vmul.f32 %v5078_v34, %v5078_v34  ;;  %v5083_v41 = vmul.f32 %v9487_v50, %v10227_v37  ;;  %v6643_v9 = vpop.f32.mrb[55].mxu0 }
 0xd3e   :  { %v5142_v22 = vadd.f32 %v5141_v31, %v5121_v16  ;;  %v5099_v30 = vadd.f32 %v5098_v49, %v5078_v34  ;;  %v5104_v59 = vadd.f32 %v5103_v1, %v5082_v63  ;;  %v5126_v3 = vmul.f32 %v5082_v63, %v5082_v63 }
 0xd3f   :  { %v5127_v26 = vmul.f32 %v5083_v41, %v5083_v41  ;;  %v6644_v23 = vadd.f32 %v6643_v9, %v6642_v12 }
 0xd40   :  { %v5143_v38 = vadd.f32 %v5142_v22, %v5122_v20  ;;  %v5148_v52 = vadd.f32 %v5147_v6, %v5126_v3  ;;  %v5105_v21 = vadd.f32 %v5104_v59, %v5083_v41 }
 0xd41   :  { %v6716_v48 = vpop.f32.mrb[48].mxu1 }
 0xd42   :  { %v5149_v56 = vadd.f32 %v5148_v52, %v5127_v26  ;;  %v5050_v32 = vpop.f32.mrb[49].mxu1  ;;  %v6645_v36 = vpop.f32.mrb[56].mxu0 }
 0xd43   :  { %v9491_v40 = vadd.f32 %v6641_v2, %v5050_v32  ;;  %v6717_v33 = vpop.f32.mrb[50].mxu1  ;;  %v6646_v14 = vpop.f32.mrb[57].mxu0 }
 0xd44   :  { %v5053_v10 = vpop.f32.mrb[51].mxu1  ;;  %v6647_v42 = vadd.f32 %v6646_v14, %v6645_v36  ;;  %v6648_v27 = vpop.f32.mrb[58].mxu0 }
 0xd45   :  { %v5069_v31 = vmul.f32 %v9491_v40, %v10228_v62  ;;  %v9495_v1 = vadd.f32 %v6644_v23, %v5053_v10  ;;  %v6649_v61 = vpop.f32.mrb[59].mxu0 }
 0xd46   :  { %v9497_v0 = vadd.f32 %v6716_v48, %v6647_v42  ;;  %v6650_v6 = vadd.f32 %v6649_v61, %v6648_v27 }
 0xd47   :  { %v5113_v18 = vmul.f32 %v5069_v31, %v5069_v31  ;;  %v5074_v44 = vmul.f32 %v9495_v1, %v10228_v62  ;;  %v5088_v57 = vadd.f32 %v5087_v4, %v5069_v31 }
 0xd48   :  { %v9501_v5 = vadd.f32 %v6717_v33, %v6650_v6  ;;  %v5079_v34 = vmul.f32 %v9497_v0, %v10228_v62 }
 0xd49   :  { %5089 = vadd.xlane.f32.xlu0 %v5088_v57  ;;  %v5094_v29 = vadd.f32 %v5093_v54, %v5074_v44  ;;  %v5118_v49 = vmul.f32 %v5074_v44, %v5074_v44  ;;  %v5132_v16 = vadd.f32 %v5131_v19, %v5113_v18 }
 0xd4a   :  { %v5100_v63 = vadd.f32 %v5099_v30, %v5079_v34  ;;  %v5123_v2 = vmul.f32 %v5079_v34, %v5079_v34  ;;  %v5084_v12 = vmul.f32 %v9501_v5, %v10228_v62 }
 0xd4b   :  { %5095 = vadd.xlane.f32.xlu1 %v5094_v29  ;;  %v5138_v20 = vadd.f32 %v5137_v35, %v5118_v49  ;;  %v5169_v29 = vld [vmem:[%s10194_s11] sm:$0xff] }
 0xd4c   :  { %v5144_v4 = vadd.f32 %v5143_v38, %v5123_v2  ;;  %v5106_v41 = vadd.f32 %v5105_v21, %v5084_v12  ;;  %v5128_v9 = vmul.f32 %v5084_v12, %v5084_v12  ;;  %v5185_v2 = vld [vmem:[%s10198_s15] sm:$0xff]  ;;  %v5170_v12 = vld [vmem:[%s10194_s11 + $0x8] sm:$0xff] }
 0xd4d   :  { %5133 = vadd.xlane.f32.xlu0 %v5132_v16 }
 0xd4e   :  { %v5150_v22 = vadd.f32 %v5149_v56, %v5128_v9 }
 0xd4f   :  { %5101 = vadd.xlane.f32.xlu1 %v5100_v63 }
 0xd51   :  { %5139 = vadd.xlane.f32.xlu0 %v5138_v20 }
 0xd53   :  { %5145 = vadd.xlane.f32.xlu1 %v5144_v4 }
 0xd55   :  { %5107 = vadd.xlane.f32.xlu0 %v5106_v41  ;;  %v5171_v41 = vld [vmem:[%s10194_s11 + $0x10] sm:$0xff] }
 0xd59   :  { %5151 = vadd.xlane.f32.xlu0 %v5150_v22 }
 0xdd6   :  { %v5090_v54 = vpop.xlane.xlu0 %5089 }
 0xdd7   :  { %v5153_v59 = vmul.f32 0.001953125, %v5090_v54 }
 0xdd8   :  { %v5096_v3 = vpop.xlane.xlu1 %5095 }
 0xdd9   :  { %v5161_v26 = vmul.f32 %v5153_v59, %v5153_v59  ;;  %v5154_v30 = vmul.f32 0.001953125, %v5096_v3  ;;  %v5186_v3 = vld [vmem:[%s10198_s15 + $0x8] sm:$0xff] }
 0xdda   :  { %v5134_v19 = vpop.xlane.xlu0 %5133 }
 0xddb   :  { %v5157_v23 = vmul.f32 0.001953125, %v5134_v19  ;;  %v5162_v35 = vmul.f32 %v5154_v30, %v5154_v30 }
 0xddc   :  { %v5102_v52 = vpop.xlane.xlu1 %5101 }
 0xddd   :  { %v5165_v48 = vsub.f32 %v5157_v23, %v5161_v26  ;;  %v5155_v32 = vmul.f32 0.001953125, %v5102_v52 }
 0xdde   :  { %v5140_v36 = vpop.xlane.xlu0 %5139 }
 0xddf   :  { %v5173_v33 = vadd.f32 1e-05, %v5165_v48  ;;  %v5158_v38 = vmul.f32 0.001953125, %v5140_v36  ;;  %v5163_v21 = vmul.f32 %v5155_v32, %v5155_v32  ;;  %v5172_v48 = vld [vmem:[%s10194_s11 + $0x18] sm:$0xff] }
 0xde0   :  { %v5146_v14 = vpop.xlane.xlu1 %5145 }
 0xde1   :  { %6862 = vrsqrt.f32 %v5173_v33  ;;  %v5166_v10 = vsub.f32 %v5158_v38, %v5162_v35  ;;  %v5159_v56 = vmul.f32 0.001953125, %v5146_v14  ;;  %v5188_v38 = vld [vmem:[%s10198_s15 + $0x18] sm:$0xff] }
 0xde2   :  { %v5108_v42 = vpop.xlane.xlu0 %5107 }
 0xde3   :  { %v5174_v27 = vadd.f32 1e-05, %v5166_v10  ;;  %v5167_v31 = vsub.f32 %v5159_v56, %v5163_v21  ;;  %v5156_v61 = vmul.f32 0.001953125, %v5108_v42 }
 0xde5   :  { %6864 = vrsqrt.f32 %v5174_v27  ;;  %v5175_v6 = vadd.f32 1e-05, %v5167_v31  ;;  %v5164_v44 = vmul.f32 %v5156_v61, %v5156_v61 }
 0xde6   :  { %v5152_v18 = vpop.xlane.xlu0 %5151 }
 0xde7   :  { %6866 = vrsqrt.f32 %v5175_v6  ;;  %v5160_v57 = vmul.f32 0.001953125, %v5152_v18 }
 0xde9   :  { %v5168_v34 = vsub.f32 %v5160_v57, %v5164_v44 }
 0xdeb   :  { %v6863_v49 = vpop.eup %6862  ;;  %v5176_v16 = vadd.f32 1e-05, %v5168_v34 }
 0xdec   :  { %v5181_v63 = vmul.f32 %v6863_v49, %v5169_v29 }
 0xded   :  { %6868 = vrsqrt.f32 %v5176_v16 }
 0xdee   :  { %5199 = vperm.xlu1 %6800, %v5181_v63   ;;  %v5189_v20 = vmul.f32 %v5181_v63, %v5153_v59  ;;  %v5187_v59 = vld [vmem:[%s10198_s15 + $0x10] sm:$0xff] }
 0xdef   :  { %v6865_v4 = vpop.eup %6864 }
 0xdf0   :  { %v5193_v9 = vsub.f32 %v5185_v2, %v5189_v20  ;;  %v5182_v22 = vmul.f32 %v6865_v4, %v5170_v12 }
 0xdf1   :  { %v6867_v54 = vpop.eup %6866 }
 0xdf2   :  { %5239 = vperm.xlu1 %6800, %v5193_v9   ;;  %5204 = vperm.xlu0 %6801, %v5182_v22   ;;  %v5183_v19 = vmul.f32 %v6867_v54, %v5171_v41  ;;  %v5190_v26 = vmul.f32 %v5182_v22, %v5154_v30 }
 0xdf4   :  { %v5194_v23 = vsub.f32 %v5186_v3, %v5190_v26  ;;  %v5191_v52 = vmul.f32 %v5183_v19, %v5155_v32 }
 0xdf6   :  { %5209 = vperm.xlu0 %6801, %v5183_v19   ;;  %5244 = vperm.xlu1 %6800, %v5194_v23   ;;  %v5195_v35 = vsub.f32 %v5187_v59, %v5191_v52 }
 0xdf7   :  { %v6869_v36 = vpop.eup %6868 }
 0xdf8   :  { %v5184_v33 = vmul.f32 %v6869_v36, %v5172_v48 }
 0xdfa   :  { %5249 = vperm.xlu0 %6801, %v5195_v35   ;;  %5214 = vperm.xlu1 %6800, %v5184_v33   ;;  %v5192_v30 = vmul.f32 %v5184_v33, %v5156_v61 }
 0xdfc   :  { %v5196_v32 = vsub.f32 %v5188_v38, %v5192_v30 }
 0xdfe   :  { %5254 = vperm.xlu1 %6800, %v5196_v32  }
 0xe6d   :  { %v5200_v14 = vpop.permute.xlu1 %5199 }
 0xe6e   :  { %v5217_v21 = vmul.f32 %v5200_v14, %v9427_v60  ;;  %v5218_v10 = vmul.f32 %v5200_v14, %v9431_v25  ;;  %v5219_v56 = vmul.f32 %v5200_v14, %v9459_v58  ;;  %v5220_v42 = vmul.f32 %v5200_v14, %v9463_v43 }
 0xe6f   :  { %v5221_v27 = vmul.f32 %v5200_v14, %v9491_v40 }
 0xe71   :  { %v5240_v31 = vpop.permute.xlu1 %5239  ;;  %v5205_v6 = vpop.permute.xlu0 %5204 }
 0xe72   :  { %v5257_v18 = vadd.f32 %v5240_v31, %v5217_v21  ;;  %v5258_v44 = vadd.f32 %v5240_v31, %v5218_v10  ;;  %v9536_v57 = vadd.f32 %v5240_v31, %v5219_v56  ;;  %v9538_v61 = vadd.f32 %v5240_v31, %v5220_v42 }
 0xe73   :  { %v5261_v34 = vadd.f32 %v5240_v31, %v5221_v27  ;;  %v5222_v29 = vmul.f32 %v5205_v6, %v9435_v55  ;;  %v5223_v60 = vmul.f32 %v5205_v6, %v9439_v39  ;;  %v5224_v25 = vmul.f32 %v5205_v6, %v9467_v15 }
 0xe74   :  { %v5225_v58 = vmul.f32 %v5205_v6, %v9471_v45  ;;  %v5226_v43 = vmul.f32 %v5205_v6, %v9495_v1  ;;  %vm5278_vm7 = vcmp.gt.f32.partialorder %v5258_v44, 0.0  ;;  %v5298_v40 = vmul.f32 0.2, %v5258_v44 }
 0xe75   :  { %v5245_v49 = vpop.permute.xlu1 %5244  ;;  %v5210_v16 = vpop.permute.xlu0 %5209  ;;  %vm5277_vm14 = vcmp.gt.f32.partialorder %v5257_v18, 0.0  ;;  %v5297_v63 = vmul.f32 0.2, %v5257_v18  ;;  %vm5281_vm6 = vcmp.gt.f32.partialorder %v5261_v34, 0.0  ;;  %v5301_v2 = vmul.f32 0.2, %v5261_v34 }
 0xe76   :  { %v5262_v12 = vadd.f32 %v5245_v49, %v5222_v29  ;;  %v5263_v20 = vadd.f32 %v5245_v49, %v5223_v60  ;;  %v5264_v4 = vadd.f32 %v5245_v49, %v5224_v25  ;;  %v9545_v55 = vadd.f32 %v5245_v49, %v5225_v58 }
 0xe77   :  { %v5266_v39 = vadd.f32 %v5245_v49, %v5226_v43  ;;  %v5227_v15 = vmul.f32 %v5210_v16, %v9443_v24  ;;  %v5228_v45 = vmul.f32 %v5210_v16, %v9447_v47  ;;  %v5229_v1 = vmul.f32 %v5210_v16, %v9475_v11 }
 0xe78   :  { %v5230_v41 = vmul.f32 %v5210_v16, %v9479_v46  ;;  %v5231_v9 = vmul.f32 %v5210_v16, %v9497_v0  ;;  %vm5283_vm9 = vcmp.gt.f32.partialorder %v5263_v20, 0.0  ;;  %v5303_v22 = vmul.f32 0.2, %v5263_v20 }
 0xe79   :  { %v5215_v54 = vpop.permute.xlu1 %5214  ;;  %v5250_v3 = vpop.permute.xlu0 %5249  ;;  %v5318_v19 = vsel %vm5278_vm7, %v5258_v44, %v5298_v40  ;;  %vm5282_vm11 = vcmp.gt.f32.partialorder %v5262_v12, 0.0  ;;  %v5302_v26 = vmul.f32 0.2, %v5262_v12  ;;  %v5317_v23 = vsel %vm5277_vm14, %v5257_v18, %v5297_v63 }
 0xe7a   :  { %v5232_v24 = vmul.f32 %v5215_v54, %v9451_v17  ;;  %v5233_v47 = vmul.f32 %v5215_v54, %v9455_v53  ;;  %v5234_v11 = vmul.f32 %v5215_v54, %v9483_v13  ;;  %v5235_v46 = vmul.f32 %v5215_v54, %v9487_v50 }
 0xe7b   :  { %v5236_v0 = vmul.f32 %v5215_v54, %v9501_v5  ;;  %v5267_v52 = vadd.f32 %v5250_v3, %v5227_v15  ;;  %v5268_v59 = vadd.f32 %v5250_v3, %v5228_v45  ;;  %v9559_v48 = vadd.f32 %v5250_v3, %v5229_v1 }
 0xe7c   :  { %v9561_v36 = vadd.f32 %v5250_v3, %v5230_v41  ;;  %v9563_v35 = vadd.f32 %v5250_v3, %v5231_v9  ;;  %v5323_v33 = vsel %vm5283_vm9, %v5263_v20, %v5303_v22  ;;  %v5338_v17 = vmul.f32 %v5318_v19, %v7175_v8 }
 0xe7d   :  { %v5255_v38 = vpop.permute.xlu1 %5254  ;;  %v5343_v53 = vmul.f32 %v5323_v33, %v7175_v8  ;;  %v5322_v13 = vsel %vm5282_vm11, %v5262_v12, %v5302_v26  ;;  %v5337_v50 = vmul.f32 %v5317_v23, %v7173_v7  ;;  %vm5286_vm15 = vcmp.gt.f32.partialorder %v5266_v39, 0.0 }
 0xe7e   :  { %v5272_v5 = vadd.f32 %v5255_v38, %v5232_v24  ;;  %v5273_v30 = vadd.f32 %v5255_v38, %v5233_v47  ;;  %v5274_v32 = vadd.f32 %v5255_v38, %v5234_v11  ;;  %v9570_v14 = vadd.f32 %v5255_v38, %v5235_v46 }
 0xe7f   :  { %v9572_v21 = vadd.f32 %v5255_v38, %v5236_v0  ;;  %v5358_v10 = vpack.c.bf16 %v5343_v53, %v5338_v17  ;;  %v5342_v56 = vmul.f32 %v5322_v13, %v7173_v7  ;;  %v5306_v42 = vmul.f32 0.2, %v5266_v39 }
 0xe80   :  { %v5321_v27 = vsel %vm5281_vm6, %v5261_v34, %v5301_v2  ;;  %vm5279_vm10 = vcmp.gt.f32.partialorder %v9536_v57, 0.0  ;;  %vm5284_vm8 = vcmp.gt.f32.partialorder %v5264_v4, 0.0  ;;  %v5299_v31 = vmul.f32 0.2, %v9536_v57 }
 0xe81   :  { %5379 = vrot.lane.b32.xlu1 %v5358_v10, %s6903_s12  ;;  %v5357_v6 = vpack.c.bf16 %v5342_v56, %v5337_v50  ;;  %v5326_v18 = vsel %vm5286_vm15, %v5266_v39, %v5306_v42  ;;  %v5341_v44 = vmul.f32 %v5321_v27, %v10228_v62  ;;  %v5304_v29 = vmul.f32 0.2, %v5264_v4 }
 0xe82   :  { %v5346_v60 = vmul.f32 %v5326_v18, %v10228_v62  ;;  %v5319_v25 = vsel %vm5279_vm10, %v9536_v57, %v5299_v31  ;;  %vm5280_vm7 = vcmp.gt.f32.partialorder %v9538_v61, 0.0  ;;  %vm5285_vm14 = vcmp.gt.f32.partialorder %v9545_v55, 0.0 }
 0xe83   :  { %5377 = vrot.lane.b32.xlu0 %v5357_v6, %s6903_s12  ;;  %v5324_v34 = vsel %vm5284_vm8, %v5264_v4, %v5304_v29  ;;  %v5339_v58 = vmul.f32 %v5319_v25, %v10226_v51  ;;  %v5300_v43 = vmul.f32 0.2, %v9538_v61  ;;  %v5305_v40 = vmul.f32 0.2, %v9545_v55 }
 0xe84   :  { %v5361_v49 = vpack.c.bf16 %v5346_v60, %v5341_v44  ;;  %v5344_v16 = vmul.f32 %v5324_v34, %v10226_v51  ;;  %vm5287_vm6 = vcmp.gt.f32.partialorder %v5267_v52, 0.0  ;;  %vm5292_vm9 = vcmp.gt.f32.partialorder %v5272_v5, 0.0 }
 0xe85   :  { %v5320_v57 = vsel %vm5280_vm7, %v9538_v61, %v5300_v43  ;;  %v5325_v63 = vsel %vm5285_vm14, %v9545_v55, %v5305_v40  ;;  %v5307_v2 = vmul.f32 0.2, %v5267_v52  ;;  %v5312_v12 = vmul.f32 0.2, %v5272_v5 }
 0xe86   :  { %5385 = vrot.lane.b32.xlu1 %v5361_v49, %s6903_s12  ;;  %v5359_v20 = vpack.c.bf16 %v5344_v16, %v5339_v58  ;;  %v5340_v4 = vmul.f32 %v5320_v57, %v10227_v37  ;;  %v5345_v39 = vmul.f32 %v5325_v63, %v10227_v37  ;;  %vm5288_vm11 = vcmp.gt.f32.partialorder %v5268_v59, 0.0 }
 0xe87   :  { %v5327_v15 = vsel %vm5287_vm6, %v5267_v52, %v5307_v2  ;;  %v5332_v45 = vsel %vm5292_vm9, %v5272_v5, %v5312_v12  ;;  %vm5293_vm15 = vcmp.gt.f32.partialorder %v5273_v30, 0.0  ;;  %v5308_v1 = vmul.f32 0.2, %v5268_v59 }
 0xe88   :  { %5381 = vrot.lane.b32.xlu0 %v5359_v20, %s6903_s12  ;;  %v5360_v41 = vpack.c.bf16 %v5345_v39, %v5340_v4  ;;  %v5347_v61 = vmul.f32 %v5327_v15, %v7173_v7  ;;  %v5352_v55 = vmul.f32 %v5332_v45, %v7173_v7  ;;  %v5313_v9 = vmul.f32 0.2, %v5273_v30 }
 0xe89   :  { %v5328_v22 = vsel %vm5288_vm11, %v5268_v59, %v5308_v1  ;;  %vm5289_vm10 = vcmp.gt.f32.partialorder %v9559_v48, 0.0  ;;  %vm5294_vm8 = vcmp.gt.f32.partialorder %v5274_v32, 0.0  ;;  %v5309_v54 = vmul.f32 0.2, %v9559_v48 }
 0xe8a   :  { %v5362_v3 = vpack.c.bf16 %v5352_v55, %v5347_v61  ;;  %v5333_v19 = vsel %vm5293_vm15, %v5273_v30, %v5313_v9  ;;  %v5348_v26 = vmul.f32 %v5328_v22, %v7175_v8  ;;  %v5314_v23 = vmul.f32 0.2, %v5274_v32 }
 0xe8b   :  { %v5353_v24 = vmul.f32 %v5333_v19, %v7175_v8  ;;  %v5329_v47 = vsel %vm5289_vm10, %v9559_v48, %v5309_v54  ;;  %vm5290_vm7 = vcmp.gt.f32.partialorder %v9561_v36, 0.0  ;;  %vm5295_vm14 = vcmp.gt.f32.partialorder %v9570_v14, 0.0 }
 0xe8c   :  { %5383 = vrot.lane.b32.xlu0 %v5360_v41, %s6903_s12  ;;  %5387 = vrot.lane.b32.xlu1 %v5362_v3, %s6903_s12  ;;  %v5334_v7 = vsel %vm5294_vm8, %v5274_v32, %v5314_v23  ;;  %v5349_v11 = vmul.f32 %v5329_v47, %v10226_v51  ;;  %v5310_v46 = vmul.f32 0.2, %v9561_v36  ;;  %v5315_v0 = vmul.f32 0.2, %v9570_v14 }
 0xe8d   :  { %v5363_v52 = vpack.c.bf16 %v5353_v24, %v5348_v26  ;;  %v5354_v8 = vmul.f32 %v5334_v7, %v10226_v51  ;;  %vm5291_vm6 = vcmp.gt.f32.partialorder %v9563_v35, 0.0  ;;  %vm5296_vm9 = vcmp.gt.f32.partialorder %v9572_v21, 0.0  ;;  %v9827_v24 = vld [vmem:[%s10189_s6] sm:$0xff] }
 0xe8e   :  { %v5330_v59 = vsel %vm5290_vm7, %v9561_v36, %v5310_v46  ;;  %v5335_v48 = vsel %vm5295_vm14, %v9570_v14, %v5315_v0  ;;  %v5311_v33 = vmul.f32 0.2, %v9563_v35  ;;  %v5316_v17 = vmul.f32 0.2, %v9572_v21 }
 0xe8f   :  { %v5364_v38 = vpack.c.bf16 %v5354_v8, %v5349_v11  ;;  %v5350_v53 = vmul.f32 %v5330_v59, %v10227_v37  ;;  %v5355_v13 = vmul.f32 %v5335_v48, %v10227_v37  ;;  %v9831_v47 = vcombine.high %v9827_v24, %v9827_v24 }
 0xe90   :  { %5389 = vrot.lane.b32.xlu0 %v5363_v52, %s6903_s12  ;;  %v5331_v51 = vsel %vm5291_vm6, %v9563_v35, %v5311_v33  ;;  %v5336_v50 = vsel %vm5296_vm9, %v9572_v21, %v5316_v17  ;;  %vm10280_vm11 = vcmask 736256  }
 0xe91   :  { %5391 = vrot.lane.b32.xlu1 %v5364_v38, %s6903_s12  ;;  %v5365_v36 = vpack.c.bf16 %v5355_v13, %v5350_v53  ;;  %v5351_v5 = vmul.f32 %v5331_v51, %v10228_v62  ;;  %v5356_v30 = vmul.f32 %v5336_v50, %v10228_v62  ;;  %6216 = vmatprep.mubr.bf16.mxu1 %v9831_v47  ;;  %vm10281_vm15 = vmmov %vm10280_vm11 }
 0xe92   :  { %6298 = vmatprep.mubr.bf16.mxu0 %v9831_v47  ;;  %vm10286_vm14 = vmmov %vm10280_vm11 }
 0xe93   :  { %v5366_v32 = vpack.c.bf16 %v5356_v30, %v5351_v5  ;;  %vm10287_vm6 = vmmov %vm10280_vm11 }
 0xe94   :  { %5393 = vrot.lane.b32.xlu0 %v5365_v36, %s6903_s12 }
 0xe95   :  { %5395 = vrot.lane.b32.xlu1 %v5366_v32, %s6903_s12 }
 0xef3   :  { %v5380_v14 = vpop.permute.xlu1 %5379 }
 0xef5   :  { %v5378_v37 = vpop.permute.xlu0 %5377 }
 0xef6   :  { %v9627_v10 = vsel %vm1037_vm13, %v5378_v37, %v5380_v14  ;;  %5417 = vst.msk [vmem:[#allocation2] sm:$0xff] %vm1058_vm12, %v5378_v37 }
 0xef7   :  { %5440 = vst [vmem:[#allocation3 + $0x8] sm:$0xff] %v9627_v10  ;;  %6184 = vmatprep.subr.bf16.mxu1 %v9627_v10 }
 0xef8   :  { %v5386_v35 = vpop.permute.xlu1 %5385 }
 0xef9   :  { %5422 = vst.msk [vmem:[#allocation2 + $0x28] sm:$0xff] %vm1037_vm13, %v5386_v35 }
 0xefa   :  { %v5382_v62 = vpop.permute.xlu0 %5381 }
 0xefb   :  { %v5398_v21 = vsel %vm1037_vm13, %v5380_v14, %v5382_v62 }
 0xefc   :  { %5477 = vrot.lane.b32.xlu1 %v5398_v21, %s6894_s25  ;;  %5441 = vst [vmem:[#allocation3 + $0x10] sm:$0xff] %v5398_v21 }
 0xefd   :  { %v5449_v56 = vld [vmem:[#allocation2] sm:$0xff] }
 0xefe   :  { %v5388_v42 = vpop.permute.xlu1 %5387  ;;  %v5384_v27 = vpop.permute.xlu0 %5383  ;;  %5473 = vrot.lane.b32.xlu0 %v5449_v56, %s6894_s25  ;;  %5439 = vst [vmem:[#allocation3] sm:$0xff] %v5449_v56  ;;  %6185 = vmatpush1.bf16.msra.mxu1 %v5449_v56 }
 0xeff   :  { %5423 = vst.msk [vmem:[#allocation2 + $0x30] sm:$0xff] %vm1058_vm12, %v5388_v42  ;;  %v9638_v31 = vsel %vm1037_vm13, %v5382_v62, %v5384_v27  ;;  %v9641_v6 = vsel %vm1037_vm13, %v5384_v27, %v5386_v35  ;;  %vm10278_vm12 = vcmask 744448  }
 0xf00   :  { %5421 = vst [vmem:[#allocation2 + $0x20] sm:$0xff] %v9641_v6  ;;  %5555 = vrot.lane.b32.xlu1 %v5398_v21, %s6895_s26  ;;  %5442 = vst [vmem:[#allocation3 + $0x18] sm:$0xff] %v9638_v31  ;;  %6266 = vmatprep.subr.bf16.mxu0 %v9638_v31  ;;  %v9690_v57 = vld [vmem:[#allocation2 + $0x28] sm:$0xff] }
 0xf01   :  { %6267 = vmatpush1.bf16.msra.mxu0 %v5398_v21  ;;  %vm10282_vm10 = vmmov %vm10278_vm12 }
 0xf02   :  { %v5390_v18 = vpop.permute.xlu0 %5389  ;;  %5551 = vrot.lane.b32.xlu0 %v5449_v56, %s6895_s26  ;;  %vm10283_vm8 = vmmov %vm10282_vm10 }
 0xf03   :  { %v5392_v44 = vpop.permute.xlu1 %5391  ;;  %v9649_v29 = vsel %vm1037_vm13, %v5388_v42, %v5390_v18 }
 0xf04   :  { %v9652_v60 = vsel %vm1037_vm13, %v5390_v18, %v5392_v44  ;;  %5633 = vrot.lane.b32.xlu1 %v5398_v21, %s6896_s27  ;;  %5445 = vst [vmem:[#allocation3 + $0x30] sm:$0xff] %v9649_v29  ;;  %6186 = vmatprep.subr.bf16.mxu1 %v9649_v29 }
 0xf05   :  { %5446 = vst [vmem:[#allocation3 + $0x38] sm:$0xff] %v9652_v60 }
 0xf06   :  { %v5394_v25 = vpop.permute.xlu0 %5393  ;;  %5629 = vrot.lane.b32.xlu0 %v5449_v56, %s6896_s27  ;;  %v5434_v34 = vld [vmem:[#allocation2 + $0x30] sm:$0xff] }
 0xf07   :  { %v5396_v58 = vpop.permute.xlu1 %5395  ;;  %v9660_v43 = vsel %vm1037_vm13, %v5392_v44, %v5394_v25  ;;  %5444 = vst [vmem:[#allocation3 + $0x28] sm:$0xff] %v5434_v34  ;;  %6187 = vmatpush1.bf16.msra.mxu1 %v5434_v34  ;;  %v9662_v40 = vld [vmem:[#allocation2 + $0x20] sm:$0xff] }
 0xf08   :  { %5428 = vst.msk [vmem:[#allocation2 + $0x58] sm:$0xff] %vm1037_vm13, %v5396_v58  ;;  %v9666_v49 = vsel %vm1037_vm13, %v5394_v25, %v5396_v58  ;;  %5711 = vrot.lane.b32.xlu1 %v5398_v21, %s6897_s28  ;;  %5447 = vst [vmem:[#allocation3 + $0x40] sm:$0xff] %v9660_v43  ;;  %6268 = vmatprep.subr.bf16.mxu0 %v9660_v43 }
 0xf09   :  { %5443 = vst [vmem:[#allocation3 + $0x20] sm:$0xff] %v9662_v40  ;;  %5427 = vst [vmem:[#allocation2 + $0x50] sm:$0xff] %v9666_v49  ;;  %6269 = vmatpush1.bf16.msra.mxu0 %v9652_v60 }
 0xf0a   :  { %5707 = vrot.lane.b32.xlu0 %v5449_v56, %s6897_s28  ;;  %vm10279_vm13 = vmmov %vm10278_vm12 }
 0xf0c   :  { %5479 = vrot.lane.b32.xlu1 %v9638_v31, %s6894_s25 }
 0xf0e   :  { %5785 = vrot.lane.b32.xlu0 %v5449_v56, %s6898_s29 }
 0xf0f   :  { %v9736_v63 = vld [vmem:[#allocation2 + $0x58] sm:$0xff] }
 0xf10   :  { %5789 = vrot.lane.b32.xlu1 %v5398_v21, %s6898_s29  ;;  %v9679_v16 = vld [vmem:[#allocation2 + $0x50] sm:$0xff] }
 0xf11   :  { %5448 = vst [vmem:[#allocation3 + $0x48] sm:$0xff] %v9679_v16 }
 0xf12   :  { %5863 = vrot.lane.b32.xlu0 %v5449_v56, %s6899_s30 }
 0xf14   :  { %5557 = vrot.lane.b32.xlu1 %v9638_v31, %s6895_s26 }
 0xf16   :  { %5941 = vrot.lane.b32.xlu0 %v5449_v56, %s6900_s0 }
 0xf18   :  { %5867 = vrot.lane.b32.xlu1 %v5398_v21, %s6899_s30 }
 0xf1a   :  { %6019 = vrot.lane.b32.xlu0 %v5449_v56, %s6901_s19 }
 0xf1c   :  { %5635 = vrot.lane.b32.xlu1 %v9638_v31, %s6896_s27 }
 0xf1e   :  { %5717 = vrot.lane.b32.xlu0 %v9690_v57, %s6897_s28 }
 0xf20   :  { %5945 = vrot.lane.b32.xlu1 %v5398_v21, %s6900_s0 }
 0xf22   :  { %5475 = vrot.lane.b32.xlu0 %v9627_v10, %s6894_s25 }
 0xf24   :  { %5713 = vrot.lane.b32.xlu1 %v9638_v31, %s6897_s28 }
 0xf26   :  { %5553 = vrot.lane.b32.xlu0 %v9627_v10, %s6895_s26 }
 0xf28   :  { %6023 = vrot.lane.b32.xlu1 %v5398_v21, %s6901_s19 }
 0xf2a   :  { %5631 = vrot.lane.b32.xlu0 %v9627_v10, %s6896_s27 }
 0xf2c   :  { %5793 = vrot.lane.b32.xlu1 %v9641_v6, %s6898_s29 }
 0xf2e   :  { %5709 = vrot.lane.b32.xlu0 %v9627_v10, %s6897_s28 }
 0xf30   :  { %5869 = vrot.lane.b32.xlu1 %v9638_v31, %s6899_s30 }
 0xf32   :  { %5481 = vrot.lane.b32.xlu0 %v9641_v6, %s6894_s25 }
 0xf34   :  { %5485 = vrot.lane.b32.xlu1 %v5434_v34, %s6894_s25 }
 0xf36   :  { %5787 = vrot.lane.b32.xlu0 %v9627_v10, %s6898_s29 }
 0xf38   :  { %5563 = vrot.lane.b32.xlu1 %v5434_v34, %s6895_s26 }
 0xf3a   :  { %5559 = vrot.lane.b32.xlu0 %v9641_v6, %s6895_s26 }
 0xf3c   :  { %5641 = vrot.lane.b32.xlu1 %v5434_v34, %s6896_s27 }
 0xf3e   :  { %5865 = vrot.lane.b32.xlu0 %v9627_v10, %s6899_s30 }
 0xf40   :  { %5719 = vrot.lane.b32.xlu1 %v5434_v34, %s6897_s28 }
 0xf42   :  { %5637 = vrot.lane.b32.xlu0 %v9641_v6, %s6896_s27 }
 0xf44   :  { %5797 = vrot.lane.b32.xlu1 %v5434_v34, %s6898_s29 }
 0xf46   :  { %5943 = vrot.lane.b32.xlu0 %v9627_v10, %s6900_s0 }
 0xf48   :  { %5875 = vrot.lane.b32.xlu1 %v5434_v34, %s6899_s30 }
 0xf4a   :  { %5715 = vrot.lane.b32.xlu0 %v9641_v6, %s6897_s28 }
 0xf4c   :  { %5953 = vrot.lane.b32.xlu1 %v5434_v34, %s6900_s0 }
 0xf4e   :  { %6021 = vrot.lane.b32.xlu0 %v9627_v10, %s6901_s19 }
 0xf50   :  { %6031 = vrot.lane.b32.xlu1 %v5434_v34, %s6901_s19 }
 0xf52   :  { %5791 = vrot.lane.b32.xlu0 %v9638_v31, %s6898_s29 }
 0xf54   :  { %5729 = vrot.lane.b32.xlu1 %v9736_v63, %s6897_s28 }
 0xf56   :  { %5871 = vrot.lane.b32.xlu0 %v9641_v6, %s6899_s30 }
 0xf58   :  { %5487 = vrot.lane.b32.xlu1 %v9649_v29, %s6894_s25 }
 0xf5a   :  { %5489 = vrot.lane.b32.xlu0 %v9652_v60, %s6894_s25 }
 0xf5c   :  { %5483 = vrot.lane.b32.xlu1 %v9690_v57, %s6894_s25 }
 0xf5e   :  { %5795 = vrot.lane.b32.xlu0 %v9690_v57, %s6898_s29 }
 0xf60   :  { %5565 = vrot.lane.b32.xlu1 %v9649_v29, %s6895_s26 }
 0xf62   :  { %5567 = vrot.lane.b32.xlu0 %v9652_v60, %s6895_s26 }
 0xf64   :  { %5949 = vrot.lane.b32.xlu1 %v9641_v6, %s6900_s0 }
 0xf66   :  { %5947 = vrot.lane.b32.xlu0 %v9638_v31, %s6900_s0 }
 0xf68   :  { %5643 = vrot.lane.b32.xlu1 %v9649_v29, %s6896_s27 }
 0xf6a   :  { %5645 = vrot.lane.b32.xlu0 %v9652_v60, %s6896_s27 }
 0xf6c   :  { %5495 = vrot.lane.b32.xlu1 %v9736_v63, %s6894_s25 }
 0xf6e   :  { %5807 = vrot.lane.b32.xlu0 %v9736_v63, %s6898_s29  ;;  %v5478_v2 = vpop.permute.xlu1 %5477 }
 0xf70   :  { %v5474_v12 = vpop.permute.xlu0 %5473  ;;  %5721 = vrot.lane.b32.xlu1 %v9649_v29, %s6897_s28 }
 0xf72   :  { %5723 = vrot.lane.b32.xlu0 %v9652_v60, %s6897_s28  ;;  %v5556_v20 = vpop.permute.xlu1 %5555 }
 0xf74   :  { %v5552_v4 = vpop.permute.xlu0 %5551  ;;  %5493 = vrot.lane.b32.xlu1 %v9666_v49, %s6894_s25 }
 0xf76   :  { %5491 = vrot.lane.b32.xlu0 %v9660_v43, %s6894_s25  ;;  %v5634_v39 = vpop.permute.xlu1 %5633 }
 0xf78   :  { %v5630_v15 = vpop.permute.xlu0 %5629  ;;  %5799 = vrot.lane.b32.xlu1 %v9649_v29, %s6898_s29 }
 0xf7a   :  { %5801 = vrot.lane.b32.xlu0 %v9652_v60, %s6898_s29  ;;  %v9778_v45 = vpop.permute.xlu1 %5711 }
 0xf7c   :  { %v5708_v1 = vpop.permute.xlu0 %5707  ;;  %5571 = vrot.lane.b32.xlu1 %v9666_v49, %s6895_s26 }
 0xf7e   :  { %5569 = vrot.lane.b32.xlu0 %v9660_v43, %s6895_s26  ;;  %v9784_v41 = vpop.permute.xlu1 %5479 }
 0xf7f   :  { %v9788_v61 = vsel %vm124_vm0, %v5478_v2, %v9784_v41 }
 0xf80   :  { %v9790_v55 = vpop.permute.xlu0 %5785  ;;  %5519 = vst [vmem:[#allocation3 + $0x60] sm:$0xff] %v9788_v61  ;;  %5877 = vrot.lane.b32.xlu1 %v9649_v29, %s6899_s30 }
 0xf82   :  { %5879 = vrot.lane.b32.xlu0 %v9652_v60, %s6899_s30  ;;  %v9797_v9 = vpop.permute.xlu1 %5789 }
 0xf84   :  { %v9799_v22 = vpop.permute.xlu0 %5863  ;;  %5649 = vrot.lane.b32.xlu1 %v9666_v49, %s6896_s27 }
 0xf86   :  { %5647 = vrot.lane.b32.xlu0 %v9660_v43, %s6896_s27  ;;  %v9805_v54 = vpop.permute.xlu1 %5557 }
 0xf87   :  { %v9809_v3 = vsel %vm170_vm1, %v5556_v20, %v9805_v54 }
 0xf88   :  { %v9811_v19 = vpop.permute.xlu0 %5941  ;;  %5597 = vst [vmem:[#allocation3 + $0xb0] sm:$0xff] %v9809_v3  ;;  %5955 = vrot.lane.b32.xlu1 %v9649_v29, %s6900_s0 }
 0xf8a   :  { %5957 = vrot.lane.b32.xlu0 %v9652_v60, %s6900_s0  ;;  %v9818_v26 = vpop.permute.xlu1 %5867 }
 0xf8c   :  { %v9820_v23 = vpop.permute.xlu0 %6019  ;;  %5727 = vrot.lane.b32.xlu1 %v9666_v49, %s6897_s28 }
 0xf8e   :  { %5725 = vrot.lane.b32.xlu0 %v9660_v43, %s6897_s28  ;;  %v9835_v7 = vpop.permute.xlu1 %5635 }
 0xf8f   :  { %v9839_v11 = vsel %vm216_vm2, %v5634_v39, %v9835_v7 }
 0xf90   :  { %v9843_v46 = vpop.permute.xlu0 %5717  ;;  %6033 = vrot.lane.b32.xlu1 %v9649_v29, %s6901_s19 }
 0xf92   :  { %6035 = vrot.lane.b32.xlu0 %v9652_v60, %s6901_s19  ;;  %v9849_v0 = vpop.permute.xlu1 %5945 }
 0xf94   :  { %v5476_v52 = vpop.permute.xlu0 %5475  ;;  %5803 = vrot.lane.b32.xlu1 %v9660_v43, %s6898_s29 }
 0xf95   :  { %v5497_v8 = vsel %vm124_vm0, %v5474_v12, %v5476_v52  ;;  %v5498_v59 = vsel %vm124_vm0, %v5476_v52, %v5478_v2 }
 0xf96   :  { %5517 = vst [vmem:[#allocation3 + $0x50] sm:$0xff] %v5497_v8  ;;  %5518 = vst [vmem:[#allocation3 + $0x58] sm:$0xff] %v5498_v59  ;;  %5805 = vrot.lane.b32.xlu0 %v9666_v49, %s6898_s29  ;;  %v9857_v48 = vpop.permute.xlu1 %5713  ;;  %6188 = vmatprep.subr.bf16.mxu1 %v5498_v59 }
 0xf97   :  { %v9862_v33 = vsel %vm262_vm3, %v9778_v45, %v9857_v48  ;;  %6189 = vmatpush1.bf16.msra.mxu1 %v5497_v8 }
 0xf98   :  { %v5554_v17 = vpop.permute.xlu0 %5553  ;;  %5561 = vrot.lane.b32.xlu1 %v9690_v57, %s6895_s26 }
 0xf99   :  { %v9867_v38 = vsel %vm170_vm1, %v5552_v4, %v5554_v17  ;;  %v9870_v53 = vsel %vm170_vm1, %v5554_v17, %v5556_v20 }
 0xf9a   :  { %5595 = vst [vmem:[#allocation3 + $0xa0] sm:$0xff] %v9867_v38  ;;  %5596 = vst [vmem:[#allocation3 + $0xa8] sm:$0xff] %v9870_v53  ;;  %5873 = vrot.lane.b32.xlu0 %v9690_v57, %s6899_s30  ;;  %v9876_v13 = vpop.permute.xlu1 %6023 }
 0xf9c   :  { %v5632_v51 = vpop.permute.xlu0 %5631  ;;  %5883 = vrot.lane.b32.xlu1 %v9666_v49, %s6899_s30 }
 0xf9d   :  { %v9881_v50 = vsel %vm216_vm2, %v5630_v15, %v5632_v51  ;;  %v9884_v36 = vsel %vm216_vm2, %v5632_v51, %v5634_v39  ;;  %v6165_v39 = vld [vmem:[%s10190_s7] sm:$0xff] }
 0xf9e   :  { %5881 = vrot.lane.b32.xlu0 %v9660_v43, %s6899_s30  ;;  %v9888_v5 = vpop.permute.xlu1 %5793 }
 0xfa0   :  { %v5710_v30 = vpop.permute.xlu0 %5709  ;;  %5573 = vrot.lane.b32.xlu1 %v9736_v63, %s6895_s26 }
 0xfa1   :  { %v9893_v32 = vsel %vm262_vm3, %v5708_v1, %v5710_v30  ;;  %v9897_v14 = vsel %vm262_vm3, %v5710_v30, %v9778_v45 }
 0xfa2   :  { %5885 = vrot.lane.b32.xlu0 %v9736_v63, %s6899_s30  ;;  %v5870_v37 = vpop.permute.xlu1 %5869 }
 0xfa3   :  { %v9903_v10 = vsel %vm354_vm5, %v9818_v26, %v5870_v37 }
 0xfa4   :  { %v5482_v35 = vpop.permute.xlu0 %5481  ;;  %5961 = vrot.lane.b32.xlu1 %v9666_v49, %s6900_s0 }
 0xfa5   :  { %v5500_v62 = vsel %vm124_vm0, %v9784_v41, %v5482_v35 }
 0xfa6   :  { %5520 = vst [vmem:[#allocation3 + $0x68] sm:$0xff] %v5500_v62  ;;  %5959 = vrot.lane.b32.xlu0 %v9660_v43, %s6900_s0  ;;  %v5486_v21 = vpop.permute.xlu1 %5485  ;;  %6270 = vmatprep.subr.bf16.mxu0 %v5500_v62 }
 0xfa7   :  { %6271 = vmatpush1.bf16.msra.mxu0 %v9788_v61 }
 0xfa8   :  { %v5788_v56 = vpop.permute.xlu0 %5787  ;;  %6027 = vrot.lane.b32.xlu1 %v9641_v6, %s6901_s19 }
 0xfa9   :  { %v9916_v42 = vsel %vm308_vm4, %v9790_v55, %v5788_v56  ;;  %v9920_v27 = vsel %vm308_vm4, %v5788_v56, %v9797_v9 }
 0xfaa   :  { %6025 = vrot.lane.b32.xlu0 %v9638_v31, %s6901_s19  ;;  %v5564_v18 = vpop.permute.xlu1 %5563 }
 0xfac   :  { %v9924_v44 = vpop.permute.xlu0 %5559  ;;  %5639 = vrot.lane.b32.xlu1 %v9690_v57, %s6896_s27 }
 0xfad   :  { %v9931_v6 = vsel %vm170_vm1, %v9805_v54, %v9924_v44 }
 0xfae   :  { %5598 = vst [vmem:[#allocation3 + $0xb8] sm:$0xff] %v9931_v6  ;;  %5951 = vrot.lane.b32.xlu0 %v9690_v57, %s6900_s0  ;;  %v5642_v29 = vpop.permute.xlu1 %5641 }
 0xfb0   :  { %v5866_v60 = vpop.permute.xlu0 %5865  ;;  %6039 = vrot.lane.b32.xlu1 %v9666_v49, %s6901_s19 }
 0xfb1   :  { %v9940_v31 = vsel %vm354_vm5, %v9799_v22, %v5866_v60  ;;  %v9944_v25 = vsel %vm354_vm5, %v5866_v60, %v9818_v26 }
 0xfb2   :  { %6037 = vrot.lane.b32.xlu0 %v9660_v43, %s6901_s19  ;;  %v9948_v34 = vpop.permute.xlu1 %5719 }
 0xfb4   :  { %v9950_v58 = vpop.permute.xlu0 %5637  ;;  %5651 = vrot.lane.b32.xlu1 %v9736_v63, %s6896_s27 }
 0xfb5   :  { %v9957_v49 = vsel %vm216_vm2, %v9835_v7, %v9950_v58 }
 0xfb6   :  { %5963 = vrot.lane.b32.xlu0 %v9736_v63, %s6900_s0  ;;  %v9961_v2 = vpop.permute.xlu1 %5797 }
 0xfb8   :  { %v5944_v12 = vpop.permute.xlu0 %5943  ;;  %6041 = vrot.lane.b32.xlu1 %v9736_v63, %s6901_s19 }
 0xfb9   :  { %v9967_v43 = vsel %vm10278_vm12, %v9811_v19, %v5944_v12  ;;  %v9971_v20 = vsel %vm10279_vm13, %v5944_v12, %v9849_v0 }
 0xfba   :  { %6029 = vrot.lane.b32.xlu0 %v9690_v57, %s6901_s19  ;;  %v9975_v4 = vpop.permute.xlu1 %5875 }
 0xfbc   :  { %v5716_v15 = vpop.permute.xlu0 %5715 }
 0xfbd   :  { %v9982_v63 = vsel %vm262_vm3, %v9857_v48, %v5716_v15  ;;  %v9986_v45 = vsel %vm262_vm3, %v5716_v15, %v9843_v46 }
 0xfbe   :  { %6168 = vperm.xlu0 %6801, %v6165_v39   ;;  %v9988_v1 = vpop.permute.xlu1 %5953 }
 0xfc0   :  { %v6022_v41 = vpop.permute.xlu0 %6021 }
 0xfc1   :  { %v9992_v57 = vsel %vm10280_vm11, %v9820_v23, %v6022_v41  ;;  %v9996_v61 = vsel %vm10281_vm15, %v6022_v41, %v9876_v13 }
 0xfc2   :  { %v9998_v55 = vpop.permute.xlu1 %6031 }
 0xfc4   :  { %v5792_v22 = vpop.permute.xlu0 %5791 }
 0xfc5   :  { %v10002_v54 = vsel %vm308_vm4, %v9797_v9, %v5792_v22  ;;  %v10006_v19 = vsel %vm308_vm4, %v5792_v22, %v9888_v5 }
 0xfc6   :  { %v10008_v26 = vpop.permute.xlu1 %5729 }
 0xfc8   :  { %v10010_v7 = vpop.permute.xlu0 %5871 }
 0xfc9   :  { %v10014_v23 = vsel %vm354_vm5, %v5870_v37, %v10010_v7 }
 0xfca   :  { %v5488_v46 = vpop.permute.xlu1 %5487 }
 0xfcb   :  { %v5502_v52 = vsel %vm124_vm0, %v5486_v21, %v5488_v46 }
 0xfcc   :  { %v5490_v8 = vpop.permute.xlu0 %5489  ;;  %5522 = vst [vmem:[#allocation3 + $0x78] sm:$0xff] %v5502_v52 }
 0xfcd   :  { %v5503_v9 = vsel %vm124_vm0, %v5488_v46, %v5490_v8 }
 0xfce   :  { %5523 = vst [vmem:[#allocation3 + $0x80] sm:$0xff] %v5503_v9  ;;  %v5484_v59 = vpop.permute.xlu1 %5483  ;;  %6190 = vmatprep.subr.bf16.mxu1 %v5503_v9 }
 0xfcf   :  { %v10019_v48 = vsel %vm124_vm0, %v5482_v35, %v5484_v59  ;;  %6191 = vmatpush1.bf16.msra.mxu1 %v5502_v52 }
 0xfd0   :  { %v5796_v17 = vpop.permute.xlu0 %5795  ;;  %5521 = vst [vmem:[#allocation3 + $0x70] sm:$0xff] %v10019_v48  ;;  %6192 = vmatprep.subr.bf16.mxu1 %v9870_v53 }
 0xfd1   :  { %v10025_v51 = vsel %vm308_vm4, %v9888_v5, %v5796_v17 }
 0xfd2   :  { %v5566_v30 = vpop.permute.xlu1 %5565 }
 0xfd3   :  { %v5580_v37 = vsel %vm170_vm1, %v5564_v18, %v5566_v30  ;;  %6193 = vmatpush1.bf16.msra.mxu1 %v9867_v38 }
 0xfd4   :  { %v5568_v62 = vpop.permute.xlu0 %5567 }
 0xfd5   :  { %v5581_v21 = vsel %vm170_vm1, %v5566_v30, %v5568_v62 }
 0xfd6   :  { %v10030_v35 = vpop.permute.xlu1 %5949  ;;  %6194 = vmatprep.subr.bf16.mxu1 %v5581_v21 }
 0xfd7   :  { %6195 = vmatpush1.bf16.msra.mxu1 %v5580_v37 }
 0xfd8   :  { %v5948_v56 = vpop.permute.xlu0 %5947  ;;  %6196 = vmatprep.subr.bf16.mxu1 %v9884_v36 }
 0xfd9   :  { %v10035_v53 = vsel %vm10282_vm10, %v9849_v0, %v5948_v56  ;;  %v10039_v5 = vsel %vm10283_vm8, %v5948_v56, %v10030_v35  ;;  %v10095_v56 = vcombine.low %v9827_v24, %v9827_v24 }
 0xfda   :  { %v5644_v18 = vpop.permute.xlu1 %5643 }
 0xfdb   :  { %v5658_v38 = vsel %vm216_vm2, %v5642_v29, %v5644_v18  ;;  %6197 = vmatpush1.bf16.msra.mxu1 %v9881_v50 }
 0xfdc   :  { %v5646_v60 = vpop.permute.xlu0 %5645 }
 0xfdd   :  { %v5659_v12 = vsel %vm216_vm2, %v5644_v18, %v5646_v60 }
 0xfde   :  { %v5496_v39 = vpop.permute.xlu1 %5495  ;;  %6198 = vmatprep.subr.bf16.mxu1 %v5659_v12 }
 0xfdf   :  { %6199 = vmatpush1.bf16.msra.mxu1 %v5658_v38 }
 0xfe0   :  { %v10044_v36 = vpop.permute.xlu0 %5807  ;;  %6200 = vmatprep.subr.bf16.mxu1 %v9897_v14 }
 0xfe2   :  { %v5722_v0 = vpop.permute.xlu1 %5721 }
 0xfe3   :  { %v5736_v15 = vsel %vm262_vm3, %v9948_v34, %v5722_v0  ;;  %6201 = vmatpush1.bf16.msra.mxu1 %v9893_v32 }
 0xfe4   :  { %v5724_v41 = vpop.permute.xlu0 %5723 }
 0xfe5   :  { %v5737_v29 = vsel %vm262_vm3, %v5722_v0, %v5724_v41 }
 0xfe6   :  { %v5494_v50 = vpop.permute.xlu1 %5493  ;;  %6202 = vmatprep.subr.bf16.mxu1 %v5737_v29 }
 0xfe7   :  { %v10052_v22 = vsel %vm124_vm0, %v5494_v50, %v5496_v39  ;;  %6203 = vmatpush1.bf16.msra.mxu1 %v5736_v15  ;;  %v10122_v39 = vld [vmem:[%s10189_s6 + $0x8] ss:$0 sps:$4 sm:$0xff]   ;;  %s6906_s6 = smov [#allocation4]  }
 0xfe8   :  { %v5492_v46 = vpop.permute.xlu0 %5491  ;;  %5526 = vst [vmem:[#allocation3 + $0x98] sm:$0xff] %v10052_v22  ;;  %6204 = vmatprep.subr.bf16.mxu1 %v9920_v27  ;;  %s6439_s28 = sshll.u32 %s6906_s6, 4  ;;  %s6440_s28 = int_to_ptr.vmem [resolvable:$true] %s6439_s28 }
 0xfe9   :  { %v5504_v14 = vsel %vm124_vm0, %v5490_v8, %v5492_v46  ;;  %v5505_v34 = vsel %vm124_vm0, %v5492_v46, %v5494_v50  ;;  %vm10284_vm0 = vmmov %vm10283_vm8  ;;  %s6870_s29 = scalar_lea.vmem %s6440_s28, 640  ;;  %p6875_p1 = scmp.lt.s32.totalorder %s6440_s28, %s6440_s28 }
 0xfea   :  { %5524 = vst [vmem:[#allocation3 + $0x88] sm:$0xff] %v5504_v14  ;;  %5525 = vst [vmem:[#allocation3 + $0x90] sm:$0xff] %v5505_v34  ;;  %v5800_v32 = vpop.permute.xlu1 %5799  ;;  %6272 = vmatprep.subr.bf16.mxu0 %v5505_v34  ;;  %p6871_p0 = scmp.ne.s32.totalorder %s6440_s28, %s6870_s29  ;;  %p6876_p2 = scmp.lt.s32.totalorder %s6870_s29, %s6870_s29 }
 0xfeb   :  { %v5814_v52 = vsel %vm308_vm4, %v9961_v2, %v5800_v32  ;;  %6205 = vmatpush1.bf16.msra.mxu1 %v9916_v42  ;;  %6273 = vmatpush1.bf16.msra.mxu0 %v5504_v14  ;;  %vm10285_vm7 = vmmov %vm10284_vm0 }
 0xfec   :  { %v5802_v9 = vpop.permute.xlu0 %5801  ;;  %6274 = vmatprep.subr.bf16.mxu0 %v9931_v6  ;;  %vm10293_vm12 = vmmov %vm10284_vm0  ;;  %p6877_p3 = por %p6876_p2, %p6875_p1 }
 0xfed   :  { %v5815_v59 = vsel %vm308_vm4, %v5800_v32, %v5802_v9  ;;  %vm10296_vm15 = vmmov %vm10284_vm0 }
 0xfee   :  { %v10063_v27 = vpop.permute.xlu1 %5571  ;;  %6206 = vmatprep.subr.bf16.mxu1 %v5815_v59  ;;  %p6878_p4 = pnand %p6877_p3, %p6871_p0 }
 0xfef   :  { %6207 = vmatpush1.bf16.msra.mxu1 %v5814_v52  ;;  %6275 = vmatpush1.bf16.msra.mxu0 %v9809_v3 }
 0xff0   :  { %v5570_v8 = vpop.permute.xlu0 %5569  ;;  %6208 = vmatprep.subr.bf16.mxu1 %v9944_v25 }
 0xff1   :  { %v5582_v17 = vsel %vm170_vm1, %v5568_v62, %v5570_v8  ;;  %v5583_v42 = vsel %vm170_vm1, %v5570_v8, %v10063_v27 }
 0xff2   :  { %v5878_v2 = vpop.permute.xlu1 %5877  ;;  %6276 = vmatprep.subr.bf16.mxu0 %v5583_v42 }
 0xff3   :  { %v5892_v6 = vsel %vm354_vm5, %v9975_v4, %v5878_v2  ;;  %6209 = vmatpush1.bf16.msra.mxu1 %v9940_v31  ;;  %6277 = vmatpush1.bf16.msra.mxu0 %v5582_v17 }
 0xff4   :  { %v10073_v30 = vpop.permute.xlu0 %5879  ;;  %6278 = vmatprep.subr.bf16.mxu0 %v9957_v49 }
 0xff5   :  { %v5893_v3 = vsel %vm354_vm5, %v5878_v2, %v10073_v30 }
 0xff6   :  { %v10078_v25 = vpop.permute.xlu1 %5649  ;;  %6210 = vmatprep.subr.bf16.mxu1 %v5893_v3 }
 0xff7   :  { %6211 = vmatpush1.bf16.msra.mxu1 %v5892_v6  ;;  %6279 = vmatpush1.bf16.msra.mxu0 %v9839_v11 }
 0xff8   :  { %v5648_v37 = vpop.permute.xlu0 %5647  ;;  %6212 = vmatprep.subr.bf16.mxu1 %v9971_v20 }
 0xff9   :  { %v5660_v4 = vsel %vm216_vm2, %v5646_v60, %v5648_v37  ;;  %v5661_v31 = vsel %vm216_vm2, %v5648_v37, %v10078_v25 }
 0xffa   :  { %v5956_v62 = vpop.permute.xlu1 %5955  ;;  %6280 = vmatprep.subr.bf16.mxu0 %v5661_v31 }
 0xffb   :  { %v5970_v49 = vsel %vm10284_vm0, %v9988_v1, %v5956_v62  ;;  %6213 = vmatpush1.bf16.msra.mxu1 %v9967_v43  ;;  %6281 = vmatpush1.bf16.msra.mxu0 %v5660_v4 }
 0xffc   :  { %v10088_v21 = vpop.permute.xlu0 %5957  ;;  %6282 = vmatprep.subr.bf16.mxu0 %v9982_v63 }
 0xffd   :  { %v5971_v11 = vsel %vm10285_vm7, %v5956_v62, %v10088_v21 }
 0xffe   :  { %v5728_v20 = vpop.permute.xlu1 %5727  ;;  %6214 = vmatprep.subr.bf16.mxu1 %v5971_v11 }
 0xfff   :  { %v5740_v18 = vsel %vm262_vm3, %v5728_v20, %v10008_v26  ;;  %6215 = vmatpush1.bf16.msra.mxu1 %v5970_v49  ;;  %6283 = vmatpush1.bf16.msra.mxu0 %v9862_v33 }
0x1000   :  { %v5726_v43 = vpop.permute.xlu0 %5725  ;;  %6225 = vmatprep.subr.bf16.mxu1 %v9996_v61 }
0x1001   :  { %v5738_v63 = vsel %vm262_vm3, %v5724_v41, %v5726_v43  ;;  %v5739_v1 = vsel %vm262_vm3, %v5726_v43, %v5728_v20  ;;  %vm10288_vm3 = vcmask 261120  }
0x1002   :  { %v6034_v38 = vpop.permute.xlu1 %6033  ;;  %6217 = vmatmul.mubr.bf16.vlgmr.msra.gmra.mrb[52].mxu1 %v10095_v56  ;;  %6284 = vmatprep.subr.bf16.mxu0 %v5739_v1  ;;  %vm10297_vm10 = vmmov %vm10288_vm3 }
0x1003   :  { %v6048_v24 = vsel %vm10286_vm14, %v9998_v55, %v6034_v38  ;;  %6226 = vmatpush1.bf16.msra.mxu1 %v9992_v57  ;;  %6285 = vmatpush1.bf16.msra.mxu0 %v5738_v63 }
0x1004   :  { %v10107_v26 = vpop.permute.xlu0 %6035  ;;  %6286 = vmatprep.subr.bf16.mxu0 %v10006_v19  ;;  %6257 = vmatprep.mubr.bf16.mxu1 %v10216_v28 }
0x1005   :  { %v6049_v33 = vsel %vm10287_vm6, %v6034_v38, %v10107_v26 }
0x1006   :  { %v5804_v61 = vpop.permute.xlu1 %5803  ;;  %6227 = vmatprep.subr.bf16.mxu1 %v6049_v33 }
0x1007   :  { %v5816_v60 = vsel %vm308_vm4, %v5802_v9, %v5804_v61  ;;  %6228 = vmatpush1.bf16.msra.mxu1 %v6048_v24  ;;  %6287 = vmatpush1.bf16.msra.mxu0 %v10002_v54 }
0x1008   :  { %v5806_v55 = vpop.permute.xlu0 %5805  ;;  %6655 = vmatprep.subr.bf16.mxu1 %v9986_v45 }
0x1009   :  { %v5818_v57 = vsel %vm308_vm4, %v5806_v55, %v10044_v36  ;;  %v5817_v19 = vsel %vm308_vm4, %v5804_v61, %v5806_v55  ;;  %vm10289_vm4 = vmmov %vm10284_vm0 }
0x100a   :  { %v5562_v12 = vpop.permute.xlu1 %5561  ;;  %6288 = vmatprep.subr.bf16.mxu0 %v5817_v19 }
0x100b   :  { %v5579_v0 = vsel %vm170_vm1, %v9924_v44, %v5562_v12  ;;  %6289 = vmatpush1.bf16.msra.mxu0 %v5816_v60 }
0x100c   :  { %v5874_v54 = vpop.permute.xlu0 %5873  ;;  %5599 = vst [vmem:[#allocation3 + $0xc0] sm:$0xff] %v5579_v0  ;;  %6290 = vmatprep.subr.bf16.mxu0 %v10014_v23 }
0x100d   :  { %v5891_v45 = vsel %vm354_vm5, %v10010_v7, %v5874_v54 }
0x100e   :  { %v5884_v36 = vpop.permute.xlu1 %5883  ;;  %6549 = vmatmul.mubr.msk.bf16.vlgmr.msra.gmra.mrb[52].mxu1 %vm10288_vm3, %v10122_v39 }
0x100f   :  { %6656 = vmatpush3.bf16.msra.mxu1 %v9662_v40  ;;  %6291 = vmatpush1.bf16.msra.mxu0 %v9903_v10 }
0x1010   :  { %v5882_v15 = vpop.permute.xlu0 %5881  ;;  %6657 = vmatprep.subr.bf16.mxu1 %v5740_v18  ;;  %6380 = vmatprep.mubr.bf16.mxu1 %v9831_v47 }
0x1011   :  { %v5894_v44 = vsel %vm354_vm5, %v10073_v30, %v5882_v15  ;;  %v5895_v23 = vsel %vm354_vm5, %v5882_v15, %v5884_v36 }
0x1012   :  { %v5574_v41 = vpop.permute.xlu1 %5573  ;;  %6292 = vmatprep.subr.bf16.mxu0 %v5895_v23 }
0x1013   :  { %v5584_v7 = vsel %vm170_vm1, %v10063_v27, %v5574_v41  ;;  %6658 = vmatpush3.bf16.msra.mxu1 %v9679_v16  ;;  %6293 = vmatpush1.bf16.msra.mxu0 %v5894_v44  ;;  %vm10290_vm1 = vmmov %vm10284_vm0  ;;  %v6904_v27 = vmov 0.0   ;;  %vm6905_vm0 = vmmov 0  }
0x1014   :  { %v5886_v40 = vpop.permute.xlu0 %5885  ;;  %6659 = vmatprep.subr.bf16.mxu1 %v10025_v51  ;;  %6294 = vmatprep.subr.bf16.mxu0 %v10039_v5 }
0x1015   :  { %v5896_v47 = vsel %vm354_vm5, %v5884_v36, %v5886_v40  ;;  %vm10291_vm5 = vmmov %vm10287_vm6 }
0x1016   :  { %v5962_v10 = vpop.permute.xlu1 %5961  ;;  %vm10292_vm9 = vmmov %vm10291_vm5 }
0x1017   :  { %6660 = vmatpush3.bf16.msra.mxu1 %v10019_v48  ;;  %6295 = vmatpush1.bf16.msra.mxu0 %v10035_v53  ;;  %vm10294_vm13 = vmmov %vm10291_vm5 }
0x1018   :  { %v5960_v29 = vpop.permute.xlu0 %5959  ;;  %6661 = vmatprep.subr.bf16.mxu1 %v5818_v57  ;;  %vm10295_vm11 = vmmov %vm10291_vm5 }
0x1019   :  { %v5972_v50 = vsel %vm10289_vm4, %v10088_v21, %v5960_v29  ;;  %v5973_v16 = vsel %vm10290_vm1, %v5960_v29, %v5962_v10  ;;  %vm10298_vm8 = vmmov %vm10291_vm5 }
0x101a   :  { %v6028_v46 = vpop.permute.xlu1 %6027  ;;  %6296 = vmatprep.subr.bf16.mxu0 %v5973_v16  ;;  %vm10299_vm7 = vmmov %vm10291_vm5 }
0x101b   :  { %6662 = vmatpush3.bf16.msra.mxu1 %v10052_v22  ;;  %6297 = vmatpush1.bf16.msra.mxu0 %v5972_v50 }
0x101c   :  { %v6026_v51 = vpop.permute.xlu0 %6025  ;;  %6663 = vmatprep.subr.bf16.mxu1 %v5891_v45 }
0x101d   :  { %v6045_v5 = vsel %vm10291_vm5, %v9876_v13, %v6026_v51  ;;  %v6046_v48 = vsel %vm10292_vm9, %v6026_v51, %v6028_v46 }
0x101e   :  { %v5640_v53 = vpop.permute.xlu1 %5639  ;;  %6299 = vmatmul.mubr.bf16.vlgmr.msra.gmra.mrb[60].mxu0 %v10095_v56  ;;  %6307 = vmatprep.subr.bf16.mxu0 %v6046_v48 }
0x101f   :  { %v5657_v14 = vsel %vm216_vm2, %v9950_v58, %v5640_v53  ;;  %6664 = vmatpush3.bf16.msra.mxu1 %v5579_v0  ;;  %6308 = vmatpush1.bf16.msra.mxu0 %v6045_v5 }
0x1020   :  { %v5952_v34 = vpop.permute.xlu0 %5951  ;;  %6665 = vmatprep.subr.bf16.mxu1 %v5896_v47  ;;  %6339 = vmatprep.mubr.bf16.mxu0 %v10216_v28 }
0x1021   :  { %v5969_v22 = vsel %vm10293_vm12, %v10030_v35, %v5952_v34 }
0x1022   :  { %v6040_v32 = vpop.permute.xlu1 %6039 }
0x1023   :  { %6666 = vmatpush3.bf16.msra.mxu1 %v5584_v7 }
0x1024   :  { %v6038_v13 = vpop.permute.xlu0 %6037  ;;  %6667 = vmatprep.subr.bf16.mxu1 %v5969_v22 }
0x1025   :  { %v6050_v52 = vsel %vm10294_vm13, %v10107_v26, %v6038_v13  ;;  %v6051_v9 = vsel %vm10295_vm11, %v6038_v13, %v6040_v32 }
0x1026   :  { %v5652_v59 = vpop.permute.xlu1 %5651  ;;  %6309 = vmatprep.subr.bf16.mxu0 %v6051_v9 }
0x1027   :  { %v5662_v58 = vsel %vm216_vm2, %v10078_v25, %v5652_v59  ;;  %6668 = vmatpush3.bf16.msra.mxu1 %v5657_v14  ;;  %6310 = vmatpush1.bf16.msra.mxu0 %v6050_v52  ;;  %vm10300_vm2 = vmmov %vm10288_vm3 }
0x1028   :  { %v5964_v28 = vpop.permute.xlu0 %5963  ;;  %6718 = vmatprep.subr.bf16.mxu0 %v6904_v27 }
0x1029   :  { %v5974_v35 = vsel %vm10296_vm15, %v5962_v10, %v5964_v28 }
0x102a   :  { %v6042_v8 = vpop.permute.xlu1 %6041  ;;  %6669 = vmatprep.subr.bf16.mxu1 %v5974_v35  ;;  %6550 = vmatmul.mubr.msk.bf16.vlgmr.msra.gmra.mrb[60].mxu0 %vm10297_vm10, %v10122_v39 }
0x102b   :  { %v6052_v17 = vsel %vm10298_vm8, %v6040_v32, %v6042_v8  ;;  %6670 = vmatpush3.bf16.msra.mxu1 %v5662_v58  ;;  %6722 = vmatprep.mubr.msk.bf16.mxu0 %vm6905_vm0, %v6904_v27 }
0x102c   :  { %v6030_v42 = vpop.permute.xlu0 %6029 }
0x102d   :  { %v6047_v2 = vsel %vm10299_vm7, %v6028_v46, %v6030_v42 }
0x102e   :  { %6719 = vmatpush3.bf16.msra.mxu0 %v6047_v2  ;;  %6381 = vmatmul.mubr.bf16.vlgmr.msra.gmra.mrb[56].mxu1 %v10095_v56 }
0x102f   :  { %6720 = vmatprep.subr.bf16.mxu0 %v6904_v27 }
0x1032   :  { %6721 = vmatpush3.bf16.msra.mxu0 %v6052_v17 }
0x1035   :  { %6723 = vmatmul.mubr.msk.bf16.vlgmr.msra.gmra.mrb[64].mxu0 %vm10300_vm2, %v10122_v39 }
0x103d   :  { %v6169_v6 = vpop.permute.xlu0 %6168 }
0x10e1   :  { %v6259_v30 = vpop.f32.mrb[52].mxu1 }
0x10e2   :  { %v6734_v3 = vadd.f32 %v6259_v30, %v6169_v6  ;;  %v6261_v25 = vpop.f32.mrb[53].mxu1 }
0x10e3   :  { %v6735_v37 = vadd.f32 %v6261_v25, %v6169_v6  ;;  %v6263_v4 = vpop.f32.mrb[54].mxu1 }
0x10e4   :  { %6428 = vst [vmem:[#allocation4] sm:$0xff] %v6734_v3  ;;  %v6264_v31 = vpop.f32.mrb[55].mxu1 }
0x10e5   :  { %6429 = vst [vmem:[#allocation4 + $0x8] sm:$0xff] %v6735_v37 }
0x10fd   :  { %v6341_v62 = vpop.f32.mrb[60].mxu0 }
0x10fe   :  { %v6736_v49 = vadd.f32 %v6341_v62, %v6169_v6  ;;  %v6343_v21 = vpop.f32.mrb[61].mxu0 }
0x10ff   :  { %v6737_v11 = vadd.f32 %v6343_v21, %v6169_v6  ;;  %v6345_v20 = vpop.f32.mrb[62].mxu0 }
0x1100   :  { %6430 = vst [vmem:[#allocation4 + $0x10] sm:$0xff] %v6736_v49  ;;  %v6346_v56 = vpop.f32.mrb[63].mxu0 }
0x1101   :  { %6431 = vst [vmem:[#allocation4 + $0x18] sm:$0xff] %v6737_v11  ;;  %v6671_v18 = vpop.f32.mrb[56].mxu1 }
0x1102   :  { %v6672_v43 = vpop.f32.mrb[57].mxu1 }
0x1103   :  { %v6673_v63 = vadd.f32 %v6672_v43, %v6671_v18  ;;  %v6674_v1 = vpop.f32.mrb[58].mxu1 }
0x1104   :  { %v6675_v38 = vpop.f32.mrb[59].mxu1 }
0x1105   :  { %v6383_v24 = vadd.f32 %v6673_v63, %v6169_v6 }
0x1108   :  { %v6422_v26 = vpop.f32.mrb[64].mxu0 }
0x1109   :  { %v6423_v33 = vadd.f32 %v6422_v26, %v6383_v24  ;;  %v6724_v61 = vpop.f32.mrb[65].mxu0 }
0x110a   :  { %v6425_v60 = vpop.f32.mrb[66].mxu0 }
0x110b   :  { %6432 = vst [vmem:[#allocation4 + $0x20] sm:$0xff] %v6423_v33  ;;  %v6725_v55 = vpop.f32.mrb[67].mxu0 }
0x110c   :  { %6881 = shalt.err (!%p6878_p4)
}
0x110d   :  { %s6882_s19 = scalar_lea.hbm %s10199_s16, 640 }
0x110e   :  { %p6883_p5 = scmp.ne.s32.totalorder %s10199_s16, %s6882_s19  ;;  %p6886_p6 = scmp.lt.u32.totalorder %s6882_s19, %s10199_s16 }
0x1110   :  { %p6888_p7 = pnand %p6886_p6, %p6883_p5 }
0x1112   :  { %6891 = shalt.err (!%p6888_p7)
}
0x1113   :  { %6442 = dma.vmem_to_hbm [thread:$0]  %s6440_s28, 640, %s10199_s16, [#allocation5]  }
0x1114   :  { %6892 = dma.done.wait [#allocation5], 640  }
0x1115   :  { %6893 = vsyncadd [#allocation5], 4294966656 }
0x1116   :  { %6446 = vsyncpa [#allocation5], 1 }

</bundles_post_ra>
